<compile_context>
chip_gen: v7x
topology: tpu7x:2x2x1
jax: 0.10.0
libtpu: 0.0.40
codegen_flags: <defaults>
</compile_context>

<pallas_src>
import functools

import jax
import jax.numpy as jnp
from jax.experimental import pallas as pl
from jax.experimental.pallas import tpu as pltpu


# ----------------------------------------------------------------------------
# Kernels
# ----------------------------------------------------------------------------
def _sigmoid(z):
    # Single EUP tanh instead of exp + full-precision divide.
    return 0.5 * jnp.tanh(0.5 * z) + 0.5


def dqn_lstm_kernel(
    x_ref,            # (T*Bp, I)  bf16, time-major flattened (row = t*Bp + b)
    wih0_ref,         # (I, 4H)    bf16  layer-0 input weights (gate-permuted)
    whh0_ref,         # (H, 4H)    bf16  layer-0 recurrent weights
    b0_ref,           # (1, 4H)    f32   layer-0 combined bias (b_ih + b_hh)
    wl1_ref,          # (2H, 4H)   bf16  layer-1 FUSED [wih1; whh1] weights
    b1_ref,           # (1, 4H)    f32   layer-1 combined bias
    fw1_ref, fb1_ref,  # fc1: (H, H) bf16, (1, H) f32
    fw2_ref, fb2_ref,  # fc2: (H, H//2) bf16, (1, H//2) f32
    fw3_ref, fb3_ref,  # fc3 (lane-padded): (H//2, A_pad) bf16, (1, A_pad) f32
    out_ref,          # (Bp, A_pad) f32 — lane-dense store
    *, seq_len, batch_padded,
):
    T, B = seq_len, batch_padded
    H = whh0_ref.shape[0]
    G = 4 * H

    # ---- Hoisted layer-0 input projection: ONE MXU matmul + bias fold. -----
    # xg[t*B + b, :] are the input-driven pre-activations of layer 0 at step t.
    xg = (jnp.dot(x_ref[...], wih0_ref[...],
                  preferred_element_type=jnp.float32) + b0_ref[...])  # (T*B, G) f32

    whh0 = whh0_ref[...]
    wl1 = wl1_ref[...]
    b1 = jnp.broadcast_to(b1_ref[...], (B, G))   # hoisted broadcast (done once)

    def cell(gates, c):
        # Gate columns are pre-permuted to (i, f, o, g): one sigmoid over the
        # contiguous (B, 3H) slab, one tanh over the (B, H) g slab.
        s = _sigmoid(gates[:, :3 * H])
        g = jnp.tanh(gates[:, 3 * H:])
        i = s[:, 0 * H:1 * H]
        f = s[:, 1 * H:2 * H]
        o = s[:, 2 * H:3 * H]
        c_new = f * c + i * g
        h_new = o * jnp.tanh(c_new)
        return h_new, c_new

    zeros_f32 = jnp.zeros((B, H), jnp.float32)
    zeros_bf = jnp.zeros((B, H), jnp.bfloat16)
    c1, c2 = zeros_f32, zeros_f32
    h1_bf, h2_bf = zeros_bf, zeros_bf   # bf16 copies carried across steps

    # Fully unrolled time loop (T static & small): all slices are static and
    # sublane/lane aligned (B % 8 == 0, H % 128 == 0).
    for t in range(T):
        # Layer 0: only the recurrent matmul remains on the serial chain.
        gates0 = xg[t * B:(t + 1) * B, :] + jnp.dot(
            h1_bf, whh0, preferred_element_type=jnp.float32)
        h1, c1 = cell(gates0, c1)
        h1_bf = h1.astype(jnp.bfloat16)           # single cast, reused next step

        # Layer 1: fused [wih1; whh1] -> one K=2H MXU contraction.
        # (Inter-layer dropout is identity at inference.)
        hcat = jnp.concatenate([h1_bf, h2_bf], axis=1)   # (B, 2H) bf16
        gates1 = jnp.dot(hcat, wl1, preferred_element_type=jnp.float32) + b1
        h2, c2 = cell(gates1, c2)
        h2_bf = h2.astype(jnp.bfloat16)

    # ---- MLP head: relu(fc1) -> relu(fc2) -> fc3 (dropout = identity). -----
    y = jnp.maximum(
        jnp.dot(h2_bf, fw1_ref[...],
                preferred_element_type=jnp.float32) + fb1_ref[...], 0.0)
    y = jnp.maximum(
        jnp.dot(y.astype(jnp.bfloat16), fw2_ref[...],
                preferred_element_type=jnp.float32) + fb2_ref[...], 0.0)
    out_ref[...] = (
        jnp.dot(y.astype(jnp.bfloat16), fw3_ref[...],
                preferred_element_type=jnp.float32) + fb3_ref[...])


def dqn_mlp_kernel(
    x_ref,             # (Bp, I)       bf16
    w1_ref, b1_ref,    # (I, H) bf16, (1, H) f32
    w2_ref, b2_ref,    # (H, H//2) bf16, (1, H//2) f32
    w3_ref, b3_ref,    # (H//2, A_pad) bf16, (1, A_pad) f32
    out_ref,           # (Bp, A_pad) f32
):
    y = jnp.maximum(
        jnp.dot(x_ref[...], w1_ref[...],
                preferred_element_type=jnp.float32) + b1_ref[...], 0.0)
    y = jnp.maximum(
        jnp.dot(y.astype(jnp.bfloat16), w2_ref[...],
                preferred_element_type=jnp.float32) + b2_ref[...], 0.0)
    out_ref[...] = (
        jnp.dot(y.astype(jnp.bfloat16), w3_ref[...],
                preferred_element_type=jnp.float32) + fb3_or(b3_ref))


def fb3_or(b_ref):
    return b_ref[...]


# ----------------------------------------------------------------------------
# Parameter construction (deterministic, mimics PyTorch U(-1/sqrt(H), 1/sqrt(H)))
# Stored directly in kernel layout:
#   * bf16 weights transposed to (in, out),
#   * gate columns permuted (i,f,g,o) -> (i,f,o,g) for both LSTM layers,
#   * layer-1 wih/whh stacked into one (2H, 4H) fused weight,
#   * f32 biases (b_ih + b_hh combined), output layer zero-padded to 128 lanes.
# ----------------------------------------------------------------------------
def _permute_gates(w):
    """Reorder the last (4H) axis from PyTorch (i, f, g, o) to (i, f, o, g)."""
    Hn = w.shape[-1] // 4
    return jnp.concatenate(
        [w[..., :2 * Hn], w[..., 3 * Hn:], w[..., 2 * Hn:3 * Hn]], axis=-1)


def init_dqn_params(key, input_size, hidden_size, n_actions):
    H, I, A = hidden_size, input_size, n_actions
    A_pad = ((A + 127) // 128) * 128
    k = 1.0 / jnp.sqrt(jnp.float32(H))

    def u(key, shape):
        return jax.random.uniform(key, shape, jnp.float32, -k, k)

    def bf(w):
        return w.astype(jnp.bfloat16)

    def pad_out(w):  # zero-pad last dim to A_pad for lane-dense output stores
        return jnp.pad(w, [(0, 0)] * (w.ndim - 1) + [(0, A_pad - A)])

    keys = jax.random.split(key, 20)

    # Generate in PyTorch (i, f, g, o) convention, then permute once.
    wih0 = _permute_gates(u(keys[0], (I, 4 * H)))
    whh0 = _permute_gates(u(keys[1], (H, 4 * H)))
    b0 = _permute_gates(u(keys[2], (1, 4 * H)) + u(keys[3], (1, 4 * H)))
    wih1 = _permute_gates(u(keys[4], (H, 4 * H)))
    whh1 = _permute_gates(u(keys[5], (H, 4 * H)))
    b1 = _permute_gates(u(keys[6], (1, 4 * H)) + u(keys[7], (1, 4 * H)))

    p = {
        # LSTM layer 0
        "wih0": bf(wih0),
        "whh0": bf(whh0),
        "b0": b0,
        # LSTM layer 1: fused [wih1; whh1] -> (2H, 4H)
        "wl1": bf(jnp.concatenate([wih1, whh1], axis=0)),
        "b1": b1,
        # fc head
        "fw1": bf(u(keys[8], (H, H))), "fb1": u(keys[9], (1, H)),
        "fw2": bf(u(keys[10], (H, H // 2))), "fb2": u(keys[11], (1, H // 2)),
        "fw3": bf(pad_out(u(keys[12], (H // 2, A)))),
        "fb3": pad_out(u(keys[13], (1, A))),
        # simple_fc path
        "sw1": bf(u(keys[14], (I, H))), "sb1": u(keys[15], (1, H)),
        "sw2": bf(u(keys[16], (H, H // 2))), "sb2": u(keys[17], (1, H // 2)),
        "sw3": bf(pad_out(u(keys[18], (H // 2, A)))),
        "sb3": pad_out(u(keys[19], (1, A))),
    }
    return p


# ----------------------------------------------------------------------------
# Wrappers
# ----------------------------------------------------------------------------
_VMEM = pl.BlockSpec(memory_space=pltpu.MemorySpace.VMEM)
_COMPILER_PARAMS = pltpu.CompilerParams(vmem_limit_bytes=32 << 20)


def _pad_batch(n):
    return ((n + 7) // 8) * 8   # sublane multiple


@functools.partial(jax.jit, static_argnames=("n_actions",))
def dqn_forward_seq(x, params, n_actions=4):
    """3-D branch: x is (B, T, I) batch-first, returns (B, n_actions)."""
    B, T, I = x.shape
    Bp = _pad_batch(B)
    A_pad = params["fb3"].shape[1]
    # Time-major flatten with batch padded to a sublane multiple (row = t*Bp+b).
    # TODO(synk): have callers supply time-major input so this transpose isn't
    # a separate HBM round-trip once T*B*I grows.
    x_tm = jnp.swapaxes(x, 0, 1)                          # (T, B, I)
    x_tm = jnp.pad(x_tm, ((0, 0), (0, Bp - B), (0, 0)))   # (T, Bp, I)
    x_tm = x_tm.reshape(T * Bp, I).astype(jnp.bfloat16)
    args = (
        x_tm,
        params["wih0"], params["whh0"], params["b0"],
        params["wl1"], params["b1"],
        params["fw1"], params["fb1"],
        params["fw2"], params["fb2"],
        params["fw3"], params["fb3"],
    )
    # Single grid-less call: the whole model is one kernel (per-call overhead is
    # the same order as the compute at these shapes).
    # TODO(synk): for large batch on v7x, add a batch grid axis with
    # dimension_semantics=("parallel",) to use both TensorCores.
    out = pl.pallas_call(
        functools.partial(dqn_lstm_kernel, seq_len=T, batch_padded=Bp),
        out_shape=jax.ShapeDtypeStruct((Bp, A_pad), jnp.float32),
        in_specs=[_VMEM] * len(args),
        out_specs=_VMEM,
        compiler_params=_COMPILER_PARAMS,
    )(*args)
    return out[:B, :n_actions]


@functools.partial(jax.jit, static_argnames=("n_actions",))
def dqn_forward_flat(x, params, n_actions=4):
    """2-D branch: x is (B, I), returns (B, n_actions)."""
    B, I = x.shape
    Bp = _pad_batch(B)
    A_pad = params["sb3"].shape[1]
    x_p = jnp.pad(x, ((0, Bp - B), (0, 0))).astype(jnp.bfloat16)
    args = (
        x_p,
        params["sw1"], params["sb1"],
        params["sw2"], params["sb2"],
        params["sw3"], params["sb3"],
    )
    out = pl.pallas_call(
        dqn_mlp_kernel,
        out_shape=jax.ShapeDtypeStruct((Bp, A_pad), jnp.float32),
        in_specs=[_VMEM] * len(args),
        out_specs=_VMEM,
        compiler_params=_COMPILER_PARAMS,
    )(*args)
    return out[:B, :n_actions]


def dqn_forward(x, params, n_actions=4):
    if x.ndim == 2:
        return dqn_forward_flat(x, params, n_actions=n_actions)
    elif x.ndim == 3:
        return dqn_forward_seq(x, params, n_actions=n_actions)
    raise ValueError(f"Unexpected input dimension: {x.ndim}. Expected 2D or 3D input.")


# ----------------------------------------------------------------------------
# Main
# ----------------------------------------------------------------------------
if __name__ == "__main__":
    input_size = 15
    hidden_size = 128     # multiple of 128 -> lane-aligned gate slices
                          # (module default 256 is also lane-aligned)
    n_actions = 4
    batch, seq = 2, 8

    key = jax.random.PRNGKey(0)
    kp, kx2, kx3 = jax.random.split(key, 3)
    params = init_dqn_params(kp, input_size, hidden_size, n_actions)

    # 3-D (LSTM) branch
    x3 = jax.random.normal(kx3, (batch, seq, input_size), jnp.float32)
    q3 = dqn_forward(x3, params, n_actions=n_actions)
    jax.block_until_ready(q3)
    assert q3.shape == (batch, n_actions)
    assert bool(jnp.all(jnp.isfinite(q3)))

    # 2-D (simple MLP) branch
    x2 = jax.random.normal(kx2, (batch, input_size), jnp.float32)
    q2 = dqn_forward(x2, params, n_actions=n_actions)
    jax.block_until_ready(q2)
    assert q2.shape == (batch, n_actions)
    assert bool(jnp.all(jnp.isfinite(q2)))

    print("KERNEL_OK")
</pallas_src>

<mosaic_0001>
module attributes {stable_mosaic.version = 11 : i64} {
  func.func @dqn_lstm_kernel(%arg0: memref<64x15xbf16, #tpu.memory_space<vmem>>, %arg1: memref<15x512xbf16, #tpu.memory_space<vmem>>, %arg2: memref<128x512xbf16, #tpu.memory_space<vmem>>, %arg3: memref<1x512xf32, #tpu.memory_space<vmem>>, %arg4: memref<256x512xbf16, #tpu.memory_space<vmem>>, %arg5: memref<1x512xf32, #tpu.memory_space<vmem>>, %arg6: memref<128x128xbf16, #tpu.memory_space<vmem>>, %arg7: memref<1x128xf32, #tpu.memory_space<vmem>>, %arg8: memref<128x64xbf16, #tpu.memory_space<vmem>>, %arg9: memref<1x64xf32, #tpu.memory_space<vmem>>, %arg10: memref<64x128xbf16, #tpu.memory_space<vmem>>, %arg11: memref<1x128xf32, #tpu.memory_space<vmem>>, %arg12: memref<8x128xf32, #tpu.memory_space<vmem>>) attributes {dimension_semantics = [], scalar_prefetch = 0 : i64, scratch_operands = 0 : i64, tpu.core_type = #tpu.core_type<tc>} {
    %c0 = arith.constant 0 : index
    %c0_0 = arith.constant 0 : index
    %0 = vector.load %arg0[%c0, %c0_0] : memref<64x15xbf16, #tpu.memory_space<vmem>>, vector<64x15xbf16>
    %c0_1 = arith.constant 0 : index
    %c0_2 = arith.constant 0 : index
    %1 = vector.load %arg1[%c0_1, %c0_2] : memref<15x512xbf16, #tpu.memory_space<vmem>>, vector<15x512xbf16>
    %cst = arith.constant dense<0.000000e+00> : vector<64x512xf32>
    %2 = tpu.matmul %0, %1, %cst {dimension_numbers = #tpu.dot_dimension_numbers<[1], [0], [0], [1], [0, 0, 1, 1], [], []>} : vector<64x15xbf16>, vector<15x512xbf16>, vector<64x512xf32> -> vector<64x512xf32>
    %c0_3 = arith.constant 0 : index
    %c0_4 = arith.constant 0 : index
    %3 = vector.load %arg3[%c0_3, %c0_4] : memref<1x512xf32, #tpu.memory_space<vmem>>, vector<1x512xf32>
    %4 = vector.broadcast %3 : vector<1x512xf32> to vector<64x512xf32>
    %5 = arith.addf %2, %4 : vector<64x512xf32>
    %c0_5 = arith.constant 0 : index
    %c0_6 = arith.constant 0 : index
    %6 = vector.load %arg2[%c0_5, %c0_6] : memref<128x512xbf16, #tpu.memory_space<vmem>>, vector<128x512xbf16>
    %c0_7 = arith.constant 0 : index
    %c0_8 = arith.constant 0 : index
    %7 = vector.load %arg4[%c0_7, %c0_8] : memref<256x512xbf16, #tpu.memory_space<vmem>>, vector<256x512xbf16>
    %c0_9 = arith.constant 0 : index
    %c0_10 = arith.constant 0 : index
    %8 = vector.load %arg5[%c0_9, %c0_10] : memref<1x512xf32, #tpu.memory_space<vmem>>, vector<1x512xf32>
    %9 = vector.shape_cast %8 : vector<1x512xf32> to vector<1x512xf32>
    %10 = vector.broadcast %9 : vector<1x512xf32> to vector<8x512xf32>
    %cst_11 = arith.constant 0.000000e+00 : f32
    %11 = vector.broadcast %cst_11 : f32 to vector<8x128xf32>
    %cst_12 = arith.constant 0.000000e+00 : bf16
    %12 = vector.broadcast %cst_12 : bf16 to vector<8x128xbf16>
    %13 = vector.extract_strided_slice %5 {offsets = [0, 0], sizes = [8, 512], strides = [1, 1]} : vector<64x512xf32> to vector<8x512xf32>
    %cst_13 = arith.constant dense<0.000000e+00> : vector<8x512xf32>
    %14 = tpu.matmul %12, %6, %cst_13 {dimension_numbers = #tpu.dot_dimension_numbers<[1], [0], [0], [1], [0, 0, 1, 1], [], []>} : vector<8x128xbf16>, vector<128x512xbf16>, vector<8x512xf32> -> vector<8x512xf32>
    %15 = arith.addf %13, %14 : vector<8x512xf32>
    %16 = vector.extract_strided_slice %15 {offsets = [0, 0], sizes = [8, 384], strides = [1, 1]} : vector<8x512xf32> to vector<8x384xf32>
    %cst_14 = arith.constant 5.000000e-01 : f32
    %17 = vector.broadcast %cst_14 : f32 to vector<8x384xf32>
    %18 = arith.mulf %17, %16 : vector<8x384xf32>
    %19 = math.tanh %18 : vector<8x384xf32>
    %cst_15 = arith.constant 5.000000e-01 : f32
    %20 = vector.broadcast %cst_15 : f32 to vector<8x384xf32>
    %21 = arith.mulf %20, %19 : vector<8x384xf32>
    %cst_16 = arith.constant 5.000000e-01 : f32
    %22 = vector.broadcast %cst_16 : f32 to vector<8x384xf32>
    %23 = arith.addf %21, %22 : vector<8x384xf32>
    %24 = vector.extract_strided_slice %15 {offsets = [0, 384], sizes = [8, 128], strides = [1, 1]} : vector<8x512xf32> to vector<8x128xf32>
    %25 = math.tanh %24 : vector<8x128xf32>
    %26 = vector.extract_strided_slice %23 {offsets = [0, 0], sizes = [8, 128], strides = [1, 1]} : vector<8x384xf32> to vector<8x128xf32>
    %27 = vector.extract_strided_slice %23 {offsets = [0, 128], sizes = [8, 128], strides = [1, 1]} : vector<8x384xf32> to vector<8x128xf32>
    %28 = vector.extract_strided_slice %23 {offsets = [0, 256], sizes = [8, 128], strides = [1, 1]} : vector<8x384xf32> to vector<8x128xf32>
    %29 = arith.mulf %27, %11 : vector<8x128xf32>
    %30 = arith.mulf %26, %25 : vector<8x128xf32>
    %31 = arith.addf %29, %30 : vector<8x128xf32>
    %32 = math.tanh %31 : vector<8x128xf32>
    %33 = arith.mulf %28, %32 : vector<8x128xf32>
    %34 = arith.truncf %33 : vector<8x128xf32> to vector<8x128xbf16>
    %35 = tpu.concatenate %34, %12 in 1 : vector<8x128xbf16>, vector<8x128xbf16> -> vector<8x256xbf16>
    %cst_17 = arith.constant dense<0.000000e+00> : vector<8x512xf32>
    %36 = tpu.matmul %35, %7, %cst_17 {dimension_numbers = #tpu.dot_dimension_numbers<[1], [0], [0], [1], [0, 0, 1, 1], [], []>} : vector<8x256xbf16>, vector<256x512xbf16>, vector<8x512xf32> -> vector<8x512xf32>
    %37 = arith.addf %36, %10 : vector<8x512xf32>
    %38 = vector.extract_strided_slice %37 {offsets = [0, 0], sizes = [8, 384], strides = [1, 1]} : vector<8x512xf32> to vector<8x384xf32>
    %cst_18 = arith.constant 5.000000e-01 : f32
    %39 = vector.broadcast %cst_18 : f32 to vector<8x384xf32>
    %40 = arith.mulf %39, %38 : vector<8x384xf32>
    %41 = math.tanh %40 : vector<8x384xf32>
    %cst_19 = arith.constant 5.000000e-01 : f32
    %42 = vector.broadcast %cst_19 : f32 to vector<8x384xf32>
    %43 = arith.mulf %42, %41 : vector<8x384xf32>
    %cst_20 = arith.constant 5.000000e-01 : f32
    %44 = vector.broadcast %cst_20 : f32 to vector<8x384xf32>
    %45 = arith.addf %43, %44 : vector<8x384xf32>
    %46 = vector.extract_strided_slice %37 {offsets = [0, 384], sizes = [8, 128], strides = [1, 1]} : vector<8x512xf32> to vector<8x128xf32>
    %47 = math.tanh %46 : vector<8x128xf32>
    %48 = vector.extract_strided_slice %45 {offsets = [0, 0], sizes = [8, 128], strides = [1, 1]} : vector<8x384xf32> to vector<8x128xf32>
    %49 = vector.extract_strided_slice %45 {offsets = [0, 128], sizes = [8, 128], strides = [1, 1]} : vector<8x384xf32> to vector<8x128xf32>
    %50 = vector.extract_strided_slice %45 {offsets = [0, 256], sizes = [8, 128], strides = [1, 1]} : vector<8x384xf32> to vector<8x128xf32>
    %51 = arith.mulf %49, %11 : vector<8x128xf32>
    %52 = arith.mulf %48, %47 : vector<8x128xf32>
    %53 = arith.addf %51, %52 : vector<8x128xf32>
    %54 = math.tanh %53 : vector<8x128xf32>
    %55 = arith.mulf %50, %54 : vector<8x128xf32>
    %56 = arith.truncf %55 : vector<8x128xf32> to vector<8x128xbf16>
    %57 = vector.extract_strided_slice %5 {offsets = [8, 0], sizes = [8, 512], strides = [1, 1]} : vector<64x512xf32> to vector<8x512xf32>
    %cst_21 = arith.constant dense<0.000000e+00> : vector<8x512xf32>
    %58 = tpu.matmul %34, %6, %cst_21 {dimension_numbers = #tpu.dot_dimension_numbers<[1], [0], [0], [1], [0, 0, 1, 1], [], []>} : vector<8x128xbf16>, vector<128x512xbf16>, vector<8x512xf32> -> vector<8x512xf32>
    %59 = arith.addf %57, %58 : vector<8x512xf32>
    %60 = vector.extract_strided_slice %59 {offsets = [0, 0], sizes = [8, 384], strides = [1, 1]} : vector<8x512xf32> to vector<8x384xf32>
    %cst_22 = arith.constant 5.000000e-01 : f32
    %61 = vector.broadcast %cst_22 : f32 to vector<8x384xf32>
    %62 = arith.mulf %61, %60 : vector<8x384xf32>
    %63 = math.tanh %62 : vector<8x384xf32>
    %cst_23 = arith.constant 5.000000e-01 : f32
    %64 = vector.broadcast %cst_23 : f32 to vector<8x384xf32>
    %65 = arith.mulf %64, %63 : vector<8x384xf32>
    %cst_24 = arith.constant 5.000000e-01 : f32
    %66 = vector.broadcast %cst_24 : f32 to vector<8x384xf32>
    %67 = arith.addf %65, %66 : vector<8x384xf32>
    %68 = vector.extract_strided_slice %59 {offsets = [0, 384], sizes = [8, 128], strides = [1, 1]} : vector<8x512xf32> to vector<8x128xf32>
    %69 = math.tanh %68 : vector<8x128xf32>
    %70 = vector.extract_strided_slice %67 {offsets = [0, 0], sizes = [8, 128], strides = [1, 1]} : vector<8x384xf32> to vector<8x128xf32>
    %71 = vector.extract_strided_slice %67 {offsets = [0, 128], sizes = [8, 128], strides = [1, 1]} : vector<8x384xf32> to vector<8x128xf32>
    %72 = vector.extract_strided_slice %67 {offsets = [0, 256], sizes = [8, 128], strides = [1, 1]} : vector<8x384xf32> to vector<8x128xf32>
    %73 = arith.mulf %71, %31 : vector<8x128xf32>
    %74 = arith.mulf %70, %69 : vector<8x128xf32>
    %75 = arith.addf %73, %74 : vector<8x128xf32>
    %76 = math.tanh %75 : vector<8x128xf32>
    %77 = arith.mulf %72, %76 : vector<8x128xf32>
    %78 = arith.truncf %77 : vector<8x128xf32> to vector<8x128xbf16>
    %79 = tpu.concatenate %78, %56 in 1 : vector<8x128xbf16>, vector<8x128xbf16> -> vector<8x256xbf16>
    %cst_25 = arith.constant dense<0.000000e+00> : vector<8x512xf32>
    %80 = tpu.matmul %79, %7, %cst_25 {dimension_numbers = #tpu.dot_dimension_numbers<[1], [0], [0], [1], [0, 0, 1, 1], [], []>} : vector<8x256xbf16>, vector<256x512xbf16>, vector<8x512xf32> -> vector<8x512xf32>
    %81 = arith.addf %80, %10 : vector<8x512xf32>
    %82 = vector.extract_strided_slice %81 {offsets = [0, 0], sizes = [8, 384], strides = [1, 1]} : vector<8x512xf32> to vector<8x384xf32>
    %cst_26 = arith.constant 5.000000e-01 : f32
    %83 = vector.broadcast %cst_26 : f32 to vector<8x384xf32>
    %84 = arith.mulf %83, %82 : vector<8x384xf32>
    %85 = math.tanh %84 : vector<8x384xf32>
    %cst_27 = arith.constant 5.000000e-01 : f32
    %86 = vector.broadcast %cst_27 : f32 to vector<8x384xf32>
    %87 = arith.mulf %86, %85 : vector<8x384xf32>
    %cst_28 = arith.constant 5.000000e-01 : f32
    %88 = vector.broadcast %cst_28 : f32 to vector<8x384xf32>
    %89 = arith.addf %87, %88 : vector<8x384xf32>
    %90 = vector.extract_strided_slice %81 {offsets = [0, 384], sizes = [8, 128], strides = [1, 1]} : vector<8x512xf32> to vector<8x128xf32>
    %91 = math.tanh %90 : vector<8x128xf32>
    %92 = vector.extract_strided_slice %89 {offsets = [0, 0], sizes = [8, 128], strides = [1, 1]} : vector<8x384xf32> to vector<8x128xf32>
    %93 = vector.extract_strided_slice %89 {offsets = [0, 128], sizes = [8, 128], strides = [1, 1]} : vector<8x384xf32> to vector<8x128xf32>
    %94 = vector.extract_strided_slice %89 {offsets = [0, 256], sizes = [8, 128], strides = [1, 1]} : vector<8x384xf32> to vector<8x128xf32>
    %95 = arith.mulf %93, %53 : vector<8x128xf32>
    %96 = arith.mulf %92, %91 : vector<8x128xf32>
    %97 = arith.addf %95, %96 : vector<8x128xf32>
    %98 = math.tanh %97 : vector<8x128xf32>
    %99 = arith.mulf %94, %98 : vector<8x128xf32>
    %100 = arith.truncf %99 : vector<8x128xf32> to vector<8x128xbf16>
    %101 = vector.extract_strided_slice %5 {offsets = [16, 0], sizes = [8, 512], strides = [1, 1]} : vector<64x512xf32> to vector<8x512xf32>
    %cst_29 = arith.constant dense<0.000000e+00> : vector<8x512xf32>
    %102 = tpu.matmul %78, %6, %cst_29 {dimension_numbers = #tpu.dot_dimension_numbers<[1], [0], [0], [1], [0, 0, 1, 1], [], []>} : vector<8x128xbf16>, vector<128x512xbf16>, vector<8x512xf32> -> vector<8x512xf32>
    %103 = arith.addf %101, %102 : vector<8x512xf32>
    %104 = vector.extract_strided_slice %103 {offsets = [0, 0], sizes = [8, 384], strides = [1, 1]} : vector<8x512xf32> to vector<8x384xf32>
    %cst_30 = arith.constant 5.000000e-01 : f32
    %105 = vector.broadcast %cst_30 : f32 to vector<8x384xf32>
    %106 = arith.mulf %105, %104 : vector<8x384xf32>
    %107 = math.tanh %106 : vector<8x384xf32>
    %cst_31 = arith.constant 5.000000e-01 : f32
    %108 = vector.broadcast %cst_31 : f32 to vector<8x384xf32>
    %109 = arith.mulf %108, %107 : vector<8x384xf32>
    %cst_32 = arith.constant 5.000000e-01 : f32
    %110 = vector.broadcast %cst_32 : f32 to vector<8x384xf32>
    %111 = arith.addf %109, %110 : vector<8x384xf32>
    %112 = vector.extract_strided_slice %103 {offsets = [0, 384], sizes = [8, 128], strides = [1, 1]} : vector<8x512xf32> to vector<8x128xf32>
    %113 = math.tanh %112 : vector<8x128xf32>
    %114 = vector.extract_strided_slice %111 {offsets = [0, 0], sizes = [8, 128], strides = [1, 1]} : vector<8x384xf32> to vector<8x128xf32>
    %115 = vector.extract_strided_slice %111 {offsets = [0, 128], sizes = [8, 128], strides = [1, 1]} : vector<8x384xf32> to vector<8x128xf32>
    %116 = vector.extract_strided_slice %111 {offsets = [0, 256], sizes = [8, 128], strides = [1, 1]} : vector<8x384xf32> to vector<8x128xf32>
    %117 = arith.mulf %115, %75 : vector<8x128xf32>
    %118 = arith.mulf %114, %113 : vector<8x128xf32>
    %119 = arith.addf %117, %118 : vector<8x128xf32>
    %120 = math.tanh %119 : vector<8x128xf32>
    %121 = arith.mulf %116, %120 : vector<8x128xf32>
    %122 = arith.truncf %121 : vector<8x128xf32> to vector<8x128xbf16>
    %123 = tpu.concatenate %122, %100 in 1 : vector<8x128xbf16>, vector<8x128xbf16> -> vector<8x256xbf16>
    %cst_33 = arith.constant dense<0.000000e+00> : vector<8x512xf32>
    %124 = tpu.matmul %123, %7, %cst_33 {dimension_numbers = #tpu.dot_dimension_numbers<[1], [0], [0], [1], [0, 0, 1, 1], [], []>} : vector<8x256xbf16>, vector<256x512xbf16>, vector<8x512xf32> -> vector<8x512xf32>
    %125 = arith.addf %124, %10 : vector<8x512xf32>
    %126 = vector.extract_strided_slice %125 {offsets = [0, 0], sizes = [8, 384], strides = [1, 1]} : vector<8x512xf32> to vector<8x384xf32>
    %cst_34 = arith.constant 5.000000e-01 : f32
    %127 = vector.broadcast %cst_34 : f32 to vector<8x384xf32>
    %128 = arith.mulf %127, %126 : vector<8x384xf32>
    %129 = math.tanh %128 : vector<8x384xf32>
    %cst_35 = arith.constant 5.000000e-01 : f32
    %130 = vector.broadcast %cst_35 : f32 to vector<8x384xf32>
    %131 = arith.mulf %130, %129 : vector<8x384xf32>
    %cst_36 = arith.constant 5.000000e-01 : f32
    %132 = vector.broadcast %cst_36 : f32 to vector<8x384xf32>
    %133 = arith.addf %131, %132 : vector<8x384xf32>
    %134 = vector.extract_strided_slice %125 {offsets = [0, 384], sizes = [8, 128], strides = [1, 1]} : vector<8x512xf32> to vector<8x128xf32>
    %135 = math.tanh %134 : vector<8x128xf32>
    %136 = vector.extract_strided_slice %133 {offsets = [0, 0], sizes = [8, 128], strides = [1, 1]} : vector<8x384xf32> to vector<8x128xf32>
    %137 = vector.extract_strided_slice %133 {offsets = [0, 128], sizes = [8, 128], strides = [1, 1]} : vector<8x384xf32> to vector<8x128xf32>
    %138 = vector.extract_strided_slice %133 {offsets = [0, 256], sizes = [8, 128], strides = [1, 1]} : vector<8x384xf32> to vector<8x128xf32>
    %139 = arith.mulf %137, %97 : vector<8x128xf32>
    %140 = arith.mulf %136, %135 : vector<8x128xf32>
    %141 = arith.addf %139, %140 : vector<8x128xf32>
    %142 = math.tanh %141 : vector<8x128xf32>
    %143 = arith.mulf %138, %142 : vector<8x128xf32>
    %144 = arith.truncf %143 : vector<8x128xf32> to vector<8x128xbf16>
    %145 = vector.extract_strided_slice %5 {offsets = [24, 0], sizes = [8, 512], strides = [1, 1]} : vector<64x512xf32> to vector<8x512xf32>
    %cst_37 = arith.constant dense<0.000000e+00> : vector<8x512xf32>
    %146 = tpu.matmul %122, %6, %cst_37 {dimension_numbers = #tpu.dot_dimension_numbers<[1], [0], [0], [1], [0, 0, 1, 1], [], []>} : vector<8x128xbf16>, vector<128x512xbf16>, vector<8x512xf32> -> vector<8x512xf32>
    %147 = arith.addf %145, %146 : vector<8x512xf32>
    %148 = vector.extract_strided_slice %147 {offsets = [0, 0], sizes = [8, 384], strides = [1, 1]} : vector<8x512xf32> to vector<8x384xf32>
    %cst_38 = arith.constant 5.000000e-01 : f32
    %149 = vector.broadcast %cst_38 : f32 to vector<8x384xf32>
    %150 = arith.mulf %149, %148 : vector<8x384xf32>
    %151 = math.tanh %150 : vector<8x384xf32>
    %cst_39 = arith.constant 5.000000e-01 : f32
    %152 = vector.broadcast %cst_39 : f32 to vector<8x384xf32>
    %153 = arith.mulf %152, %151 : vector<8x384xf32>
    %cst_40 = arith.constant 5.000000e-01 : f32
    %154 = vector.broadcast %cst_40 : f32 to vector<8x384xf32>
    %155 = arith.addf %153, %154 : vector<8x384xf32>
    %156 = vector.extract_strided_slice %147 {offsets = [0, 384], sizes = [8, 128], strides = [1, 1]} : vector<8x512xf32> to vector<8x128xf32>
    %157 = math.tanh %156 : vector<8x128xf32>
    %158 = vector.extract_strided_slice %155 {offsets = [0, 0], sizes = [8, 128], strides = [1, 1]} : vector<8x384xf32> to vector<8x128xf32>
    %159 = vector.extract_strided_slice %155 {offsets = [0, 128], sizes = [8, 128], strides = [1, 1]} : vector<8x384xf32> to vector<8x128xf32>
    %160 = vector.extract_strided_slice %155 {offsets = [0, 256], sizes = [8, 128], strides = [1, 1]} : vector<8x384xf32> to vector<8x128xf32>
    %161 = arith.mulf %159, %119 : vector<8x128xf32>
    %162 = arith.mulf %158, %157 : vector<8x128xf32>
    %163 = arith.addf %161, %162 : vector<8x128xf32>
    %164 = math.tanh %163 : vector<8x128xf32>
    %165 = arith.mulf %160, %164 : vector<8x128xf32>
    %166 = arith.truncf %165 : vector<8x128xf32> to vector<8x128xbf16>
    %167 = tpu.concatenate %166, %144 in 1 : vector<8x128xbf16>, vector<8x128xbf16> -> vector<8x256xbf16>
    %cst_41 = arith.constant dense<0.000000e+00> : vector<8x512xf32>
    %168 = tpu.matmul %167, %7, %cst_41 {dimension_numbers = #tpu.dot_dimension_numbers<[1], [0], [0], [1], [0, 0, 1, 1], [], []>} : vector<8x256xbf16>, vector<256x512xbf16>, vector<8x512xf32> -> vector<8x512xf32>
    %169 = arith.addf %168, %10 : vector<8x512xf32>
    %170 = vector.extract_strided_slice %169 {offsets = [0, 0], sizes = [8, 384], strides = [1, 1]} : vector<8x512xf32> to vector<8x384xf32>
    %cst_42 = arith.constant 5.000000e-01 : f32
    %171 = vector.broadcast %cst_42 : f32 to vector<8x384xf32>
    %172 = arith.mulf %171, %170 : vector<8x384xf32>
    %173 = math.tanh %172 : vector<8x384xf32>
    %cst_43 = arith.constant 5.000000e-01 : f32
    %174 = vector.broadcast %cst_43 : f32 to vector<8x384xf32>
    %175 = arith.mulf %174, %173 : vector<8x384xf32>
    %cst_44 = arith.constant 5.000000e-01 : f32
    %176 = vector.broadcast %cst_44 : f32 to vector<8x384xf32>
    %177 = arith.addf %175, %176 : vector<8x384xf32>
    %178 = vector.extract_strided_slice %169 {offsets = [0, 384], sizes = [8, 128], strides = [1, 1]} : vector<8x512xf32> to vector<8x128xf32>
    %179 = math.tanh %178 : vector<8x128xf32>
    %180 = vector.extract_strided_slice %177 {offsets = [0, 0], sizes = [8, 128], strides = [1, 1]} : vector<8x384xf32> to vector<8x128xf32>
    %181 = vector.extract_strided_slice %177 {offsets = [0, 128], sizes = [8, 128], strides = [1, 1]} : vector<8x384xf32> to vector<8x128xf32>
    %182 = vector.extract_strided_slice %177 {offsets = [0, 256], sizes = [8, 128], strides = [1, 1]} : vector<8x384xf32> to vector<8x128xf32>
    %183 = arith.mulf %181, %141 : vector<8x128xf32>
    %184 = arith.mulf %180, %179 : vector<8x128xf32>
    %185 = arith.addf %183, %184 : vector<8x128xf32>
    %186 = math.tanh %185 : vector<8x128xf32>
    %187 = arith.mulf %182, %186 : vector<8x128xf32>
    %188 = arith.truncf %187 : vector<8x128xf32> to vector<8x128xbf16>
    %189 = vector.extract_strided_slice %5 {offsets = [32, 0], sizes = [8, 512], strides = [1, 1]} : vector<64x512xf32> to vector<8x512xf32>
    %cst_45 = arith.constant dense<0.000000e+00> : vector<8x512xf32>
    %190 = tpu.matmul %166, %6, %cst_45 {dimension_numbers = #tpu.dot_dimension_numbers<[1], [0], [0], [1], [0, 0, 1, 1], [], []>} : vector<8x128xbf16>, vector<128x512xbf16>, vector<8x512xf32> -> vector<8x512xf32>
    %191 = arith.addf %189, %190 : vector<8x512xf32>
    %192 = vector.extract_strided_slice %191 {offsets = [0, 0], sizes = [8, 384], strides = [1, 1]} : vector<8x512xf32> to vector<8x384xf32>
    %cst_46 = arith.constant 5.000000e-01 : f32
    %193 = vector.broadcast %cst_46 : f32 to vector<8x384xf32>
    %194 = arith.mulf %193, %192 : vector<8x384xf32>
    %195 = math.tanh %194 : vector<8x384xf32>
    %cst_47 = arith.constant 5.000000e-01 : f32
    %196 = vector.broadcast %cst_47 : f32 to vector<8x384xf32>
    %197 = arith.mulf %196, %195 : vector<8x384xf32>
    %cst_48 = arith.constant 5.000000e-01 : f32
    %198 = vector.broadcast %cst_48 : f32 to vector<8x384xf32>
    %199 = arith.addf %197, %198 : vector<8x384xf32>
    %200 = vector.extract_strided_slice %191 {offsets = [0, 384], sizes = [8, 128], strides = [1, 1]} : vector<8x512xf32> to vector<8x128xf32>
    %201 = math.tanh %200 : vector<8x128xf32>
    %202 = vector.extract_strided_slice %199 {offsets = [0, 0], sizes = [8, 128], strides = [1, 1]} : vector<8x384xf32> to vector<8x128xf32>
    %203 = vector.extract_strided_slice %199 {offsets = [0, 128], sizes = [8, 128], strides = [1, 1]} : vector<8x384xf32> to vector<8x128xf32>
    %204 = vector.extract_strided_slice %199 {offsets = [0, 256], sizes = [8, 128], strides = [1, 1]} : vector<8x384xf32> to vector<8x128xf32>
    %205 = arith.mulf %203, %163 : vector<8x128xf32>
    %206 = arith.mulf %202, %201 : vector<8x128xf32>
    %207 = arith.addf %205, %206 : vector<8x128xf32>
    %208 = math.tanh %207 : vector<8x128xf32>
    %209 = arith.mulf %204, %208 : vector<8x128xf32>
    %210 = arith.truncf %209 : vector<8x128xf32> to vector<8x128xbf16>
    %211 = tpu.concatenate %210, %188 in 1 : vector<8x128xbf16>, vector<8x128xbf16> -> vector<8x256xbf16>
    %cst_49 = arith.constant dense<0.000000e+00> : vector<8x512xf32>
    %212 = tpu.matmul %211, %7, %cst_49 {dimension_numbers = #tpu.dot_dimension_numbers<[1], [0], [0], [1], [0, 0, 1, 1], [], []>} : vector<8x256xbf16>, vector<256x512xbf16>, vector<8x512xf32> -> vector<8x512xf32>
    %213 = arith.addf %212, %10 : vector<8x512xf32>
    %214 = vector.extract_strided_slice %213 {offsets = [0, 0], sizes = [8, 384], strides = [1, 1]} : vector<8x512xf32> to vector<8x384xf32>
    %cst_50 = arith.constant 5.000000e-01 : f32
    %215 = vector.broadcast %cst_50 : f32 to vector<8x384xf32>
    %216 = arith.mulf %215, %214 : vector<8x384xf32>
    %217 = math.tanh %216 : vector<8x384xf32>
    %cst_51 = arith.constant 5.000000e-01 : f32
    %218 = vector.broadcast %cst_51 : f32 to vector<8x384xf32>
    %219 = arith.mulf %218, %217 : vector<8x384xf32>
    %cst_52 = arith.constant 5.000000e-01 : f32
    %220 = vector.broadcast %cst_52 : f32 to vector<8x384xf32>
    %221 = arith.addf %219, %220 : vector<8x384xf32>
    %222 = vector.extract_strided_slice %213 {offsets = [0, 384], sizes = [8, 128], strides = [1, 1]} : vector<8x512xf32> to vector<8x128xf32>
    %223 = math.tanh %222 : vector<8x128xf32>
    %224 = vector.extract_strided_slice %221 {offsets = [0, 0], sizes = [8, 128], strides = [1, 1]} : vector<8x384xf32> to vector<8x128xf32>
    %225 = vector.extract_strided_slice %221 {offsets = [0, 128], sizes = [8, 128], strides = [1, 1]} : vector<8x384xf32> to vector<8x128xf32>
    %226 = vector.extract_strided_slice %221 {offsets = [0, 256], sizes = [8, 128], strides = [1, 1]} : vector<8x384xf32> to vector<8x128xf32>
    %227 = arith.mulf %225, %185 : vector<8x128xf32>
    %228 = arith.mulf %224, %223 : vector<8x128xf32>
    %229 = arith.addf %227, %228 : vector<8x128xf32>
    %230 = math.tanh %229 : vector<8x128xf32>
    %231 = arith.mulf %226, %230 : vector<8x128xf32>
    %232 = arith.truncf %231 : vector<8x128xf32> to vector<8x128xbf16>
    %233 = vector.extract_strided_slice %5 {offsets = [40, 0], sizes = [8, 512], strides = [1, 1]} : vector<64x512xf32> to vector<8x512xf32>
    %cst_53 = arith.constant dense<0.000000e+00> : vector<8x512xf32>
    %234 = tpu.matmul %210, %6, %cst_53 {dimension_numbers = #tpu.dot_dimension_numbers<[1], [0], [0], [1], [0, 0, 1, 1], [], []>} : vector<8x128xbf16>, vector<128x512xbf16>, vector<8x512xf32> -> vector<8x512xf32>
    %235 = arith.addf %233, %234 : vector<8x512xf32>
    %236 = vector.extract_strided_slice %235 {offsets = [0, 0], sizes = [8, 384], strides = [1, 1]} : vector<8x512xf32> to vector<8x384xf32>
    %cst_54 = arith.constant 5.000000e-01 : f32
    %237 = vector.broadcast %cst_54 : f32 to vector<8x384xf32>
    %238 = arith.mulf %237, %236 : vector<8x384xf32>
    %239 = math.tanh %238 : vector<8x384xf32>
    %cst_55 = arith.constant 5.000000e-01 : f32
    %240 = vector.broadcast %cst_55 : f32 to vector<8x384xf32>
    %241 = arith.mulf %240, %239 : vector<8x384xf32>
    %cst_56 = arith.constant 5.000000e-01 : f32
    %242 = vector.broadcast %cst_56 : f32 to vector<8x384xf32>
    %243 = arith.addf %241, %242 : vector<8x384xf32>
    %244 = vector.extract_strided_slice %235 {offsets = [0, 384], sizes = [8, 128], strides = [1, 1]} : vector<8x512xf32> to vector<8x128xf32>
    %245 = math.tanh %244 : vector<8x128xf32>
    %246 = vector.extract_strided_slice %243 {offsets = [0, 0], sizes = [8, 128], strides = [1, 1]} : vector<8x384xf32> to vector<8x128xf32>
    %247 = vector.extract_strided_slice %243 {offsets = [0, 128], sizes = [8, 128], strides = [1, 1]} : vector<8x384xf32> to vector<8x128xf32>
    %248 = vector.extract_strided_slice %243 {offsets = [0, 256], sizes = [8, 128], strides = [1, 1]} : vector<8x384xf32> to vector<8x128xf32>
    %249 = arith.mulf %247, %207 : vector<8x128xf32>
    %250 = arith.mulf %246, %245 : vector<8x128xf32>
    %251 = arith.addf %249, %250 : vector<8x128xf32>
    %252 = math.tanh %251 : vector<8x128xf32>
    %253 = arith.mulf %248, %252 : vector<8x128xf32>
    %254 = arith.truncf %253 : vector<8x128xf32> to vector<8x128xbf16>
    %255 = tpu.concatenate %254, %232 in 1 : vector<8x128xbf16>, vector<8x128xbf16> -> vector<8x256xbf16>
    %cst_57 = arith.constant dense<0.000000e+00> : vector<8x512xf32>
    %256 = tpu.matmul %255, %7, %cst_57 {dimension_numbers = #tpu.dot_dimension_numbers<[1], [0], [0], [1], [0, 0, 1, 1], [], []>} : vector<8x256xbf16>, vector<256x512xbf16>, vector<8x512xf32> -> vector<8x512xf32>
    %257 = arith.addf %256, %10 : vector<8x512xf32>
    %258 = vector.extract_strided_slice %257 {offsets = [0, 0], sizes = [8, 384], strides = [1, 1]} : vector<8x512xf32> to vector<8x384xf32>
    %cst_58 = arith.constant 5.000000e-01 : f32
    %259 = vector.broadcast %cst_58 : f32 to vector<8x384xf32>
    %260 = arith.mulf %259, %258 : vector<8x384xf32>
    %261 = math.tanh %260 : vector<8x384xf32>
    %cst_59 = arith.constant 5.000000e-01 : f32
    %262 = vector.broadcast %cst_59 : f32 to vector<8x384xf32>
    %263 = arith.mulf %262, %261 : vector<8x384xf32>
    %cst_60 = arith.constant 5.000000e-01 : f32
    %264 = vector.broadcast %cst_60 : f32 to vector<8x384xf32>
    %265 = arith.addf %263, %264 : vector<8x384xf32>
    %266 = vector.extract_strided_slice %257 {offsets = [0, 384], sizes = [8, 128], strides = [1, 1]} : vector<8x512xf32> to vector<8x128xf32>
    %267 = math.tanh %266 : vector<8x128xf32>
    %268 = vector.extract_strided_slice %265 {offsets = [0, 0], sizes = [8, 128], strides = [1, 1]} : vector<8x384xf32> to vector<8x128xf32>
    %269 = vector.extract_strided_slice %265 {offsets = [0, 128], sizes = [8, 128], strides = [1, 1]} : vector<8x384xf32> to vector<8x128xf32>
    %270 = vector.extract_strided_slice %265 {offsets = [0, 256], sizes = [8, 128], strides = [1, 1]} : vector<8x384xf32> to vector<8x128xf32>
    %271 = arith.mulf %269, %229 : vector<8x128xf32>
    %272 = arith.mulf %268, %267 : vector<8x128xf32>
    %273 = arith.addf %271, %272 : vector<8x128xf32>
    %274 = math.tanh %273 : vector<8x128xf32>
    %275 = arith.mulf %270, %274 : vector<8x128xf32>
    %276 = arith.truncf %275 : vector<8x128xf32> to vector<8x128xbf16>
    %277 = vector.extract_strided_slice %5 {offsets = [48, 0], sizes = [8, 512], strides = [1, 1]} : vector<64x512xf32> to vector<8x512xf32>
    %cst_61 = arith.constant dense<0.000000e+00> : vector<8x512xf32>
    %278 = tpu.matmul %254, %6, %cst_61 {dimension_numbers = #tpu.dot_dimension_numbers<[1], [0], [0], [1], [0, 0, 1, 1], [], []>} : vector<8x128xbf16>, vector<128x512xbf16>, vector<8x512xf32> -> vector<8x512xf32>
    %279 = arith.addf %277, %278 : vector<8x512xf32>
    %280 = vector.extract_strided_slice %279 {offsets = [0, 0], sizes = [8, 384], strides = [1, 1]} : vector<8x512xf32> to vector<8x384xf32>
    %cst_62 = arith.constant 5.000000e-01 : f32
    %281 = vector.broadcast %cst_62 : f32 to vector<8x384xf32>
    %282 = arith.mulf %281, %280 : vector<8x384xf32>
    %283 = math.tanh %282 : vector<8x384xf32>
    %cst_63 = arith.constant 5.000000e-01 : f32
    %284 = vector.broadcast %cst_63 : f32 to vector<8x384xf32>
    %285 = arith.mulf %284, %283 : vector<8x384xf32>
    %cst_64 = arith.constant 5.000000e-01 : f32
    %286 = vector.broadcast %cst_64 : f32 to vector<8x384xf32>
    %287 = arith.addf %285, %286 : vector<8x384xf32>
    %288 = vector.extract_strided_slice %279 {offsets = [0, 384], sizes = [8, 128], strides = [1, 1]} : vector<8x512xf32> to vector<8x128xf32>
    %289 = math.tanh %288 : vector<8x128xf32>
    %290 = vector.extract_strided_slice %287 {offsets = [0, 0], sizes = [8, 128], strides = [1, 1]} : vector<8x384xf32> to vector<8x128xf32>
    %291 = vector.extract_strided_slice %287 {offsets = [0, 128], sizes = [8, 128], strides = [1, 1]} : vector<8x384xf32> to vector<8x128xf32>
    %292 = vector.extract_strided_slice %287 {offsets = [0, 256], sizes = [8, 128], strides = [1, 1]} : vector<8x384xf32> to vector<8x128xf32>
    %293 = arith.mulf %291, %251 : vector<8x128xf32>
    %294 = arith.mulf %290, %289 : vector<8x128xf32>
    %295 = arith.addf %293, %294 : vector<8x128xf32>
    %296 = math.tanh %295 : vector<8x128xf32>
    %297 = arith.mulf %292, %296 : vector<8x128xf32>
    %298 = arith.truncf %297 : vector<8x128xf32> to vector<8x128xbf16>
    %299 = tpu.concatenate %298, %276 in 1 : vector<8x128xbf16>, vector<8x128xbf16> -> vector<8x256xbf16>
    %cst_65 = arith.constant dense<0.000000e+00> : vector<8x512xf32>
    %300 = tpu.matmul %299, %7, %cst_65 {dimension_numbers = #tpu.dot_dimension_numbers<[1], [0], [0], [1], [0, 0, 1, 1], [], []>} : vector<8x256xbf16>, vector<256x512xbf16>, vector<8x512xf32> -> vector<8x512xf32>
    %301 = arith.addf %300, %10 : vector<8x512xf32>
    %302 = vector.extract_strided_slice %301 {offsets = [0, 0], sizes = [8, 384], strides = [1, 1]} : vector<8x512xf32> to vector<8x384xf32>
    %cst_66 = arith.constant 5.000000e-01 : f32
    %303 = vector.broadcast %cst_66 : f32 to vector<8x384xf32>
    %304 = arith.mulf %303, %302 : vector<8x384xf32>
    %305 = math.tanh %304 : vector<8x384xf32>
    %cst_67 = arith.constant 5.000000e-01 : f32
    %306 = vector.broadcast %cst_67 : f32 to vector<8x384xf32>
    %307 = arith.mulf %306, %305 : vector<8x384xf32>
    %cst_68 = arith.constant 5.000000e-01 : f32
    %308 = vector.broadcast %cst_68 : f32 to vector<8x384xf32>
    %309 = arith.addf %307, %308 : vector<8x384xf32>
    %310 = vector.extract_strided_slice %301 {offsets = [0, 384], sizes = [8, 128], strides = [1, 1]} : vector<8x512xf32> to vector<8x128xf32>
    %311 = math.tanh %310 : vector<8x128xf32>
    %312 = vector.extract_strided_slice %309 {offsets = [0, 0], sizes = [8, 128], strides = [1, 1]} : vector<8x384xf32> to vector<8x128xf32>
    %313 = vector.extract_strided_slice %309 {offsets = [0, 128], sizes = [8, 128], strides = [1, 1]} : vector<8x384xf32> to vector<8x128xf32>
    %314 = vector.extract_strided_slice %309 {offsets = [0, 256], sizes = [8, 128], strides = [1, 1]} : vector<8x384xf32> to vector<8x128xf32>
    %315 = arith.mulf %313, %273 : vector<8x128xf32>
    %316 = arith.mulf %312, %311 : vector<8x128xf32>
    %317 = arith.addf %315, %316 : vector<8x128xf32>
    %318 = math.tanh %317 : vector<8x128xf32>
    %319 = arith.mulf %314, %318 : vector<8x128xf32>
    %320 = arith.truncf %319 : vector<8x128xf32> to vector<8x128xbf16>
    %321 = vector.extract_strided_slice %5 {offsets = [56, 0], sizes = [8, 512], strides = [1, 1]} : vector<64x512xf32> to vector<8x512xf32>
    %cst_69 = arith.constant dense<0.000000e+00> : vector<8x512xf32>
    %322 = tpu.matmul %298, %6, %cst_69 {dimension_numbers = #tpu.dot_dimension_numbers<[1], [0], [0], [1], [0, 0, 1, 1], [], []>} : vector<8x128xbf16>, vector<128x512xbf16>, vector<8x512xf32> -> vector<8x512xf32>
    %323 = arith.addf %321, %322 : vector<8x512xf32>
    %324 = vector.extract_strided_slice %323 {offsets = [0, 0], sizes = [8, 384], strides = [1, 1]} : vector<8x512xf32> to vector<8x384xf32>
    %cst_70 = arith.constant 5.000000e-01 : f32
    %325 = vector.broadcast %cst_70 : f32 to vector<8x384xf32>
    %326 = arith.mulf %325, %324 : vector<8x384xf32>
    %327 = math.tanh %326 : vector<8x384xf32>
    %cst_71 = arith.constant 5.000000e-01 : f32
    %328 = vector.broadcast %cst_71 : f32 to vector<8x384xf32>
    %329 = arith.mulf %328, %327 : vector<8x384xf32>
    %cst_72 = arith.constant 5.000000e-01 : f32
    %330 = vector.broadcast %cst_72 : f32 to vector<8x384xf32>
    %331 = arith.addf %329, %330 : vector<8x384xf32>
    %332 = vector.extract_strided_slice %323 {offsets = [0, 384], sizes = [8, 128], strides = [1, 1]} : vector<8x512xf32> to vector<8x128xf32>
    %333 = math.tanh %332 : vector<8x128xf32>
    %334 = vector.extract_strided_slice %331 {offsets = [0, 0], sizes = [8, 128], strides = [1, 1]} : vector<8x384xf32> to vector<8x128xf32>
    %335 = vector.extract_strided_slice %331 {offsets = [0, 128], sizes = [8, 128], strides = [1, 1]} : vector<8x384xf32> to vector<8x128xf32>
    %336 = vector.extract_strided_slice %331 {offsets = [0, 256], sizes = [8, 128], strides = [1, 1]} : vector<8x384xf32> to vector<8x128xf32>
    %337 = arith.mulf %335, %295 : vector<8x128xf32>
    %338 = arith.mulf %334, %333 : vector<8x128xf32>
    %339 = arith.addf %337, %338 : vector<8x128xf32>
    %340 = math.tanh %339 : vector<8x128xf32>
    %341 = arith.mulf %336, %340 : vector<8x128xf32>
    %342 = arith.truncf %341 : vector<8x128xf32> to vector<8x128xbf16>
    %343 = tpu.concatenate %342, %320 in 1 : vector<8x128xbf16>, vector<8x128xbf16> -> vector<8x256xbf16>
    %cst_73 = arith.constant dense<0.000000e+00> : vector<8x512xf32>
    %344 = tpu.matmul %343, %7, %cst_73 {dimension_numbers = #tpu.dot_dimension_numbers<[1], [0], [0], [1], [0, 0, 1, 1], [], []>} : vector<8x256xbf16>, vector<256x512xbf16>, vector<8x512xf32> -> vector<8x512xf32>
    %345 = arith.addf %344, %10 : vector<8x512xf32>
    %346 = vector.extract_strided_slice %345 {offsets = [0, 0], sizes = [8, 384], strides = [1, 1]} : vector<8x512xf32> to vector<8x384xf32>
    %cst_74 = arith.constant 5.000000e-01 : f32
    %347 = vector.broadcast %cst_74 : f32 to vector<8x384xf32>
    %348 = arith.mulf %347, %346 : vector<8x384xf32>
    %349 = math.tanh %348 : vector<8x384xf32>
    %cst_75 = arith.constant 5.000000e-01 : f32
    %350 = vector.broadcast %cst_75 : f32 to vector<8x384xf32>
    %351 = arith.mulf %350, %349 : vector<8x384xf32>
    %cst_76 = arith.constant 5.000000e-01 : f32
    %352 = vector.broadcast %cst_76 : f32 to vector<8x384xf32>
    %353 = arith.addf %351, %352 : vector<8x384xf32>
    %354 = vector.extract_strided_slice %345 {offsets = [0, 384], sizes = [8, 128], strides = [1, 1]} : vector<8x512xf32> to vector<8x128xf32>
    %355 = math.tanh %354 : vector<8x128xf32>
    %356 = vector.extract_strided_slice %353 {offsets = [0, 0], sizes = [8, 128], strides = [1, 1]} : vector<8x384xf32> to vector<8x128xf32>
    %357 = vector.extract_strided_slice %353 {offsets = [0, 128], sizes = [8, 128], strides = [1, 1]} : vector<8x384xf32> to vector<8x128xf32>
    %358 = vector.extract_strided_slice %353 {offsets = [0, 256], sizes = [8, 128], strides = [1, 1]} : vector<8x384xf32> to vector<8x128xf32>
    %359 = arith.mulf %357, %317 : vector<8x128xf32>
    %360 = arith.mulf %356, %355 : vector<8x128xf32>
    %361 = arith.addf %359, %360 : vector<8x128xf32>
    %362 = math.tanh %361 : vector<8x128xf32>
    %363 = arith.mulf %358, %362 : vector<8x128xf32>
    %364 = arith.truncf %363 : vector<8x128xf32> to vector<8x128xbf16>
    %c0_77 = arith.constant 0 : index
    %c0_78 = arith.constant 0 : index
    %365 = vector.load %arg6[%c0_77, %c0_78] : memref<128x128xbf16, #tpu.memory_space<vmem>>, vector<128x128xbf16>
    %cst_79 = arith.constant dense<0.000000e+00> : vector<8x128xf32>
    %366 = tpu.matmul %364, %365, %cst_79 {dimension_numbers = #tpu.dot_dimension_numbers<[1], [0], [0], [1], [0, 0, 1, 1], [], []>} : vector<8x128xbf16>, vector<128x128xbf16>, vector<8x128xf32> -> vector<8x128xf32>
    %c0_80 = arith.constant 0 : index
    %c0_81 = arith.constant 0 : index
    %367 = vector.load %arg7[%c0_80, %c0_81] : memref<1x128xf32, #tpu.memory_space<vmem>>, vector<1x128xf32>
    %368 = vector.broadcast %367 : vector<1x128xf32> to vector<8x128xf32>
    %369 = arith.addf %366, %368 : vector<8x128xf32>
    %cst_82 = arith.constant 0.000000e+00 : f32
    %370 = vector.broadcast %cst_82 : f32 to vector<8x128xf32>
    %371 = arith.maximumf %369, %370 : vector<8x128xf32>
    %372 = arith.truncf %371 : vector<8x128xf32> to vector<8x128xbf16>
    %c0_83 = arith.constant 0 : index
    %c0_84 = arith.constant 0 : index
    %373 = vector.load %arg8[%c0_83, %c0_84] : memref<128x64xbf16, #tpu.memory_space<vmem>>, vector<128x64xbf16>
    %cst_85 = arith.constant dense<0.000000e+00> : vector<8x64xf32>
    %374 = tpu.matmul %372, %373, %cst_85 {dimension_numbers = #tpu.dot_dimension_numbers<[1], [0], [0], [1], [0, 0, 1, 1], [], []>} : vector<8x128xbf16>, vector<128x64xbf16>, vector<8x64xf32> -> vector<8x64xf32>
    %c0_86 = arith.constant 0 : index
    %c0_87 = arith.constant 0 : index
    %375 = vector.load %arg9[%c0_86, %c0_87] : memref<1x64xf32, #tpu.memory_space<vmem>>, vector<1x64xf32>
    %376 = vector.broadcast %375 : vector<1x64xf32> to vector<8x64xf32>
    %377 = arith.addf %374, %376 : vector<8x64xf32>
    %cst_88 = arith.constant 0.000000e+00 : f32
    %378 = vector.broadcast %cst_88 : f32 to vector<8x64xf32>
    %379 = arith.maximumf %377, %378 : vector<8x64xf32>
    %380 = arith.truncf %379 : vector<8x64xf32> to vector<8x64xbf16>
    %c0_89 = arith.constant 0 : index
    %c0_90 = arith.constant 0 : index
    %381 = vector.load %arg10[%c0_89, %c0_90] : memref<64x128xbf16, #tpu.memory_space<vmem>>, vector<64x128xbf16>
    %cst_91 = arith.constant dense<0.000000e+00> : vector<8x128xf32>
    %382 = tpu.matmul %380, %381, %cst_91 {dimension_numbers = #tpu.dot_dimension_numbers<[1], [0], [0], [1], [0, 0, 1, 1], [], []>} : vector<8x64xbf16>, vector<64x128xbf16>, vector<8x128xf32> -> vector<8x128xf32>
    %c0_92 = arith.constant 0 : index
    %c0_93 = arith.constant 0 : index
    %383 = vector.load %arg11[%c0_92, %c0_93] : memref<1x128xf32, #tpu.memory_space<vmem>>, vector<1x128xf32>
    %384 = vector.broadcast %383 : vector<1x128xf32> to vector<8x128xf32>
    %385 = arith.addf %382, %384 : vector<8x128xf32>
    %c0_94 = arith.constant 0 : index
    %c0_95 = arith.constant 0 : index
    %386 = vector.load %arg12[%c0_94, %c0_95] : memref<8x128xf32, #tpu.memory_space<vmem>>, vector<8x128xf32>
    tpu.vector_store %arg12[%c0_94, %c0_95], %385 {strides = array<i32>} : memref<8x128xf32, #tpu.memory_space<vmem>>, vector<8x128xf32>,
    return
  }
}

</mosaic_0001>

<bundles_post_ra>
// kernel: dqn_forward_seq.1
= control target key start
LH: loop header
LB: loop body
LE: loop exit
PB: predicated region body
PF: predicated region fallthrough
CT: control target
= control target key end

     0   :  { %17 = vsyncpa [#allocation3], 0  ;;  %s5515_s0 = inlined_call_operand.vmem [shape: bf16[64,15], index: 0, kind: input, shape index: {}]   ;;  %s5516_s1 = inlined_call_operand.vmem [shape: bf16[15,512], index: 1, kind: input, shape index: {}]   ;;  %s5517_s2 = inlined_call_operand.hbm [shape: bf16[128,512], index: 2, kind: input, shape index: {}]   ;;  %s5518_s3 = inlined_call_operand.vmem [shape: f32[1,512], index: 3, kind: input, shape index: {}]   ;;  %s5519_s4 = inlined_call_operand.hbm [shape: bf16[256,512], index: 4, kind: input, shape index: {}]   ;;  %s5520_s5 = inlined_call_operand.vmem [shape: f32[1,512], index: 5, kind: input, shape index: {}]   ;;  %s5521_s6 = inlined_call_operand.vmem [shape: bf16[128,128], index: 6, kind: input, shape index: {}]   ;;  %s5522_s7 = inlined_call_operand.vmem [shape: f32[1,128], index: 7, kind: input, shape index: {}]   ;;  %s5523_s8 = inlined_call_operand.vmem [shape: bf16[128,64], index: 8, kind: input, shape index: {}]   ;;  %s5524_s9 = inlined_call_operand.vmem [shape: f32[1,64], index: 9, kind: input, shape index: {}]   ;;  %s5525_s10 = inlined_call_operand.vmem [shape: bf16[64,128], index: 10, kind: input, shape index: {}]   ;;  %s5526_s11 = inlined_call_operand.vmem [shape: f32[1,128], index: 11, kind: input, shape index: {}]   ;;  %s5527_s12 = inlined_call_operand.vmem [shape: f32[8,128], index: 12, kind: output, shape index: {}]  }
   0x1   :  { %18 = vsyncpa [#allocation5], 0  ;;  %s3670_s21 = smov [#allocation2]   ;;  %s3622_s25 = scalar_lea.hbm %s5517_s2, 4096 }
   0x2   :  { %s28_s22 = sshll.u32 %s3670_s21, 4  ;;  %p3623_p0 = scmp.ne.s32.totalorder %s5517_s2, %s3622_s25  ;;  %s29_s22 = int_to_ptr.vmem [resolvable:$true] %s28_s22 }
   0x3   :  { %p3626_p1 = scmp.lt.u32.totalorder %s3622_s25, %s5517_s2 }
   0x5   :  { %p3628_p2 = pnand %p3626_p1, %p3623_p0 }
   0x7   :  { %3631 = shalt.err (!%p3628_p2)
}
   0x8   :  { %s3632_s30 = scalar_lea.vmem %s29_s22, 4096  ;;  %p3637_p4 = scmp.lt.s32.totalorder %s29_s22, %s29_s22 }
   0x9   :  { %p3633_p3 = scmp.ne.s32.totalorder %s29_s22, %s3632_s30  ;;  %p3638_p5 = scmp.lt.s32.totalorder %s3632_s30, %s3632_s30 }
   0xb   :  { %p3639_p6 = por %p3638_p5, %p3637_p4 }
   0xd   :  { %p3640_p7 = pnand %p3639_p6, %p3633_p3 }
   0xf   :  { %3643 = shalt.err (!%p3640_p7)
}
  0x10   :  { %s3671_s13 = smov 256   ;;  %s3672_s14 = smov 16  }
  0x11   :  { %34 = dma.hbm_to_vmem [thread:$0]  %s5517_s2, 4096, %s29_s22, [#allocation3], %s3671_s13, %s3671_s13, %s3672_s14  }
  0x12   :  { %s3673_s17 = smov [#allocation4]   ;;  %s3644_s21 = scalar_lea.hbm %s5519_s4, 8192 }
  0x13   :  { %s42_s18 = sshll.u32 %s3673_s17, 4  ;;  %p3645_p8 = scmp.ne.s32.totalorder %s5519_s4, %s3644_s21  ;;  %s43_s18 = int_to_ptr.vmem [resolvable:$true] %s42_s18 }
  0x14   :  { %p3648_p9 = scmp.lt.u32.totalorder %s3644_s21, %s5519_s4 }
  0x16   :  { %p3650_p10 = pnand %p3648_p9, %p3645_p8 }
  0x18   :  { %3653 = shalt.err (!%p3650_p10)
}
  0x19   :  { %s3654_s27 = scalar_lea.vmem %s43_s18, 8192  ;;  %p3659_p12 = scmp.lt.s32.totalorder %s43_s18, %s43_s18 }
  0x1a   :  { %p3655_p11 = scmp.ne.s32.totalorder %s43_s18, %s3654_s27  ;;  %p3660_p13 = scmp.lt.s32.totalorder %s3654_s27, %s3654_s27 }
  0x1c   :  { %p3661_p0 = por %p3660_p13, %p3659_p12 }
  0x1e   :  { %p3662_p1 = pnand %p3661_p0, %p3655_p11 }
  0x20   :  { %3665 = shalt.err (!%p3662_p1)
}
  0x21   :  { %48 = dma.hbm_to_vmem [thread:$0]  %s5519_s4, 8192, %s43_s18, [#allocation5], %s3671_s13, %s3671_s13, %s3672_s14  }
  0x22   :  { %3666 = dma.done.wait [#allocation3], 4096  }
  0x23   :  { %3667 = vsyncadd [#allocation3], 4294963200 }
  0x24   :  { %3668 = dma.done.wait [#allocation5], 8192  }
  0x25   :  { %3669 = vsyncadd [#allocation5], 4294959104  ;;  %vm153_vm0 = vcmask 1046528   ;;  %v5528_v0 = vmov 0   ;;  %vm154_vm1 = vcmask 1047552   ;;  %v3675_v1 = vmov 65535  }
  0x26   :  { %201 = vmatprep.mubr.bf16.mxu0 %v5528_v0  ;;  %274 = vmatprep.mubr.bf16.mxu1 %v5528_v0  ;;  %v155_v2 = vsel %vm153_vm0, 4294967295, %v3675_v1  ;;  %v3096_v4 = vld [vmem:[%s5516_s1 + $0x4] ss:$16 sps:$4 sm:$0xff]   ;;  %v3098_v5 = vld [vmem:[%s5516_s1 + $0xc] ss:$16 sps:$4 sm:$0xff]   ;;  %vm140_vm2 = vcmask 121856  }
  0x27   :  { %v156_v3 = vsel %vm154_vm1, %v155_v2, 0  ;;  %v3100_v7 = vld [vmem:[%s5516_s1] ss:$16 sps:$4 sm:$0xff]   ;;  %v3101_v8 = vld [vmem:[%s5516_s1 + $0x8] ss:$16 sps:$4 sm:$0xff]   ;;  %vm3677_vm3 = vmmov 0  }
  0x28   :  { %v161_v6 = vand.u32 %v3096_v4, %v156_v3  ;;  %v167_v9 = vand.u32 %v3098_v5, %v156_v3  ;;  %v3102_v10 = vld [vmem:[%s5515_s0] sm:$0xff]   ;;  %v158_v11 = vand.u32 %v3100_v7, %v156_v3  ;;  %v164_v12 = vand.u32 %v3101_v8, %v156_v3  ;;  %v3786_v14 = vld [vmem:[#allocation2 + $0xc] ss:$16 sps:$4 sm:$0xff]   ;;  %v3790_v16 = vld [vmem:[#allocation2 + $0x8] ss:$16 sps:$4 sm:$0xff]  }
  0x29   :  { %v3784_v13 = vld [vmem:[#allocation2 + $0x4] ss:$16 sps:$4 sm:$0xff]   ;;  %v3788_v15 = vld [vmem:[#allocation2] ss:$16 sps:$4 sm:$0xff]   ;;  %v3796_v18 = vld [vmem:[#allocation2 + $0x2c] ss:$16 sps:$4 sm:$0xff]  }
  0x2a   :  { %169 = vmatprep.subr.bf16.mxu0 %v161_v6  ;;  %242 = vmatprep.subr.bf16.mxu1 %v167_v9  ;;  %v3794_v17 = vld [vmem:[#allocation2 + $0x24] ss:$16 sps:$4 sm:$0xff]   ;;  %v3798_v19 = vld [vmem:[#allocation2 + $0x20] ss:$16 sps:$4 sm:$0xff]   ;;  %v3802_v20 = vld [vmem:[#allocation2 + $0x28] ss:$16 sps:$4 sm:$0xff]  }
  0x2b   :  { %170 = vmatpush1.bf16.msra.mxu0 %v158_v11  ;;  %243 = vmatpush1.bf16.msra.mxu1 %v164_v12  ;;  %v3806_v21 = vld [vmem:[#allocation2 + $0x44] ss:$16 sps:$4 sm:$0xff]   ;;  %v3810_v22 = vld [vmem:[#allocation2 + $0x4c] ss:$16 sps:$4 sm:$0xff]   ;;  %v3817_v24 = vld [vmem:[#allocation2 + $0x40] ss:$16 sps:$4 sm:$0xff]  }
  0x2c   :  { %593 = vmatprep.subr.bf16.mxu0 %v3784_v13  ;;  %634 = vmatprep.subr.bf16.mxu1 %v3786_v14  ;;  %v3115_v23 = vld [vmem:[%s5515_s0 + $0x8] sm:$0xff]   ;;  %v3823_v26 = vld [vmem:[#allocation2 + $0x64] ss:$16 sps:$4 sm:$0xff]   ;;  %v3833_v28 = vld [vmem:[#allocation2 + $0x60] ss:$16 sps:$4 sm:$0xff]   ;;  %vm2826_vm4 = vcmask 523264  }
  0x2d   :  { %v3821_v25 = vld [vmem:[#allocation2 + $0x48] ss:$16 sps:$4 sm:$0xff]   ;;  %v3827_v27 = vld [vmem:[#allocation2 + $0x6c] ss:$16 sps:$4 sm:$0xff]   ;;  %v3837_v30 = vld [vmem:[#allocation2 + $0x84] ss:$16 sps:$4 sm:$0xff]  }
  0x2e   :  { %2885 = vmatmul.mubr.msk.bf16.vlgmr.msra.gmra.mrb[0].mxu0 %vm140_vm2, %v3102_v10  ;;  %2889 = vmatmul.mubr.msk.bf16.vlgmr.msra.gmra.mrb[0].mxu1 %vm140_vm2, %v3102_v10  ;;  %v3835_v29 = vld [vmem:[#allocation2 + $0x68] ss:$16 sps:$4 sm:$0xff]   ;;  %v3841_v31 = vld [vmem:[#allocation2 + $0x8c] ss:$16 sps:$4 sm:$0xff]   ;;  %v3128_v32 = vld [vmem:[%s5515_s0 + $0x10] sm:$0xff]  }
  0x2f   :  { %594 = vmatpush1.bf16.msra.mxu0 %v3788_v15  ;;  %635 = vmatpush1.bf16.msra.mxu1 %v3790_v16  ;;  %v3848_v33 = vld [vmem:[#allocation2 + $0x80] ss:$16 sps:$4 sm:$0xff]   ;;  %v3850_v34 = vld [vmem:[#allocation2 + $0x88] ss:$16 sps:$4 sm:$0xff]   ;;  %v3854_v35 = vld [vmem:[#allocation2 + $0xa4] ss:$16 sps:$4 sm:$0xff]  }
  0x30   :  { %595 = vmatprep.subr.bf16.mxu0 %v3794_v17  ;;  %636 = vmatprep.subr.bf16.mxu1 %v3796_v18  ;;  %v3858_v36 = vld [vmem:[#allocation2 + $0xac] ss:$16 sps:$4 sm:$0xff]   ;;  %v3862_v37 = vld [vmem:[#allocation2 + $0xa0] ss:$16 sps:$4 sm:$0xff]   ;;  %v3866_v38 = vld [vmem:[#allocation2 + $0xa8] ss:$16 sps:$4 sm:$0xff]  }
  0x31   :  { %211 = vmatprep.mubr.bf16.mxu0 %v5528_v0  ;;  %284 = vmatprep.mubr.bf16.mxu1 %v5528_v0  ;;  %v3141_v39 = vld [vmem:[%s5515_s0 + $0x18] sm:$0xff]   ;;  %v3873_v40 = vld [vmem:[#allocation2 + $0xc4] ss:$16 sps:$4 sm:$0xff]   ;;  %v3879_v42 = vld [vmem:[#allocation2 + $0xc0] ss:$16 sps:$4 sm:$0xff]  }
  0x32   :  { %v3875_v41 = vld [vmem:[#allocation2 + $0xcc] ss:$16 sps:$4 sm:$0xff]   ;;  %v3881_v43 = vld [vmem:[#allocation2 + $0xc8] ss:$16 sps:$4 sm:$0xff]   ;;  %v3883_v44 = vld [vmem:[#allocation2 + $0xe4] ss:$16 sps:$4 sm:$0xff]  }
  0x33   :  { %596 = vmatpush1.bf16.msra.mxu0 %v3798_v19  ;;  %637 = vmatpush1.bf16.msra.mxu1 %v3802_v20  ;;  %v3885_v45 = vld [vmem:[#allocation2 + $0xec] ss:$16 sps:$4 sm:$0xff]   ;;  %v3891_v46 = vld [vmem:[#allocation2 + $0xe0] ss:$16 sps:$4 sm:$0xff]   ;;  %v3893_v47 = vld [vmem:[#allocation2 + $0xe8] ss:$16 sps:$4 sm:$0xff]  }
  0x34   :  { %597 = vmatprep.subr.bf16.mxu0 %v3806_v21  ;;  %638 = vmatprep.subr.bf16.mxu1 %v3810_v22  ;;  %v3909_v48 = vld [vmem:[#allocation4 + $0x4] ss:$16 sps:$4 sm:$0xff]   ;;  %v3911_v49 = vld [vmem:[#allocation4 + $0xc] ss:$16 sps:$4 sm:$0xff]   ;;  %v3915_v50 = vld [vmem:[#allocation4] ss:$16 sps:$4 sm:$0xff]  }
  0x35   :  { %v3917_v51 = vld [vmem:[#allocation4 + $0x8] ss:$16 sps:$4 sm:$0xff]   ;;  %v3921_v52 = vld [vmem:[#allocation4 + $0x24] ss:$16 sps:$4 sm:$0xff]   ;;  %v3923_v53 = vld [vmem:[#allocation4 + $0x2c] ss:$16 sps:$4 sm:$0xff]  }
  0x36   :  { %2886 = vmatmul.mubr.msk.bf16.gmra.mrb[4].mxu0 %vm140_vm2, %v3115_v23  ;;  %2890 = vmatmul.mubr.msk.bf16.gmra.mrb[4].mxu1 %vm140_vm2, %v3115_v23  ;;  %v3925_v54 = vld [vmem:[#allocation4 + $0x20] ss:$16 sps:$4 sm:$0xff]   ;;  %v3927_v55 = vld [vmem:[#allocation4 + $0x28] ss:$16 sps:$4 sm:$0xff]   ;;  %v3933_v56 = vld [vmem:[#allocation4 + $0x44] ss:$16 sps:$4 sm:$0xff]  }
  0x37   :  { %598 = vmatpush1.bf16.msra.mxu0 %v3817_v24  ;;  %639 = vmatpush1.bf16.msra.mxu1 %v3821_v25  ;;  %v3935_v57 = vld [vmem:[#allocation4 + $0x4c] ss:$16 sps:$4 sm:$0xff]   ;;  %v3939_v58 = vld [vmem:[#allocation4 + $0x40] ss:$16 sps:$4 sm:$0xff]   ;;  %v3941_v59 = vld [vmem:[#allocation4 + $0x48] ss:$16 sps:$4 sm:$0xff]  }
  0x38   :  { %599 = vmatprep.subr.bf16.mxu0 %v3823_v26  ;;  %640 = vmatprep.subr.bf16.mxu1 %v3827_v27  ;;  %5872 = vst [vmem:[#allocation8_spill] sm:$0xff] %v3935_v57  ;;  %5873 = vst [vmem:[#allocation9_spill] sm:$0xff] %v3939_v58  ;;  %v3945_v60 = vld [vmem:[#allocation4 + $0x64] ss:$16 sps:$4 sm:$0xff]   ;;  %v3947_v61 = vld [vmem:[#allocation4 + $0x6c] ss:$16 sps:$4 sm:$0xff]  }
  0x39   :  { %221 = vmatprep.mubr.bf16.mxu0 %v5528_v0  ;;  %294 = vmatprep.mubr.bf16.mxu1 %v5528_v0  ;;  %5874 = vst [vmem:[#allocation10_spill] sm:$0xff] %v3941_v59  ;;  %5875 = vst [vmem:[#allocation11_spill] sm:$0xff] %v3945_v60  ;;  %v3949_v62 = vld [vmem:[#allocation4 + $0x60] ss:$16 sps:$4 sm:$0xff]   ;;  %v3951_v63 = vld [vmem:[#allocation4 + $0x68] ss:$16 sps:$4 sm:$0xff]  }
  0x3a   :  { %5876 = vst [vmem:[#allocation12_spill] sm:$0xff] %v3947_v61  ;;  %5877 = vst [vmem:[#allocation13_spill] sm:$0xff] %v3949_v62  ;;  %v3957_v1 = vld [vmem:[#allocation4 + $0x84] ss:$16 sps:$4 sm:$0xff]   ;;  %v3959_v2 = vld [vmem:[#allocation4 + $0x8c] ss:$16 sps:$4 sm:$0xff]  }
  0x3b   :  { %600 = vmatpush1.bf16.msra.mxu0 %v3833_v28  ;;  %641 = vmatpush1.bf16.msra.mxu1 %v3835_v29  ;;  %5878 = vst [vmem:[#allocation14_spill] sm:$0xff] %v3951_v63  ;;  %5879 = vst [vmem:[#allocation15_spill] sm:$0xff] %v3957_v1  ;;  %v3963_v3 = vld [vmem:[#allocation4 + $0x80] ss:$16 sps:$4 sm:$0xff]   ;;  %v3965_v4 = vld [vmem:[#allocation4 + $0x88] ss:$16 sps:$4 sm:$0xff]  }
  0x3c   :  { %601 = vmatprep.subr.bf16.mxu0 %v3837_v30  ;;  %642 = vmatprep.subr.bf16.mxu1 %v3841_v31  ;;  %5880 = vst [vmem:[#allocation16_spill] sm:$0xff] %v3959_v2  ;;  %5881 = vst [vmem:[#allocation17_spill] sm:$0xff] %v3963_v3  ;;  %v3969_v5 = vld [vmem:[#allocation4 + $0xa4] ss:$16 sps:$4 sm:$0xff]   ;;  %v3971_v6 = vld [vmem:[#allocation4 + $0xac] ss:$16 sps:$4 sm:$0xff]  }
  0x3d   :  { %5882 = vst [vmem:[#allocation18_spill] sm:$0xff] %v3965_v4  ;;  %5883 = vst [vmem:[#allocation19_spill] sm:$0xff] %v3969_v5  ;;  %v3973_v7 = vld [vmem:[#allocation4 + $0xa0] ss:$16 sps:$4 sm:$0xff]   ;;  %v3975_v8 = vld [vmem:[#allocation4 + $0xa8] ss:$16 sps:$4 sm:$0xff]  }
  0x3e   :  { %2887 = vmatmul.mubr.msk.bf16.gmra.mrb[8].mxu0 %vm140_vm2, %v3128_v32  ;;  %2891 = vmatmul.mubr.msk.bf16.gmra.mrb[8].mxu1 %vm140_vm2, %v3128_v32  ;;  %5884 = vst [vmem:[#allocation20_spill] sm:$0xff] %v3971_v6  ;;  %5885 = vst [vmem:[#allocation21_spill] sm:$0xff] %v3973_v7  ;;  %v3981_v9 = vld [vmem:[#allocation4 + $0xc4] ss:$16 sps:$4 sm:$0xff]   ;;  %v3983_v10 = vld [vmem:[#allocation4 + $0xcc] ss:$16 sps:$4 sm:$0xff]  }
  0x3f   :  { %602 = vmatpush1.bf16.msra.mxu0 %v3848_v33  ;;  %643 = vmatpush1.bf16.msra.mxu1 %v3850_v34  ;;  %5886 = vst [vmem:[#allocation22_spill] sm:$0xff] %v3975_v8  ;;  %5887 = vst [vmem:[#allocation23_spill] sm:$0xff] %v3981_v9  ;;  %v3987_v11 = vld [vmem:[#allocation4 + $0xc0] ss:$16 sps:$4 sm:$0xff]   ;;  %v3989_v12 = vld [vmem:[#allocation4 + $0xc8] ss:$16 sps:$4 sm:$0xff]  }
  0x40   :  { %603 = vmatprep.subr.bf16.mxu0 %v3854_v35  ;;  %644 = vmatprep.subr.bf16.mxu1 %v3858_v36  ;;  %5888 = vst [vmem:[#allocation24_spill] sm:$0xff] %v3983_v10  ;;  %5889 = vst [vmem:[#allocation25_spill] sm:$0xff] %v3987_v11  ;;  %v3993_v23 = vld [vmem:[#allocation4 + $0xe4] ss:$16 sps:$4 sm:$0xff]   ;;  %v3995_v32 = vld [vmem:[#allocation4 + $0xec] ss:$16 sps:$4 sm:$0xff]  }
  0x41   :  { %231 = vmatprep.mubr.bf16.mxu0 %v5528_v0  ;;  %304 = vmatprep.mubr.bf16.mxu1 %v5528_v0  ;;  %5890 = vst [vmem:[#allocation26_spill] sm:$0xff] %v3989_v12  ;;  %5891 = vst [vmem:[#allocation27_spill] sm:$0xff] %v3993_v23 }
  0x42   :  { %5892 = vst [vmem:[#allocation28_spill] sm:$0xff] %v3995_v32 }
  0x43   :  { %604 = vmatpush1.bf16.msra.mxu0 %v3862_v37  ;;  %645 = vmatpush1.bf16.msra.mxu1 %v3866_v38 }
  0x44   :  { %605 = vmatprep.subr.bf16.mxu0 %v3873_v40  ;;  %646 = vmatprep.subr.bf16.mxu1 %v3875_v41 }
  0x46   :  { %2888 = vmatmul.mubr.msk.bf16.gmra.mrb[12].mxu0 %vm140_vm2, %v3141_v39  ;;  %2892 = vmatmul.mubr.msk.bf16.gmra.mrb[12].mxu1 %vm140_vm2, %v3141_v39  ;;  %v3997_v39 = vld [vmem:[#allocation4 + $0xe0] ss:$16 sps:$4 sm:$0xff]  }
  0x47   :  { %606 = vmatpush1.bf16.msra.mxu0 %v3879_v42  ;;  %647 = vmatpush1.bf16.msra.mxu1 %v3881_v43  ;;  %5893 = vst [vmem:[#allocation29_spill] sm:$0xff] %v3997_v39 }
  0x48   :  { %607 = vmatprep.subr.bf16.mxu0 %v3883_v44  ;;  %648 = vmatprep.subr.bf16.mxu1 %v3885_v45 }
  0x49   :  { %625 = vmatprep.mubr.bf16.mxu0 %v5528_v0  ;;  %666 = vmatprep.mubr.bf16.mxu1 %v5528_v0 }
  0x4b   :  { %608 = vmatpush1.bf16.msra.mxu0 %v3891_v46  ;;  %649 = vmatpush1.bf16.msra.mxu1 %v3893_v47 }
  0x4c   :  { %1018 = vmatprep.subr.bf16.mxu0 %v3909_v48  ;;  %1059 = vmatprep.subr.bf16.mxu1 %v3911_v49 }
  0x4e   :  { %626 = vmatmul.mubr.bf16.vlgmr.msra.gmra.mrb[16].mxu0 %v5528_v0  ;;  %667 = vmatmul.mubr.bf16.vlgmr.msra.gmra.mrb[16].mxu1 %v5528_v0 }
  0x4f   :  { %1050 = vmatprep.mubr.bf16.mxu0 %v5528_v0  ;;  %1091 = vmatprep.mubr.bf16.mxu1 %v5528_v0  ;;  %v3999_v0 = vld [vmem:[#allocation4 + $0xe8] ss:$16 sps:$4 sm:$0xff]  }
  0x50   :  { %1019 = vmatpush1.bf16.msra.mxu0 %v3915_v50  ;;  %1060 = vmatpush1.bf16.msra.mxu1 %v3917_v51  ;;  %5894 = vst [vmem:[#allocation30_spill] sm:$0xff] %v3999_v0 }
  0x51   :  { %1020 = vmatprep.subr.bf16.mxu0 %v3921_v52  ;;  %1061 = vmatprep.subr.bf16.mxu1 %v3923_v53 }
  0x54   :  { %1021 = vmatpush1.bf16.msra.mxu0 %v3925_v54  ;;  %1062 = vmatpush1.bf16.msra.mxu1 %v3927_v55 }
  0x55   :  { %1022 = vmatprep.subr.bf16.mxu0 %v3933_v56  ;;  %1063 = vmatprep.subr.bf16.mxu1 %v3935_v57 }
  0x58   :  { %1023 = vmatpush1.bf16.msra.mxu0 %v3939_v58  ;;  %1064 = vmatpush1.bf16.msra.mxu1 %v3941_v59 }
  0x59   :  { %1024 = vmatprep.subr.bf16.mxu0 %v3945_v60  ;;  %1065 = vmatprep.subr.bf16.mxu1 %v3947_v61 }
  0x5c   :  { %1025 = vmatpush1.bf16.msra.mxu0 %v3949_v62  ;;  %1066 = vmatpush1.bf16.msra.mxu1 %v3951_v63 }
  0x5d   :  { %1026 = vmatprep.subr.bf16.mxu0 %v3957_v1  ;;  %1067 = vmatprep.subr.bf16.mxu1 %v3959_v2 }
  0x60   :  { %1027 = vmatpush1.bf16.msra.mxu0 %v3963_v3  ;;  %1068 = vmatpush1.bf16.msra.mxu1 %v3965_v4 }
  0x61   :  { %1028 = vmatprep.subr.bf16.mxu0 %v3969_v5  ;;  %1069 = vmatprep.subr.bf16.mxu1 %v3971_v6 }
  0x64   :  { %1029 = vmatpush1.bf16.msra.mxu0 %v3973_v7  ;;  %1070 = vmatpush1.bf16.msra.mxu1 %v3975_v8  ;;  %v4073_v8 = vld [vmem:[#allocation4 + $0x1c4] ss:$16 sps:$4 sm:$0xff]   ;;  %v4075_v7 = vld [vmem:[#allocation4 + $0x1cc] ss:$16 sps:$4 sm:$0xff]  }
  0x65   :  { %1030 = vmatprep.subr.bf16.mxu0 %v3981_v9  ;;  %1071 = vmatprep.subr.bf16.mxu1 %v3983_v10  ;;  %v4005_v10 = vld [vmem:[#allocation4 + $0x104] ss:$16 sps:$4 sm:$0xff]   ;;  %v4011_v9 = vld [vmem:[#allocation4 + $0x108] ss:$16 sps:$4 sm:$0xff]   ;;  %5919 = vst [vmem:[#allocation55_spill] sm:$0xff] %v4073_v8  ;;  %5920 = vst [vmem:[#allocation56_spill] sm:$0xff] %v4075_v7 }
  0x66   :  { %5895 = vst [vmem:[#allocation31_spill] sm:$0xff] %v4005_v10  ;;  %5898 = vst [vmem:[#allocation34_spill] sm:$0xff] %v4011_v9 }
  0x68   :  { %1031 = vmatpush1.bf16.msra.mxu0 %v3987_v11  ;;  %1072 = vmatpush1.bf16.msra.mxu1 %v3989_v12  ;;  %v4007_v11 = vld [vmem:[#allocation4 + $0x10c] ss:$16 sps:$4 sm:$0xff]   ;;  %v4009_v12 = vld [vmem:[#allocation4 + $0x100] ss:$16 sps:$4 sm:$0xff]  }
  0x69   :  { %1032 = vmatprep.subr.bf16.mxu0 %v3993_v23  ;;  %1073 = vmatprep.subr.bf16.mxu1 %v3995_v32  ;;  %5896 = vst [vmem:[#allocation32_spill] sm:$0xff] %v4007_v11  ;;  %5897 = vst [vmem:[#allocation33_spill] sm:$0xff] %v4009_v12  ;;  %v4017_v32 = vld [vmem:[#allocation4 + $0x124] ss:$16 sps:$4 sm:$0xff]   ;;  %v4023_v23 = vld [vmem:[#allocation4 + $0x128] ss:$16 sps:$4 sm:$0xff]  }
  0x6a   :  { %5899 = vst [vmem:[#allocation35_spill] sm:$0xff] %v4017_v32  ;;  %5902 = vst [vmem:[#allocation38_spill] sm:$0xff] %v4023_v23 }
  0x6c   :  { %1033 = vmatpush1.bf16.msra.mxu0 %v3997_v39  ;;  %1074 = vmatpush1.bf16.msra.mxu1 %v3999_v0  ;;  %v4019_v39 = vld [vmem:[#allocation4 + $0x12c] ss:$16 sps:$4 sm:$0xff]   ;;  %v4021_v0 = vld [vmem:[#allocation4 + $0x120] ss:$16 sps:$4 sm:$0xff]  }
  0x6d   :  { %1034 = vmatprep.subr.bf16.mxu0 %v4005_v10  ;;  %1075 = vmatprep.subr.bf16.mxu1 %v4007_v11  ;;  %5900 = vst [vmem:[#allocation36_spill] sm:$0xff] %v4019_v39  ;;  %5901 = vst [vmem:[#allocation37_spill] sm:$0xff] %v4021_v0  ;;  %v4029_v11 = vld [vmem:[#allocation4 + $0x144] ss:$16 sps:$4 sm:$0xff]   ;;  %v4035_v10 = vld [vmem:[#allocation4 + $0x148] ss:$16 sps:$4 sm:$0xff]  }
  0x6e   :  { %5903 = vst [vmem:[#allocation39_spill] sm:$0xff] %v4029_v11  ;;  %5906 = vst [vmem:[#allocation42_spill] sm:$0xff] %v4035_v10 }
  0x70   :  { %1035 = vmatpush1.bf16.msra.mxu0 %v4009_v12  ;;  %1076 = vmatpush1.bf16.msra.mxu1 %v4011_v9  ;;  %v4031_v12 = vld [vmem:[#allocation4 + $0x14c] ss:$16 sps:$4 sm:$0xff]   ;;  %v4033_v9 = vld [vmem:[#allocation4 + $0x140] ss:$16 sps:$4 sm:$0xff]  }
  0x71   :  { %1036 = vmatprep.subr.bf16.mxu0 %v4017_v32  ;;  %1077 = vmatprep.subr.bf16.mxu1 %v4019_v39  ;;  %5904 = vst [vmem:[#allocation40_spill] sm:$0xff] %v4031_v12  ;;  %5905 = vst [vmem:[#allocation41_spill] sm:$0xff] %v4033_v9  ;;  %v4041_v39 = vld [vmem:[#allocation4 + $0x164] ss:$16 sps:$4 sm:$0xff]   ;;  %v4047_v32 = vld [vmem:[#allocation4 + $0x168] ss:$16 sps:$4 sm:$0xff]  }
  0x72   :  { %5907 = vst [vmem:[#allocation43_spill] sm:$0xff] %v4041_v39  ;;  %5910 = vst [vmem:[#allocation46_spill] sm:$0xff] %v4047_v32 }
  0x74   :  { %1037 = vmatpush1.bf16.msra.mxu0 %v4021_v0  ;;  %1078 = vmatpush1.bf16.msra.mxu1 %v4023_v23  ;;  %v4043_v0 = vld [vmem:[#allocation4 + $0x16c] ss:$16 sps:$4 sm:$0xff]   ;;  %v4045_v23 = vld [vmem:[#allocation4 + $0x160] ss:$16 sps:$4 sm:$0xff]  }
  0x75   :  { %1038 = vmatprep.subr.bf16.mxu0 %v4029_v11  ;;  %1079 = vmatprep.subr.bf16.mxu1 %v4031_v12  ;;  %5908 = vst [vmem:[#allocation44_spill] sm:$0xff] %v4043_v0  ;;  %5909 = vst [vmem:[#allocation45_spill] sm:$0xff] %v4045_v23  ;;  %v4053_v12 = vld [vmem:[#allocation4 + $0x184] ss:$16 sps:$4 sm:$0xff]   ;;  %v4059_v11 = vld [vmem:[#allocation4 + $0x188] ss:$16 sps:$4 sm:$0xff]  }
  0x76   :  { %5911 = vst [vmem:[#allocation47_spill] sm:$0xff] %v4053_v12  ;;  %5914 = vst [vmem:[#allocation50_spill] sm:$0xff] %v4059_v11 }
  0x78   :  { %1039 = vmatpush1.bf16.msra.mxu0 %v4033_v9  ;;  %1080 = vmatpush1.bf16.msra.mxu1 %v4035_v10  ;;  %v4055_v9 = vld [vmem:[#allocation4 + $0x18c] ss:$16 sps:$4 sm:$0xff]   ;;  %v4057_v10 = vld [vmem:[#allocation4 + $0x180] ss:$16 sps:$4 sm:$0xff]  }
  0x79   :  { %1040 = vmatprep.subr.bf16.mxu0 %v4041_v39  ;;  %1081 = vmatprep.subr.bf16.mxu1 %v4043_v0  ;;  %5912 = vst [vmem:[#allocation48_spill] sm:$0xff] %v4055_v9  ;;  %5913 = vst [vmem:[#allocation49_spill] sm:$0xff] %v4057_v10  ;;  %v4065_v0 = vld [vmem:[#allocation4 + $0x1a4] ss:$16 sps:$4 sm:$0xff]   ;;  %v4071_v39 = vld [vmem:[#allocation4 + $0x1a8] ss:$16 sps:$4 sm:$0xff]  }
  0x7a   :  { %5915 = vst [vmem:[#allocation51_spill] sm:$0xff] %v4065_v0  ;;  %5918 = vst [vmem:[#allocation54_spill] sm:$0xff] %v4071_v39 }
  0x7c   :  { %1041 = vmatpush1.bf16.msra.mxu0 %v4045_v23  ;;  %1082 = vmatpush1.bf16.msra.mxu1 %v4047_v32  ;;  %v4067_v23 = vld [vmem:[#allocation4 + $0x1ac] ss:$16 sps:$4 sm:$0xff]   ;;  %v4069_v32 = vld [vmem:[#allocation4 + $0x1a0] ss:$16 sps:$4 sm:$0xff]  }
  0x7d   :  { %1042 = vmatprep.subr.bf16.mxu0 %v4053_v12  ;;  %1083 = vmatprep.subr.bf16.mxu1 %v4055_v9  ;;  %5916 = vst [vmem:[#allocation52_spill] sm:$0xff] %v4067_v23  ;;  %5917 = vst [vmem:[#allocation53_spill] sm:$0xff] %v4069_v32  ;;  %v4087_v9 = vld [vmem:[#allocation4 + $0x1e4] ss:$16 sps:$4 sm:$0xff]   ;;  %v4089_v12 = vld [vmem:[#allocation4 + $0x1ec] ss:$16 sps:$4 sm:$0xff]  }
  0x7e   :  { %5923 = vst [vmem:[#allocation59_spill] sm:$0xff] %v4087_v9  ;;  %5924 = vst [vmem:[#allocation60_spill] sm:$0xff] %v4089_v12 }
  0x80   :  { %1043 = vmatpush1.bf16.msra.mxu0 %v4057_v10  ;;  %1084 = vmatpush1.bf16.msra.mxu1 %v4059_v11  ;;  %v4081_v11 = vld [vmem:[#allocation4 + $0x1c0] ss:$16 sps:$4 sm:$0xff]   ;;  %v4083_v10 = vld [vmem:[#allocation4 + $0x1c8] ss:$16 sps:$4 sm:$0xff]  }
  0x81   :  { %1044 = vmatprep.subr.bf16.mxu0 %v4065_v0  ;;  %1085 = vmatprep.subr.bf16.mxu1 %v4067_v23  ;;  %5921 = vst [vmem:[#allocation57_spill] sm:$0xff] %v4081_v11  ;;  %5922 = vst [vmem:[#allocation58_spill] sm:$0xff] %v4083_v10  ;;  %v4093_v23 = vld [vmem:[#allocation4 + $0x1e0] ss:$16 sps:$4 sm:$0xff]  }
  0x82   :  { %5925 = vst [vmem:[#allocation61_spill] sm:$0xff] %v4093_v23 }
  0x84   :  { %1045 = vmatpush1.bf16.msra.mxu0 %v4069_v32  ;;  %1086 = vmatpush1.bf16.msra.mxu1 %v4071_v39  ;;  %v4095_v32 = vld [vmem:[#allocation4 + $0x1e8] ss:$16 sps:$4 sm:$0xff]  }
  0x85   :  { %1046 = vmatprep.subr.bf16.mxu0 %v4073_v8  ;;  %1087 = vmatprep.subr.bf16.mxu1 %v4075_v7  ;;  %5926 = vst [vmem:[#allocation62_spill] sm:$0xff] %v4095_v32  ;;  %v84_v7 = vlaneseq }
  0x88   :  { %1047 = vmatpush1.bf16.msra.mxu0 %v4081_v11  ;;  %1088 = vmatpush1.bf16.msra.mxu1 %v4083_v10  ;;  %v4103_v11 = vshrl.u32 %v84_v7, 7 }
  0x89   :  { %1048 = vmatprep.subr.bf16.mxu0 %v4087_v9  ;;  %1089 = vmatprep.subr.bf16.mxu1 %v4089_v12  ;;  %v82_v12 = vld [vmem:[%s5518_s3] sm:$0xf] }
  0x8a   :  { %5927 = vst [vmem:[#allocation63_spill] sm:$0xff] %v4103_v11  ;;  %v5622_v10 = vsub.s32 2, %v4103_v11  ;;  %v5631_v8 = vsub.s32 3, %v4103_v11  ;;  %v5632_v39 = vsub.s32 0, %v4103_v11 }
  0x8c   :  { %1049 = vmatpush1.bf16.msra.mxu0 %v4093_v23  ;;  %1090 = vmatpush1.bf16.msra.mxu1 %v4095_v32  ;;  %v5639_v23 = vsub.s32 1, %v4103_v11  ;;  %v4122_v32 = vrot.slane %v82_v12, %v5631_v8  ;;  %v87_v9 = vrot.slane %v82_v12, %v5632_v39 }
  0x8d   :  { %1119 = vmatprep.subr.bf16.mxu0 %v3784_v13  ;;  %1160 = vmatprep.subr.bf16.mxu1 %v3786_v14  ;;  %v4114_v13 = vrot.slane %v82_v12, %v5622_v10 }
  0x8e   :  { %v91_v5 = vrot.slane %v82_v12, %v5639_v23 }
 0x101   :  { %v4116_v14 = vpop.f32.mrb[0].mxu0  ;;  %v4118_v7 = vpop.f32.mrb[0].mxu1 }
 0x102   :  { %v205_v0 = vpop.f32.mrb[1].mxu0  ;;  %v278_v6 = vpop.f32.mrb[1].mxu1 }
 0x103   :  { %v207_v4 = vpop.f32.mrb[2].mxu0  ;;  %v280_v3 = vpop.f32.mrb[2].mxu1 }
 0x104   :  { %v4128_v10 = vadd.f32 %v207_v4, %v87_v9  ;;  %v209_v2 = vpop.f32.mrb[3].mxu0  ;;  %v4131_v1 = vadd.f32 %v280_v3, %v4114_v13  ;;  %v282_v63 = vpop.f32.mrb[3].mxu1 }
 0x105   :  { %v4133_v62 = vadd.f32 %v209_v2, %v91_v5  ;;  %v4136_v8 = vadd.f32 %v282_v63, %v4122_v32 }
 0x106   :  { %5928 = vst [vmem:[#allocation64_spill] sm:$0xff] %v4128_v10  ;;  %5929 = vst [vmem:[#allocation65_spill] sm:$0xff] %v4131_v1 }
 0x107   :  { %5930 = vst [vmem:[#allocation66_spill] sm:$0xff] %v4133_v62  ;;  %5931 = vst [vmem:[#allocation67_spill] sm:$0xff] %v4136_v8 }
 0x109   :  { %v213_v39 = vpop.f32.mrb[4].mxu0  ;;  %v286_v61 = vpop.f32.mrb[4].mxu1 }
 0x10a   :  { %v4138_v60 = vadd.f32 %v213_v39, %v87_v9  ;;  %v215_v11 = vpop.f32.mrb[5].mxu0  ;;  %v4141_v12 = vadd.f32 %v286_v61, %v4114_v13  ;;  %v288_v4 = vpop.f32.mrb[5].mxu1 }
 0x10b   :  { %v4143_v23 = vadd.f32 %v215_v11, %v91_v5  ;;  %v217_v10 = vpop.f32.mrb[6].mxu0  ;;  %v4146_v3 = vadd.f32 %v288_v4, %v4122_v32  ;;  %v290_v2 = vpop.f32.mrb[6].mxu1 }
 0x10c   :  { %5932 = vst [vmem:[#allocation68_spill] sm:$0xff] %v4138_v60  ;;  %5933 = vst [vmem:[#allocation69_spill] sm:$0xff] %v4141_v12  ;;  %v4148_v62 = vadd.f32 %v217_v10, %v87_v9  ;;  %v219_v63 = vpop.f32.mrb[7].mxu0  ;;  %v4151_v8 = vadd.f32 %v290_v2, %v4114_v13  ;;  %v292_v39 = vpop.f32.mrb[7].mxu1 }
 0x10d   :  { %5934 = vst [vmem:[#allocation70_spill] sm:$0xff] %v4143_v23  ;;  %5935 = vst [vmem:[#allocation71_spill] sm:$0xff] %v4146_v3  ;;  %v4153_v60 = vadd.f32 %v219_v63, %v91_v5  ;;  %v4156_v61 = vadd.f32 %v292_v39, %v4122_v32 }
 0x10e   :  { %5936 = vst [vmem:[#allocation72_spill] sm:$0xff] %v4148_v62  ;;  %5937 = vst [vmem:[#allocation73_spill] sm:$0xff] %v4151_v8 }
 0x10f   :  { %5938 = vst [vmem:[#allocation74_spill] sm:$0xff] %v4153_v60  ;;  %5939 = vst [vmem:[#allocation75_spill] sm:$0xff] %v4156_v61 }
 0x111   :  { %v223_v12 = vpop.f32.mrb[8].mxu0  ;;  %v296_v11 = vpop.f32.mrb[8].mxu1 }
 0x112   :  { %v4158_v23 = vadd.f32 %v223_v12, %v87_v9  ;;  %v225_v1 = vpop.f32.mrb[9].mxu0  ;;  %v4161_v4 = vadd.f32 %v296_v11, %v4114_v13  ;;  %v298_v10 = vpop.f32.mrb[9].mxu1 }
 0x113   :  { %v4163_v62 = vadd.f32 %v225_v1, %v91_v5  ;;  %v227_v3 = vpop.f32.mrb[10].mxu0  ;;  %v4166_v2 = vadd.f32 %v298_v10, %v4122_v32  ;;  %v300_v63 = vpop.f32.mrb[10].mxu1 }
 0x114   :  { %5940 = vst [vmem:[#allocation76_spill] sm:$0xff] %v4158_v23  ;;  %5941 = vst [vmem:[#allocation77_spill] sm:$0xff] %v4161_v4  ;;  %v4168_v60 = vadd.f32 %v227_v3, %v87_v9  ;;  %v229_v39 = vpop.f32.mrb[11].mxu0  ;;  %v4171_v61 = vadd.f32 %v300_v63, %v4114_v13  ;;  %v302_v12 = vpop.f32.mrb[11].mxu1 }
 0x115   :  { %5942 = vst [vmem:[#allocation78_spill] sm:$0xff] %v4163_v62  ;;  %5943 = vst [vmem:[#allocation79_spill] sm:$0xff] %v4166_v2  ;;  %v4173_v23 = vadd.f32 %v229_v39, %v91_v5  ;;  %v4176_v11 = vadd.f32 %v302_v12, %v4122_v32 }
 0x116   :  { %5944 = vst [vmem:[#allocation80_spill] sm:$0xff] %v4168_v60  ;;  %5945 = vst [vmem:[#allocation81_spill] sm:$0xff] %v4171_v61 }
 0x117   :  { %5946 = vst [vmem:[#allocation82_spill] sm:$0xff] %v4173_v23  ;;  %5947 = vst [vmem:[#allocation83_spill] sm:$0xff] %v4176_v11 }
 0x119   :  { %v233_v4 = vpop.f32.mrb[12].mxu0  ;;  %v306_v1 = vpop.f32.mrb[12].mxu1 }
 0x11a   :  { %v4178_v62 = vadd.f32 %v233_v4, %v87_v9  ;;  %v235_v8 = vpop.f32.mrb[13].mxu0  ;;  %v4181_v10 = vadd.f32 %v306_v1, %v4114_v13  ;;  %v308_v3 = vpop.f32.mrb[13].mxu1 }
 0x11b   :  { %v4183_v60 = vadd.f32 %v235_v8, %v91_v5  ;;  %v237_v2 = vpop.f32.mrb[14].mxu0  ;;  %v4186_v63 = vadd.f32 %v308_v3, %v4122_v32  ;;  %v310_v39 = vpop.f32.mrb[14].mxu1  ;;  %v204_v8 = vadd.f32 %v4116_v14, %v87_v9  ;;  %v206_v3 = vadd.f32 %v205_v0, %v91_v5 }
 0x11c   :  { %5948 = vst [vmem:[#allocation84_spill] sm:$0xff] %v4178_v62  ;;  %5949 = vst [vmem:[#allocation85_spill] sm:$0xff] %v4181_v10  ;;  %v4188_v23 = vadd.f32 %v237_v2, %v87_v9  ;;  %v239_v12 = vpop.f32.mrb[15].mxu0  ;;  %v4191_v11 = vadd.f32 %v310_v39, %v4114_v13  ;;  %v312_v4 = vpop.f32.mrb[15].mxu1 }
 0x11d   :  { %5950 = vst [vmem:[#allocation86_spill] sm:$0xff] %v4183_v60  ;;  %5951 = vst [vmem:[#allocation87_spill] sm:$0xff] %v4186_v63  ;;  %v4193_v62 = vadd.f32 %v239_v12, %v91_v5  ;;  %v4196_v1 = vadd.f32 %v312_v4, %v4122_v32  ;;  %v277_v60 = vadd.f32 %v4118_v7, %v4114_v13 }
 0x11e   :  { %5952 = vst [vmem:[#allocation88_spill] sm:$0xff] %v4188_v23  ;;  %5953 = vst [vmem:[#allocation89_spill] sm:$0xff] %v4191_v11  ;;  %v279_v63 = vadd.f32 %v278_v6, %v4122_v32 }
 0x11f   :  { %5954 = vst [vmem:[#allocation90_spill] sm:$0xff] %v4193_v62  ;;  %5955 = vst [vmem:[#allocation91_spill] sm:$0xff] %v4196_v1 }
 0x121   :  { %v627_v2 = vpop.f32.mrb[16].mxu0  ;;  %v668_v23 = vpop.f32.mrb[16].mxu1 }
 0x122   :  { %v675_v10 = vadd.f32 %v627_v2, %v204_v8  ;;  %v677_v61 = vadd.f32 %v668_v23, %v277_v60  ;;  %v629_v39 = vpop.f32.mrb[17].mxu0  ;;  %v670_v11 = vpop.f32.mrb[17].mxu1  ;;  %v5987_v8 = vld [vmem:[#allocation38_spill] sm:$0xff]  ;;  %v5989_v2 = vld [vmem:[#allocation40_spill] sm:$0xff] }
 0x123   :  { %v676_v59 = vadd.f32 %v629_v39, %v206_v3  ;;  %v678_v12 = vadd.f32 %v670_v11, %v279_v63  ;;  %v631_v62 = vpop.f32.mrb[18].mxu0  ;;  %v672_v58 = vpop.f32.mrb[18].mxu1  ;;  %v5988_v3 = vld [vmem:[#allocation39_spill] sm:$0xff]  ;;  %v5990_v39 = vld [vmem:[#allocation41_spill] sm:$0xff] }
 0x124   :  { %v679_v4 = vmul.f32 0.5, %v675_v10  ;;  %v632_v1 = vpop.f32.mrb[19].mxu0  ;;  %v673_v57 = vpop.f32.mrb[19].mxu1  ;;  %v681_v0 = vmul.f32 0.5, %v677_v61 }
 0x125   :  { %v680_v9 = vmul.f32 0.5, %v676_v59  ;;  %v5956_v1 = vmov 0  }
 0x126   :  { %3270 = vtanh.f32 %v679_v4  ;;  %v5992_v4 = vld [vmem:[#allocation43_spill] sm:$0xff] }
 0x127   :  { %3272 = vtanh.f32 %v680_v9  ;;  %v5993_v9 = vld [vmem:[#allocation44_spill] sm:$0xff] }
 0x128   :  { %3274 = vtanh.f32 %v678_v12  ;;  %v5991_v12 = vld [vmem:[#allocation42_spill] sm:$0xff] }
 0x129   :  { %3276 = vtanh.f32 %v681_v0  ;;  %v5994_v0 = vld [vmem:[#allocation45_spill] sm:$0xff] }
 0x130   :  { %v3271_v5 = vpop.eup %3270 }
 0x131   :  { %v685_v6 = vmul.f32 0.5, %v3271_v5  ;;  %v3273_v32 = vpop.eup %3272  ;;  %v5995_v5 = vld [vmem:[#allocation46_spill] sm:$0xff] }
 0x132   :  { %v686_v60 = vmul.f32 0.5, %v3273_v32  ;;  %v3275_v23 = vpop.eup %3274  ;;  %v5997_v32 = vld [vmem:[#allocation48_spill] sm:$0xff] }
 0x133   :  { %v688_v13 = vadd.f32 0.5, %v685_v6  ;;  %v3277_v57 = vpop.eup %3276  ;;  %v5996_v6 = vld [vmem:[#allocation47_spill] sm:$0xff] }
 0x134   :  { %v689_v14 = vadd.f32 0.5, %v686_v60  ;;  %v687_v58 = vmul.f32 0.5, %v3277_v57  ;;  %v5999_v60 = vld [vmem:[#allocation50_spill] sm:$0xff]  ;;  %v6004_v57 = vld [vmem:[#allocation55_spill] sm:$0xff] }
 0x135   :  { %v693_v7 = vmul.f32 %v3275_v23, %v688_v13  ;;  %v5998_v13 = vld [vmem:[#allocation49_spill] sm:$0xff]  ;;  %v6000_v23 = vld [vmem:[#allocation51_spill] sm:$0xff] }
 0x136   :  { %v692_v11 = vmul.f32 0.0, %v689_v14  ;;  %v690_v59 = vadd.f32 0.5, %v687_v58  ;;  %v6001_v14 = vld [vmem:[#allocation52_spill] sm:$0xff] }
 0x137   :  { %v6005_v58 = vld [vmem:[#allocation56_spill] sm:$0xff] }
 0x138   :  { %v4202_v62 = vadd.f32 %v693_v7, %v692_v11  ;;  %v6002_v7 = vld [vmem:[#allocation53_spill] sm:$0xff]  ;;  %v6003_v11 = vld [vmem:[#allocation54_spill] sm:$0xff] }
 0x13a   :  { %3278 = vtanh.f32 %v4202_v62 }
 0x144   :  { %v3279_v10 = vpop.eup %3278 }
 0x145   :  { %v696_v63 = vmul.f32 %v3279_v10, %v690_v59  ;;  %v6006_v59 = vld [vmem:[#allocation57_spill] sm:$0xff]  ;;  %v6007_v10 = vld [vmem:[#allocation58_spill] sm:$0xff] }
 0x147   :  { %v697_v61 = vpack.c.bf16 %v696_v63, %v696_v63  ;;  %v6008_v63 = vld [vmem:[#allocation59_spill] sm:$0xff] }
 0x149   :  { %1051 = vmatmul.mubr.bf16.vlgmr.msra.gmra.mrb[20].mxu0 %v697_v61  ;;  %1092 = vmatmul.mubr.bf16.vlgmr.msra.gmra.mrb[20].mxu1 %v697_v61 }
 0x14a   :  { %1120 = vmatpush1.bf16.msra.mxu0 %v3788_v15  ;;  %1161 = vmatpush1.bf16.msra.mxu1 %v3790_v16  ;;  %v5957_v15 = vld [vmem:[#allocation8_spill] sm:$0xff]  ;;  %v5958_v16 = vld [vmem:[#allocation9_spill] sm:$0xff] }
 0x14b   :  { %1121 = vmatprep.subr.bf16.mxu0 %v3794_v17  ;;  %1162 = vmatprep.subr.bf16.mxu1 %v3796_v18  ;;  %v5959_v17 = vld [vmem:[#allocation10_spill] sm:$0xff]  ;;  %v5960_v18 = vld [vmem:[#allocation11_spill] sm:$0xff] }
 0x14c   :  { %1151 = vmatprep.mubr.bf16.mxu0 %v5956_v1  ;;  %1192 = vmatprep.mubr.bf16.mxu1 %v5956_v1 }
 0x14e   :  { %1122 = vmatpush1.bf16.msra.mxu0 %v3798_v19  ;;  %1163 = vmatpush1.bf16.msra.mxu1 %v3802_v20  ;;  %v5961_v19 = vld [vmem:[#allocation12_spill] sm:$0xff]  ;;  %v5962_v20 = vld [vmem:[#allocation13_spill] sm:$0xff] }
 0x14f   :  { %1123 = vmatprep.subr.bf16.mxu0 %v3806_v21  ;;  %1164 = vmatprep.subr.bf16.mxu1 %v3810_v22  ;;  %v5963_v21 = vld [vmem:[#allocation14_spill] sm:$0xff]  ;;  %v5964_v22 = vld [vmem:[#allocation15_spill] sm:$0xff] }
 0x152   :  { %1124 = vmatpush1.bf16.msra.mxu0 %v3817_v24  ;;  %1165 = vmatpush1.bf16.msra.mxu1 %v3821_v25  ;;  %v5965_v24 = vld [vmem:[#allocation16_spill] sm:$0xff]  ;;  %v5966_v25 = vld [vmem:[#allocation17_spill] sm:$0xff] }
 0x153   :  { %1125 = vmatprep.subr.bf16.mxu0 %v3823_v26  ;;  %1166 = vmatprep.subr.bf16.mxu1 %v3827_v27  ;;  %v5967_v26 = vld [vmem:[#allocation18_spill] sm:$0xff]  ;;  %v5968_v27 = vld [vmem:[#allocation19_spill] sm:$0xff] }
 0x156   :  { %1126 = vmatpush1.bf16.msra.mxu0 %v3833_v28  ;;  %1167 = vmatpush1.bf16.msra.mxu1 %v3835_v29  ;;  %v5969_v28 = vld [vmem:[#allocation20_spill] sm:$0xff]  ;;  %v5970_v29 = vld [vmem:[#allocation21_spill] sm:$0xff] }
 0x157   :  { %1127 = vmatprep.subr.bf16.mxu0 %v3837_v30  ;;  %1168 = vmatprep.subr.bf16.mxu1 %v3841_v31  ;;  %v5971_v30 = vld [vmem:[#allocation22_spill] sm:$0xff]  ;;  %v5972_v31 = vld [vmem:[#allocation23_spill] sm:$0xff] }
 0x15a   :  { %1128 = vmatpush1.bf16.msra.mxu0 %v3848_v33  ;;  %1169 = vmatpush1.bf16.msra.mxu1 %v3850_v34  ;;  %v5973_v33 = vld [vmem:[#allocation24_spill] sm:$0xff]  ;;  %v5974_v34 = vld [vmem:[#allocation25_spill] sm:$0xff] }
 0x15b   :  { %1129 = vmatprep.subr.bf16.mxu0 %v3854_v35  ;;  %1170 = vmatprep.subr.bf16.mxu1 %v3858_v36  ;;  %v5975_v35 = vld [vmem:[#allocation26_spill] sm:$0xff]  ;;  %v5976_v36 = vld [vmem:[#allocation27_spill] sm:$0xff] }
 0x15e   :  { %1130 = vmatpush1.bf16.msra.mxu0 %v3862_v37  ;;  %1171 = vmatpush1.bf16.msra.mxu1 %v3866_v38  ;;  %v5977_v37 = vld [vmem:[#allocation28_spill] sm:$0xff]  ;;  %v5978_v38 = vld [vmem:[#allocation29_spill] sm:$0xff] }
 0x15f   :  { %1131 = vmatprep.subr.bf16.mxu0 %v3873_v40  ;;  %1172 = vmatprep.subr.bf16.mxu1 %v3875_v41  ;;  %v5979_v40 = vld [vmem:[#allocation30_spill] sm:$0xff]  ;;  %v5980_v41 = vld [vmem:[#allocation31_spill] sm:$0xff] }
 0x162   :  { %1132 = vmatpush1.bf16.msra.mxu0 %v3879_v42  ;;  %1173 = vmatpush1.bf16.msra.mxu1 %v3881_v43  ;;  %v5981_v42 = vld [vmem:[#allocation32_spill] sm:$0xff]  ;;  %v5982_v43 = vld [vmem:[#allocation33_spill] sm:$0xff] }
 0x163   :  { %1133 = vmatprep.subr.bf16.mxu0 %v3883_v44  ;;  %1174 = vmatprep.subr.bf16.mxu1 %v3885_v45  ;;  %v5983_v44 = vld [vmem:[#allocation34_spill] sm:$0xff]  ;;  %v5984_v45 = vld [vmem:[#allocation35_spill] sm:$0xff] }
 0x166   :  { %1134 = vmatpush1.bf16.msra.mxu0 %v3891_v46  ;;  %1175 = vmatpush1.bf16.msra.mxu1 %v3893_v47  ;;  %v5985_v46 = vld [vmem:[#allocation36_spill] sm:$0xff]  ;;  %v5986_v47 = vld [vmem:[#allocation37_spill] sm:$0xff] }
 0x167   :  { %1224 = vmatprep.subr.bf16.mxu0 %v3909_v48  ;;  %1265 = vmatprep.subr.bf16.mxu1 %v3911_v49 }
 0x169   :  { %1152 = vmatmul.mubr.bf16.vlgmr.msra.gmra.mrb[24].mxu0 %v697_v61  ;;  %1193 = vmatmul.mubr.bf16.vlgmr.msra.gmra.mrb[24].mxu1 %v697_v61  ;;  %v6009_v61 = vld [vmem:[#allocation60_spill] sm:$0xff] }
 0x16a   :  { %1225 = vmatpush1.bf16.msra.mxu0 %v3915_v50  ;;  %1266 = vmatpush1.bf16.msra.mxu1 %v3917_v51 }
 0x16b   :  { %1226 = vmatprep.subr.bf16.mxu0 %v3921_v52  ;;  %1267 = vmatprep.subr.bf16.mxu1 %v3923_v53 }
 0x16e   :  { %1227 = vmatpush1.bf16.msra.mxu0 %v3925_v54  ;;  %1268 = vmatpush1.bf16.msra.mxu1 %v3927_v55 }
 0x16f   :  { %1228 = vmatprep.subr.bf16.mxu0 %v3933_v56  ;;  %1269 = vmatprep.subr.bf16.mxu1 %v5957_v15 }
 0x172   :  { %1229 = vmatpush1.bf16.msra.mxu0 %v5958_v16  ;;  %1270 = vmatpush1.bf16.msra.mxu1 %v5959_v17 }
 0x173   :  { %1230 = vmatprep.subr.bf16.mxu0 %v5960_v18  ;;  %1271 = vmatprep.subr.bf16.mxu1 %v5961_v19 }
 0x176   :  { %1231 = vmatpush1.bf16.msra.mxu0 %v5962_v20  ;;  %1272 = vmatpush1.bf16.msra.mxu1 %v5963_v21 }
 0x177   :  { %1232 = vmatprep.subr.bf16.mxu0 %v5964_v22  ;;  %1273 = vmatprep.subr.bf16.mxu1 %v5965_v24 }
 0x17a   :  { %1233 = vmatpush1.bf16.msra.mxu0 %v5966_v25  ;;  %1274 = vmatpush1.bf16.msra.mxu1 %v5967_v26 }
 0x17b   :  { %1234 = vmatprep.subr.bf16.mxu0 %v5968_v27  ;;  %1275 = vmatprep.subr.bf16.mxu1 %v5969_v28 }
 0x17e   :  { %1235 = vmatpush1.bf16.msra.mxu0 %v5970_v29  ;;  %1276 = vmatpush1.bf16.msra.mxu1 %v5971_v30 }
 0x17f   :  { %1236 = vmatprep.subr.bf16.mxu0 %v5972_v31  ;;  %1277 = vmatprep.subr.bf16.mxu1 %v5973_v33 }
 0x182   :  { %1237 = vmatpush1.bf16.msra.mxu0 %v5974_v34  ;;  %1278 = vmatpush1.bf16.msra.mxu1 %v5975_v35 }
 0x183   :  { %1238 = vmatprep.subr.bf16.mxu0 %v5976_v36  ;;  %1279 = vmatprep.subr.bf16.mxu1 %v5977_v37 }
 0x186   :  { %1239 = vmatpush1.bf16.msra.mxu0 %v5978_v38  ;;  %1280 = vmatpush1.bf16.msra.mxu1 %v5979_v40 }
 0x187   :  { %1240 = vmatprep.subr.bf16.mxu0 %v5980_v41  ;;  %1281 = vmatprep.subr.bf16.mxu1 %v5981_v42 }
 0x18a   :  { %1241 = vmatpush1.bf16.msra.mxu0 %v5982_v43  ;;  %1282 = vmatpush1.bf16.msra.mxu1 %v5983_v44 }
 0x18b   :  { %1242 = vmatprep.subr.bf16.mxu0 %v5984_v45  ;;  %1283 = vmatprep.subr.bf16.mxu1 %v5985_v46 }
 0x18e   :  { %1243 = vmatpush1.bf16.msra.mxu0 %v5986_v47  ;;  %1284 = vmatpush1.bf16.msra.mxu1 %v5987_v8 }
 0x18f   :  { %1244 = vmatprep.subr.bf16.mxu0 %v5988_v3  ;;  %1285 = vmatprep.subr.bf16.mxu1 %v5989_v2 }
 0x192   :  { %1245 = vmatpush1.bf16.msra.mxu0 %v5990_v39  ;;  %1286 = vmatpush1.bf16.msra.mxu1 %v5991_v12 }
 0x193   :  { %1246 = vmatprep.subr.bf16.mxu0 %v5992_v4  ;;  %1287 = vmatprep.subr.bf16.mxu1 %v5993_v9 }
 0x196   :  { %1247 = vmatpush1.bf16.msra.mxu0 %v5994_v0  ;;  %1288 = vmatpush1.bf16.msra.mxu1 %v5995_v5 }
 0x197   :  { %1248 = vmatprep.subr.bf16.mxu0 %v5996_v6  ;;  %1289 = vmatprep.subr.bf16.mxu1 %v5997_v32 }
 0x19a   :  { %1249 = vmatpush1.bf16.msra.mxu0 %v5998_v13  ;;  %1290 = vmatpush1.bf16.msra.mxu1 %v5999_v60  ;;  %v6010_v60 = vld [vmem:[#allocation61_spill] sm:$0xff] }
 0x19b   :  { %1250 = vmatprep.subr.bf16.mxu0 %v6000_v23  ;;  %1291 = vmatprep.subr.bf16.mxu1 %v6001_v14  ;;  %v6011_v23 = vld [vmem:[#allocation62_spill] sm:$0xff] }
 0x19c   :  { %v4301_v14 = vld [vmem:[#allocation2 + $0x4] ss:$16 sps:$4 sm:$0xff]  }
 0x19d   :  { %6012 = vst [vmem:[#allocation8_spill] sm:$0xff] %v4301_v14 }
 0x19e   :  { %1251 = vmatpush1.bf16.msra.mxu0 %v6002_v7  ;;  %1292 = vmatpush1.bf16.msra.mxu1 %v6003_v11  ;;  %v4304_v11 = vld [vmem:[#allocation2 + $0xc] ss:$16 sps:$4 sm:$0xff]  }
 0x19f   :  { %1252 = vmatprep.subr.bf16.mxu0 %v6004_v57  ;;  %1293 = vmatprep.subr.bf16.mxu1 %v6005_v58  ;;  %6013 = vst [vmem:[#allocation9_spill] sm:$0xff] %v4304_v11 }
 0x1a2   :  { %1253 = vmatpush1.bf16.msra.mxu0 %v6006_v59  ;;  %1294 = vmatpush1.bf16.msra.mxu1 %v6007_v10  ;;  %v411_v10 = vld [vmem:[%s5520_s5] sm:$0xf]  ;;  %v6014_v59 = vld [vmem:[#allocation63_spill] sm:$0xff] }
 0x1a3   :  { %1254 = vmatprep.subr.bf16.mxu0 %v6008_v63  ;;  %1295 = vmatprep.subr.bf16.mxu1 %v6009_v61  ;;  %v6015_v63 = vsub.s32 0, %v6014_v59  ;;  %v6019_v13 = vsub.s32 3, %v6014_v59  ;;  %v6021_v39 = vsub.s32 2, %v6014_v59 }
 0x1a5   :  { %v4312_v58 = vrot.slane %v411_v10, %v6015_v63 }
 0x1a6   :  { %1255 = vmatpush1.bf16.msra.mxu0 %v6010_v60  ;;  %1296 = vmatpush1.bf16.msra.mxu1 %v6011_v23  ;;  %v6017_v60 = vsub.s32 1, %v6014_v59 }
 0x1a7   :  { %1325 = vmatprep.subr.bf16.mxu0 %v4301_v14  ;;  %1366 = vmatprep.subr.bf16.mxu1 %v4304_v11  ;;  %6016 = vst [vmem:[#allocation10_spill] sm:$0xff] %v4312_v58  ;;  %v4321_v11 = vrot.slane %v411_v10, %v6019_v13 }
 0x1a8   :  { %v4316_v61 = vrot.slane %v411_v10, %v6017_v60 }
 0x1a9   :  { %6020 = vst [vmem:[#allocation12_spill] sm:$0xff] %v4321_v11 }
 0x1aa   :  { %6018 = vst [vmem:[#allocation11_spill] sm:$0xff] %v4316_v61 }
 0x21c   :  { %v1052_v23 = vpop.f32.mrb[20].mxu0  ;;  %v1093_v57 = vpop.f32.mrb[20].mxu1 }
 0x21d   :  { %v1053_v14 = vadd.f32 %v1052_v23, %v4312_v58  ;;  %v1054_v7 = vpop.f32.mrb[21].mxu0  ;;  %v1095_v32 = vpop.f32.mrb[21].mxu1  ;;  %v4327_v23 = vrot.slane %v411_v10, %v6021_v39 }
 0x21e   :  { %v1055_v6 = vadd.f32 %v1054_v7, %v4316_v61  ;;  %v1056_v5 = vpop.f32.mrb[22].mxu0  ;;  %v1097_v0 = vpop.f32.mrb[22].mxu1  ;;  %v1096_v60 = vadd.f32 %v1095_v32, %v4321_v11  ;;  %v6027_v11 = vld [vmem:[#allocation67_spill] sm:$0xff] }
 0x21f   :  { %v1100_v63 = vmul.f32 0.5, %v1053_v14  ;;  %v1057_v9 = vpop.f32.mrb[23].mxu0  ;;  %v1098_v4 = vpop.f32.mrb[23].mxu1  ;;  %6022 = vst [vmem:[#allocation13_spill] sm:$0xff] %v4327_v23  ;;  %v1094_v13 = vadd.f32 %v1093_v57, %v4327_v23  ;;  %v6024_v57 = vld [vmem:[#allocation64_spill] sm:$0xff] }
 0x220   :  { %v1101_v12 = vmul.f32 0.5, %v1055_v6 }
 0x221   :  { %3280 = vtanh.f32 %v1100_v63  ;;  %v1102_v58 = vmul.f32 0.5, %v1094_v13  ;;  %v6025_v13 = vld [vmem:[#allocation65_spill] sm:$0xff] }
 0x222   :  { %3282 = vtanh.f32 %v1101_v12 }
 0x223   :  { %3284 = vtanh.f32 %v1096_v60 }
 0x224   :  { %3286 = vtanh.f32 %v1102_v58  ;;  %v6026_v58 = vld [vmem:[#allocation66_spill] sm:$0xff] }
 0x22b   :  { %v3281_v2 = vpop.eup %3280 }
 0x22c   :  { %v1106_v7 = vmul.f32 0.5, %v3281_v2  ;;  %v3283_v5 = vpop.eup %3282 }
 0x22d   :  { %v1107_v9 = vmul.f32 0.5, %v3283_v5  ;;  %v3285_v4 = vpop.eup %3284 }
 0x22e   :  { %v1109_v0 = vadd.f32 0.5, %v1106_v7  ;;  %v3287_v39 = vpop.eup %3286 }
 0x22f   :  { %v1110_v6 = vadd.f32 0.5, %v1107_v9  ;;  %v1108_v12 = vmul.f32 0.5, %v3287_v39 }
 0x230   :  { %v1114_v14 = vmul.f32 %v3285_v4, %v1109_v0 }
 0x231   :  { %v1113_v63 = vmul.f32 0.0, %v1110_v6  ;;  %v1111_v6 = vadd.f32 0.5, %v1108_v12 }
 0x233   :  { %v4330_v32 = vadd.f32 %v1114_v14, %v1113_v63 }
 0x235   :  { %6023 = vst [vmem:[#allocation14_spill] sm:$0xff] %v4330_v32  ;;  %3288 = vtanh.f32 %v4330_v32 }
 0x23c   :  { %v1153_v59 = vpop.f32.mrb[24].mxu0  ;;  %v1194_v10 = vpop.f32.mrb[24].mxu1 }
 0x23d   :  { %v1201_v60 = vadd.f32 %v1153_v59, %v6024_v57  ;;  %v1203_v2 = vadd.f32 %v1194_v10, %v6025_v13  ;;  %v1155_v23 = vpop.f32.mrb[25].mxu0  ;;  %v1196_v7 = vpop.f32.mrb[25].mxu1 }
 0x23e   :  { %v1202_v5 = vadd.f32 %v1155_v23, %v6026_v58  ;;  %v1204_v9 = vadd.f32 %v1196_v7, %v6027_v11  ;;  %v1157_v0 = vpop.f32.mrb[26].mxu0  ;;  %v1198_v4 = vpop.f32.mrb[26].mxu1 }
 0x23f   :  { %v1205_v14 = vmul.f32 0.5, %v1201_v60  ;;  %v1158_v63 = vpop.f32.mrb[27].mxu0  ;;  %v1199_v32 = vpop.f32.mrb[27].mxu1  ;;  %v1207_v10 = vmul.f32 0.5, %v1203_v2 }
 0x240   :  { %v3289_v61 = vpop.eup %3288  ;;  %v1206_v39 = vmul.f32 0.5, %v1202_v5  ;;  %v4354_v63 = vld [vmem:[#allocation2 + $0x2c] ss:$16 sps:$4 sm:$0xff]  }
 0x241   :  { %3290 = vtanh.f32 %v1205_v14  ;;  %v1117_v3 = vmul.f32 %v3289_v61, %v1111_v6  ;;  %v4345_v6 = vld [vmem:[#allocation2] ss:$16 sps:$4 sm:$0xff]   ;;  %v4351_v14 = vld [vmem:[#allocation2 + $0x24] ss:$16 sps:$4 sm:$0xff]  }
 0x242   :  { %3292 = vtanh.f32 %v1206_v39  ;;  %v4359_v39 = vld [vmem:[#allocation2 + $0x20] ss:$16 sps:$4 sm:$0xff]  }
 0x243   :  { %v1118_v59 = vpack.c.bf16 %v1117_v3, %v1117_v3  ;;  %3294 = vtanh.f32 %v1204_v9 }
 0x244   :  { %3296 = vtanh.f32 %v1207_v10  ;;  %v4365_v10 = vld [vmem:[#allocation2 + $0x44] ss:$16 sps:$4 sm:$0xff]  }
 0x245   :  { %1256 = vmatprep.mubr.bf16.mxu0 %v1118_v59  ;;  %1297 = vmatprep.mubr.bf16.mxu1 %v1118_v59  ;;  %v4362_v59 = vld [vmem:[#allocation2 + $0x28] ss:$16 sps:$4 sm:$0xff]  }
 0x24b   :  { %v3291_v57 = vpop.eup %3290 }
 0x24c   :  { %v1211_v23 = vmul.f32 0.5, %v3291_v57  ;;  %v3293_v13 = vpop.eup %3292  ;;  %v4368_v57 = vld [vmem:[#allocation2 + $0x4c] ss:$16 sps:$4 sm:$0xff]  }
 0x24d   :  { %v1212_v7 = vmul.f32 0.5, %v3293_v13  ;;  %v3295_v12 = vpop.eup %3294  ;;  %v4374_v13 = vld [vmem:[#allocation2 + $0x48] ss:$16 sps:$4 sm:$0xff]  }
 0x24e   :  { %v1214_v11 = vadd.f32 0.5, %v1211_v23  ;;  %v3297_v3 = vpop.eup %3296  ;;  %v4371_v23 = vld [vmem:[#allocation2 + $0x40] ss:$16 sps:$4 sm:$0xff]  }
 0x24f   :  { %v1215_v60 = vadd.f32 0.5, %v1212_v7  ;;  %v1213_v61 = vmul.f32 0.5, %v3297_v3  ;;  %v4380_v7 = vld [vmem:[#allocation2 + $0x6c] ss:$16 sps:$4 sm:$0xff]   ;;  %v4395_v3 = vld [vmem:[#allocation2 + $0x80] ss:$16 sps:$4 sm:$0xff]  }
 0x250   :  { %v1219_v58 = vmul.f32 %v3295_v12, %v1214_v11  ;;  %v4377_v11 = vld [vmem:[#allocation2 + $0x64] ss:$16 sps:$4 sm:$0xff]   ;;  %v4383_v12 = vld [vmem:[#allocation2 + $0x60] ss:$16 sps:$4 sm:$0xff]   ;;  %6029 = vst [vmem:[#allocation16_spill] sm:$0xff] %v4395_v3 }
 0x251   :  { %v1218_v32 = vmul.f32 %v1215_v60, %v4202_v62  ;;  %v1216_v9 = vadd.f32 0.5, %v1213_v61  ;;  %v4348_v62 = vld [vmem:[#allocation2 + $0x8] ss:$16 sps:$4 sm:$0xff]  }
 0x252   :  { %v4386_v60 = vld [vmem:[#allocation2 + $0x68] ss:$16 sps:$4 sm:$0xff]  }
 0x253   :  { %v4338_v5 = vadd.f32 %v1219_v58, %v1218_v32  ;;  %v4389_v58 = vld [vmem:[#allocation2 + $0x84] ss:$16 sps:$4 sm:$0xff]   ;;  %v4392_v32 = vld [vmem:[#allocation2 + $0x8c] ss:$16 sps:$4 sm:$0xff]   ;;  %v4398_v61 = vld [vmem:[#allocation2 + $0x88] ss:$16 sps:$4 sm:$0xff]  }
 0x254   :  { %6028 = vst [vmem:[#allocation15_spill] sm:$0xff] %v4392_v32  ;;  %6030 = vst [vmem:[#allocation17_spill] sm:$0xff] %v4398_v61 }
 0x255   :  { %3298 = vtanh.f32 %v4338_v5 }
 0x25f   :  { %v3299_v0 = vpop.eup %3298 }
 0x260   :  { %v1222_v2 = vmul.f32 %v3299_v0, %v1216_v9  ;;  %v4401_v9 = vld [vmem:[#allocation2 + $0xa4] ss:$16 sps:$4 sm:$0xff]   ;;  %v4404_v0 = vld [vmem:[#allocation2 + $0xac] ss:$16 sps:$4 sm:$0xff]  }
 0x261   :  { %6031 = vst [vmem:[#allocation18_spill] sm:$0xff] %v4401_v9  ;;  %6032 = vst [vmem:[#allocation19_spill] sm:$0xff] %v4404_v0 }
 0x262   :  { %v4341_v4 = vpack.c.bf16 %v1222_v2, %v1222_v2  ;;  %v4407_v2 = vld [vmem:[#allocation2 + $0xa0] ss:$16 sps:$4 sm:$0xff]  }
 0x263   :  { %6033 = vst [vmem:[#allocation20_spill] sm:$0xff] %v4407_v2 }
 0x264   :  { %1257 = vmatmul.mubr.bf16.vlgmr.msra.gmra.mrb[28].mxu0 %v4341_v4  ;;  %1298 = vmatmul.mubr.bf16.vlgmr.msra.gmra.mrb[28].mxu1 %v4341_v4 }
 0x265   :  { %1326 = vmatpush1.bf16.msra.mxu0 %v4345_v6  ;;  %1367 = vmatpush1.bf16.msra.mxu1 %v4348_v62 }
 0x266   :  { %1327 = vmatprep.subr.bf16.mxu0 %v4351_v14  ;;  %1368 = vmatprep.subr.bf16.mxu1 %v4354_v63 }
 0x267   :  { %1357 = vmatprep.mubr.bf16.mxu0 %v5956_v1  ;;  %1398 = vmatprep.mubr.bf16.mxu1 %v5956_v1 }
 0x269   :  { %1328 = vmatpush1.bf16.msra.mxu0 %v4359_v39  ;;  %1369 = vmatpush1.bf16.msra.mxu1 %v4362_v59 }
 0x26a   :  { %1329 = vmatprep.subr.bf16.mxu0 %v4365_v10  ;;  %1370 = vmatprep.subr.bf16.mxu1 %v4368_v57 }
 0x26d   :  { %1330 = vmatpush1.bf16.msra.mxu0 %v4371_v23  ;;  %1371 = vmatpush1.bf16.msra.mxu1 %v4374_v13 }
 0x26e   :  { %1331 = vmatprep.subr.bf16.mxu0 %v4377_v11  ;;  %1372 = vmatprep.subr.bf16.mxu1 %v4380_v7 }
 0x271   :  { %1332 = vmatpush1.bf16.msra.mxu0 %v4383_v12  ;;  %1373 = vmatpush1.bf16.msra.mxu1 %v4386_v60 }
 0x272   :  { %1333 = vmatprep.subr.bf16.mxu0 %v4389_v58  ;;  %1374 = vmatprep.subr.bf16.mxu1 %v4392_v32  ;;  %v4410_v32 = vld [vmem:[#allocation2 + $0xa8] ss:$16 sps:$4 sm:$0xff]  }
 0x273   :  { %6034 = vst [vmem:[#allocation21_spill] sm:$0xff] %v4410_v32 }
 0x275   :  { %1334 = vmatpush1.bf16.msra.mxu0 %v4395_v3  ;;  %1375 = vmatpush1.bf16.msra.mxu1 %v4398_v61  ;;  %v4413_v3 = vld [vmem:[#allocation2 + $0xc4] ss:$16 sps:$4 sm:$0xff]   ;;  %v4416_v61 = vld [vmem:[#allocation2 + $0xcc] ss:$16 sps:$4 sm:$0xff]  }
 0x276   :  { %1335 = vmatprep.subr.bf16.mxu0 %v4401_v9  ;;  %1376 = vmatprep.subr.bf16.mxu1 %v4404_v0  ;;  %6035 = vst [vmem:[#allocation22_spill] sm:$0xff] %v4413_v3  ;;  %6036 = vst [vmem:[#allocation23_spill] sm:$0xff] %v4416_v61  ;;  %v4419_v9 = vld [vmem:[#allocation2 + $0xc0] ss:$16 sps:$4 sm:$0xff]   ;;  %v4422_v0 = vld [vmem:[#allocation2 + $0xc8] ss:$16 sps:$4 sm:$0xff]  }
 0x279   :  { %1336 = vmatpush1.bf16.msra.mxu0 %v4407_v2  ;;  %1377 = vmatpush1.bf16.msra.mxu1 %v4410_v32  ;;  %v4425_v2 = vld [vmem:[#allocation2 + $0xe4] ss:$16 sps:$4 sm:$0xff]   ;;  %v4428_v32 = vld [vmem:[#allocation2 + $0xec] ss:$16 sps:$4 sm:$0xff]  }
 0x27a   :  { %1337 = vmatprep.subr.bf16.mxu0 %v4413_v3  ;;  %1378 = vmatprep.subr.bf16.mxu1 %v4416_v61  ;;  %v4431_v3 = vld [vmem:[#allocation2 + $0xe0] ss:$16 sps:$4 sm:$0xff]   ;;  %v4434_v61 = vld [vmem:[#allocation2 + $0xe8] ss:$16 sps:$4 sm:$0xff]  }
 0x27d   :  { %1338 = vmatpush1.bf16.msra.mxu0 %v4419_v9  ;;  %1379 = vmatpush1.bf16.msra.mxu1 %v4422_v0 }
 0x27e   :  { %1339 = vmatprep.subr.bf16.mxu0 %v4425_v2  ;;  %1380 = vmatprep.subr.bf16.mxu1 %v4428_v32 }
 0x281   :  { %1340 = vmatpush1.bf16.msra.mxu0 %v4431_v3  ;;  %1381 = vmatpush1.bf16.msra.mxu1 %v4434_v61 }
 0x282   :  { %1430 = vmatprep.subr.bf16.mxu0 %v3909_v48  ;;  %1471 = vmatprep.subr.bf16.mxu1 %v3911_v49  ;;  %v6037_v48 = vld [vmem:[#allocation39_spill] sm:$0xff]  ;;  %v6038_v49 = vld [vmem:[#allocation40_spill] sm:$0xff] }
 0x284   :  { %1358 = vmatmul.mubr.bf16.vlgmr.msra.gmra.mrb[32].mxu0 %v4341_v4  ;;  %1399 = vmatmul.mubr.bf16.vlgmr.msra.gmra.mrb[32].mxu1 %v4341_v4  ;;  %v6065_v4 = vld [vmem:[#allocation12_spill] sm:$0xff] }
 0x285   :  { %1431 = vmatpush1.bf16.msra.mxu0 %v3915_v50  ;;  %1472 = vmatpush1.bf16.msra.mxu1 %v3917_v51  ;;  %v6039_v50 = vld [vmem:[#allocation41_spill] sm:$0xff]  ;;  %v6040_v51 = vld [vmem:[#allocation42_spill] sm:$0xff] }
 0x286   :  { %1432 = vmatprep.subr.bf16.mxu0 %v3921_v52  ;;  %1473 = vmatprep.subr.bf16.mxu1 %v3923_v53  ;;  %v6041_v52 = vld [vmem:[#allocation43_spill] sm:$0xff]  ;;  %v6042_v53 = vld [vmem:[#allocation44_spill] sm:$0xff] }
 0x289   :  { %1433 = vmatpush1.bf16.msra.mxu0 %v3925_v54  ;;  %1474 = vmatpush1.bf16.msra.mxu1 %v3927_v55  ;;  %v6043_v54 = vld [vmem:[#allocation45_spill] sm:$0xff]  ;;  %v6044_v55 = vld [vmem:[#allocation46_spill] sm:$0xff] }
 0x28a   :  { %1434 = vmatprep.subr.bf16.mxu0 %v3933_v56  ;;  %1475 = vmatprep.subr.bf16.mxu1 %v5957_v15  ;;  %v6045_v56 = vld [vmem:[#allocation47_spill] sm:$0xff]  ;;  %v6046_v15 = vld [vmem:[#allocation48_spill] sm:$0xff] }
 0x28d   :  { %1435 = vmatpush1.bf16.msra.mxu0 %v5958_v16  ;;  %1476 = vmatpush1.bf16.msra.mxu1 %v5959_v17  ;;  %v6047_v16 = vld [vmem:[#allocation49_spill] sm:$0xff]  ;;  %v6048_v17 = vld [vmem:[#allocation50_spill] sm:$0xff] }
 0x28e   :  { %1436 = vmatprep.subr.bf16.mxu0 %v5960_v18  ;;  %1477 = vmatprep.subr.bf16.mxu1 %v5961_v19  ;;  %v6049_v18 = vld [vmem:[#allocation51_spill] sm:$0xff]  ;;  %v6050_v19 = vld [vmem:[#allocation52_spill] sm:$0xff] }
 0x291   :  { %1437 = vmatpush1.bf16.msra.mxu0 %v5962_v20  ;;  %1478 = vmatpush1.bf16.msra.mxu1 %v5963_v21  ;;  %v6051_v20 = vld [vmem:[#allocation53_spill] sm:$0xff]  ;;  %v6052_v21 = vld [vmem:[#allocation54_spill] sm:$0xff] }
 0x292   :  { %1438 = vmatprep.subr.bf16.mxu0 %v5964_v22  ;;  %1479 = vmatprep.subr.bf16.mxu1 %v5965_v24  ;;  %v6053_v22 = vld [vmem:[#allocation55_spill] sm:$0xff]  ;;  %v6054_v24 = vld [vmem:[#allocation56_spill] sm:$0xff] }
 0x295   :  { %1439 = vmatpush1.bf16.msra.mxu0 %v5966_v25  ;;  %1480 = vmatpush1.bf16.msra.mxu1 %v5967_v26  ;;  %v6055_v25 = vld [vmem:[#allocation57_spill] sm:$0xff]  ;;  %v6056_v26 = vld [vmem:[#allocation58_spill] sm:$0xff] }
 0x296   :  { %1440 = vmatprep.subr.bf16.mxu0 %v5968_v27  ;;  %1481 = vmatprep.subr.bf16.mxu1 %v5969_v28  ;;  %v6057_v27 = vld [vmem:[#allocation59_spill] sm:$0xff]  ;;  %v6058_v28 = vld [vmem:[#allocation60_spill] sm:$0xff] }
 0x299   :  { %1441 = vmatpush1.bf16.msra.mxu0 %v5970_v29  ;;  %1482 = vmatpush1.bf16.msra.mxu1 %v5971_v30  ;;  %v6059_v29 = vld [vmem:[#allocation61_spill] sm:$0xff]  ;;  %v6060_v30 = vld [vmem:[#allocation62_spill] sm:$0xff] }
 0x29a   :  { %1442 = vmatprep.subr.bf16.mxu0 %v5972_v31  ;;  %1483 = vmatprep.subr.bf16.mxu1 %v5973_v33  ;;  %v6061_v31 = vld [vmem:[#allocation8_spill] sm:$0xff]  ;;  %v6062_v33 = vld [vmem:[#allocation9_spill] sm:$0xff] }
 0x29d   :  { %1443 = vmatpush1.bf16.msra.mxu0 %v5974_v34  ;;  %1484 = vmatpush1.bf16.msra.mxu1 %v5975_v35 }
 0x29e   :  { %1444 = vmatprep.subr.bf16.mxu0 %v5976_v36  ;;  %1485 = vmatprep.subr.bf16.mxu1 %v5977_v37  ;;  %v6063_v36 = vld [vmem:[#allocation10_spill] sm:$0xff] }
 0x2a1   :  { %1445 = vmatpush1.bf16.msra.mxu0 %v5978_v38  ;;  %1486 = vmatpush1.bf16.msra.mxu1 %v5979_v40 }
 0x2a2   :  { %1446 = vmatprep.subr.bf16.mxu0 %v5980_v41  ;;  %1487 = vmatprep.subr.bf16.mxu1 %v5981_v42  ;;  %v6064_v41 = vld [vmem:[#allocation11_spill] sm:$0xff] }
 0x2a5   :  { %1447 = vmatpush1.bf16.msra.mxu0 %v5982_v43  ;;  %1488 = vmatpush1.bf16.msra.mxu1 %v5983_v44 }
 0x2a6   :  { %1448 = vmatprep.subr.bf16.mxu0 %v5984_v45  ;;  %1489 = vmatprep.subr.bf16.mxu1 %v5985_v46 }
 0x2a9   :  { %1449 = vmatpush1.bf16.msra.mxu0 %v5986_v47  ;;  %1490 = vmatpush1.bf16.msra.mxu1 %v5987_v8 }
 0x2aa   :  { %1450 = vmatprep.subr.bf16.mxu0 %v6037_v48  ;;  %1491 = vmatprep.subr.bf16.mxu1 %v6038_v49  ;;  %v6066_v49 = vld [vmem:[#allocation13_spill] sm:$0xff] }
 0x2ad   :  { %1451 = vmatpush1.bf16.msra.mxu0 %v6039_v50  ;;  %1492 = vmatpush1.bf16.msra.mxu1 %v6040_v51 }
 0x2ae   :  { %1452 = vmatprep.subr.bf16.mxu0 %v6041_v52  ;;  %1493 = vmatprep.subr.bf16.mxu1 %v6042_v53 }
 0x2b1   :  { %1453 = vmatpush1.bf16.msra.mxu0 %v6043_v54  ;;  %1494 = vmatpush1.bf16.msra.mxu1 %v6044_v55 }
 0x2b2   :  { %1454 = vmatprep.subr.bf16.mxu0 %v6045_v56  ;;  %1495 = vmatprep.subr.bf16.mxu1 %v6046_v15 }
 0x2b5   :  { %1455 = vmatpush1.bf16.msra.mxu0 %v6047_v16  ;;  %1496 = vmatpush1.bf16.msra.mxu1 %v6048_v17 }
 0x2b6   :  { %1456 = vmatprep.subr.bf16.mxu0 %v6049_v18  ;;  %1497 = vmatprep.subr.bf16.mxu1 %v6050_v19  ;;  %v6067_v18 = vld [vmem:[#allocation14_spill] sm:$0xff] }
 0x2b9   :  { %1457 = vmatpush1.bf16.msra.mxu0 %v6051_v20  ;;  %1498 = vmatpush1.bf16.msra.mxu1 %v6052_v21 }
 0x2ba   :  { %1458 = vmatprep.subr.bf16.mxu0 %v6053_v22  ;;  %1499 = vmatprep.subr.bf16.mxu1 %v6054_v24 }
 0x2bd   :  { %1459 = vmatpush1.bf16.msra.mxu0 %v6055_v25  ;;  %1500 = vmatpush1.bf16.msra.mxu1 %v6056_v26  ;;  %v6068_v26 = vld [vmem:[#allocation68_spill] sm:$0xff] }
 0x2be   :  { %1460 = vmatprep.subr.bf16.mxu0 %v6057_v27  ;;  %1501 = vmatprep.subr.bf16.mxu1 %v6058_v28  ;;  %v6069_v28 = vld [vmem:[#allocation69_spill] sm:$0xff] }
 0x2c1   :  { %1461 = vmatpush1.bf16.msra.mxu0 %v6059_v29  ;;  %1502 = vmatpush1.bf16.msra.mxu1 %v6060_v30 }
 0x2c2   :  { %1531 = vmatprep.subr.bf16.mxu0 %v6061_v31  ;;  %1572 = vmatprep.subr.bf16.mxu1 %v6062_v33 }
 0x337   :  { %v1258_v34 = vpop.f32.mrb[28].mxu0  ;;  %v1299_v35 = vpop.f32.mrb[28].mxu1 }
 0x338   :  { %v1259_v37 = vadd.f32 %v1258_v34, %v6063_v36  ;;  %v1260_v38 = vpop.f32.mrb[29].mxu0  ;;  %v1301_v40 = vpop.f32.mrb[29].mxu1  ;;  %v1300_v50 = vadd.f32 %v1299_v35, %v6066_v49  ;;  %v6070_v35 = vld [vmem:[#allocation70_spill] sm:$0xff] }
 0x339   :  { %v1261_v42 = vadd.f32 %v1260_v38, %v6064_v41  ;;  %v1262_v43 = vpop.f32.mrb[30].mxu0  ;;  %v1303_v44 = vpop.f32.mrb[30].mxu1  ;;  %v1302_v48 = vadd.f32 %v1301_v40, %v6065_v4  ;;  %v6071_v38 = vld [vmem:[#allocation71_spill] sm:$0xff] }
 0x33a   :  { %v1306_v45 = vmul.f32 0.5, %v1259_v37  ;;  %v1263_v46 = vpop.f32.mrb[31].mxu0  ;;  %v1304_v47 = vpop.f32.mrb[31].mxu1  ;;  %v1308_v51 = vmul.f32 0.5, %v1300_v50 }
 0x33b   :  { %v1307_v8 = vmul.f32 0.5, %v1261_v42 }
 0x33c   :  { %3300 = vtanh.f32 %v1306_v45 }
 0x33d   :  { %3302 = vtanh.f32 %v1307_v8 }
 0x33e   :  { %3304 = vtanh.f32 %v1302_v48 }
 0x33f   :  { %3306 = vtanh.f32 %v1308_v51 }
 0x346   :  { %v3301_v52 = vpop.eup %3300 }
 0x347   :  { %v1312_v53 = vmul.f32 0.5, %v3301_v52  ;;  %v3303_v54 = vpop.eup %3302 }
 0x348   :  { %v1313_v56 = vmul.f32 0.5, %v3303_v54  ;;  %v3305_v15 = vpop.eup %3304 }
 0x349   :  { %v1315_v55 = vadd.f32 0.5, %v1312_v53  ;;  %v3307_v21 = vpop.eup %3306 }
 0x34a   :  { %v1316_v16 = vadd.f32 0.5, %v1313_v56  ;;  %v1314_v22 = vmul.f32 0.5, %v3307_v21 }
 0x34b   :  { %v1320_v17 = vmul.f32 %v3305_v15, %v1315_v55 }
 0x34c   :  { %v1319_v19 = vmul.f32 %v1316_v16, %v6067_v18  ;;  %v1317_v44 = vadd.f32 0.5, %v1314_v22 }
 0x34e   :  { %v4510_v20 = vadd.f32 %v1320_v17, %v1319_v19 }
 0x350   :  { %3308 = vtanh.f32 %v4510_v20 }
 0x357   :  { %v1359_v24 = vpop.f32.mrb[32].mxu0  ;;  %v1400_v25 = vpop.f32.mrb[32].mxu1 }
 0x358   :  { %v1407_v27 = vadd.f32 %v1359_v24, %v6068_v26  ;;  %v1409_v29 = vadd.f32 %v1400_v25, %v6069_v28  ;;  %v1361_v30 = vpop.f32.mrb[33].mxu0  ;;  %v1402_v34 = vpop.f32.mrb[33].mxu1 }
 0x359   :  { %v1408_v37 = vadd.f32 %v1361_v30, %v6070_v35  ;;  %v1410_v40 = vadd.f32 %v1402_v34, %v6071_v38  ;;  %v1363_v42 = vpop.f32.mrb[34].mxu0  ;;  %v1404_v43 = vpop.f32.mrb[34].mxu1  ;;  %v6074_v30 = vld [vmem:[#allocation17_spill] sm:$0xff]  ;;  %v6075_v34 = vld [vmem:[#allocation18_spill] sm:$0xff]  ;;  %v6076_v35 = vld [vmem:[#allocation19_spill] sm:$0xff] }
 0x35a   :  { %v1411_v45 = vmul.f32 0.5, %v1407_v27  ;;  %v1364_v46 = vpop.f32.mrb[35].mxu0  ;;  %v1405_v47 = vpop.f32.mrb[35].mxu1  ;;  %v1413_v52 = vmul.f32 0.5, %v1409_v29  ;;  %v6073_v29 = vld [vmem:[#allocation16_spill] sm:$0xff]  ;;  %v6078_v38 = vld [vmem:[#allocation21_spill] sm:$0xff] }
 0x35b   :  { %v3309_v8 = vpop.eup %3308  ;;  %v1412_v48 = vmul.f32 0.5, %v1408_v37  ;;  %v6077_v37 = vld [vmem:[#allocation20_spill] sm:$0xff]  ;;  %v6080_v42 = vld [vmem:[#allocation23_spill] sm:$0xff] }
 0x35c   :  { %3310 = vtanh.f32 %v1411_v45  ;;  %v1323_v50 = vmul.f32 %v3309_v8, %v1317_v44  ;;  %v4553_v43 = vld [vmem:[#allocation4 + $0x4] ss:$16 sps:$4 sm:$0xff]   ;;  %v4556_v44 = vld [vmem:[#allocation4 + $0xc] ss:$16 sps:$4 sm:$0xff]   ;;  %v4559_v45 = vld [vmem:[#allocation4] ss:$16 sps:$4 sm:$0xff]  }
 0x35d   :  { %3312 = vtanh.f32 %v1412_v48  ;;  %v4562_v46 = vld [vmem:[#allocation4 + $0x8] ss:$16 sps:$4 sm:$0xff]   ;;  %v4565_v47 = vld [vmem:[#allocation4 + $0x24] ss:$16 sps:$4 sm:$0xff]   ;;  %v4568_v8 = vld [vmem:[#allocation4 + $0x2c] ss:$16 sps:$4 sm:$0xff]  }
 0x35e   :  { %v1324_v51 = vpack.c.bf16 %v1323_v50, %v1323_v50  ;;  %3314 = vtanh.f32 %v1410_v40  ;;  %v6079_v40 = vld [vmem:[#allocation22_spill] sm:$0xff]  ;;  %v4574_v50 = vld [vmem:[#allocation4 + $0x28] ss:$16 sps:$4 sm:$0xff]  }
 0x35f   :  { %3316 = vtanh.f32 %v1413_v52  ;;  %v4571_v48 = vld [vmem:[#allocation4 + $0x20] ss:$16 sps:$4 sm:$0xff]   ;;  %v4580_v52 = vld [vmem:[#allocation4 + $0x4c] ss:$16 sps:$4 sm:$0xff]  }
 0x360   :  { %1462 = vmatprep.mubr.bf16.mxu0 %v1324_v51  ;;  %1503 = vmatprep.mubr.bf16.mxu1 %v1324_v51  ;;  %v4577_v51 = vld [vmem:[#allocation4 + $0x44] ss:$16 sps:$4 sm:$0xff]  }
 0x366   :  { %v3311_v53 = vpop.eup %3310 }
 0x367   :  { %v1417_v54 = vmul.f32 0.5, %v3311_v53  ;;  %v3313_v55 = vpop.eup %3312  ;;  %v4583_v53 = vld [vmem:[#allocation4 + $0x40] ss:$16 sps:$4 sm:$0xff]  }
 0x368   :  { %v1418_v15 = vmul.f32 0.5, %v3313_v55  ;;  %v3315_v16 = vpop.eup %3314  ;;  %6081 = vst [vmem:[#allocation24_spill] sm:$0xff] %v4583_v53  ;;  %v4589_v55 = vld [vmem:[#allocation4 + $0x64] ss:$16 sps:$4 sm:$0xff]  }
 0x369   :  { %v1420_v56 = vadd.f32 0.5, %v1417_v54  ;;  %v3317_v22 = vpop.eup %3316  ;;  %v4586_v54 = vld [vmem:[#allocation4 + $0x48] ss:$16 sps:$4 sm:$0xff]   ;;  %6083 = vst [vmem:[#allocation26_spill] sm:$0xff] %v4589_v55 }
 0x36a   :  { %v1421_v17 = vadd.f32 0.5, %v1418_v15  ;;  %v1419_v24 = vmul.f32 0.5, %v3317_v22  ;;  %6082 = vst [vmem:[#allocation25_spill] sm:$0xff] %v4586_v54  ;;  %v4595_v15 = vld [vmem:[#allocation4 + $0x60] ss:$16 sps:$4 sm:$0xff]  }
 0x36b   :  { %v1425_v18 = vmul.f32 %v3315_v16, %v1420_v56  ;;  %v4592_v56 = vld [vmem:[#allocation4 + $0x6c] ss:$16 sps:$4 sm:$0xff]   ;;  %6085 = vst [vmem:[#allocation28_spill] sm:$0xff] %v4595_v15  ;;  %v4598_v16 = vld [vmem:[#allocation4 + $0x68] ss:$16 sps:$4 sm:$0xff]  }
 0x36c   :  { %v1424_v19 = vmul.f32 %v1421_v17, %v4338_v5  ;;  %v1422_v25 = vadd.f32 0.5, %v1419_v24  ;;  %v6072_v5 = vld [vmem:[#allocation15_spill] sm:$0xff]  ;;  %6084 = vst [vmem:[#allocation27_spill] sm:$0xff] %v4592_v56  ;;  %6086 = vst [vmem:[#allocation29_spill] sm:$0xff] %v4598_v16  ;;  %v4601_v17 = vld [vmem:[#allocation4 + $0x84] ss:$16 sps:$4 sm:$0xff]  }
 0x36d   :  { %6087 = vst [vmem:[#allocation30_spill] sm:$0xff] %v4601_v17  ;;  %v4610_v22 = vld [vmem:[#allocation4 + $0x88] ss:$16 sps:$4 sm:$0xff]   ;;  %v4613_v24 = vld [vmem:[#allocation4 + $0xa4] ss:$16 sps:$4 sm:$0xff]  }
 0x36e   :  { %v4518_v21 = vadd.f32 %v1425_v18, %v1424_v19  ;;  %v4604_v18 = vld [vmem:[#allocation4 + $0x8c] ss:$16 sps:$4 sm:$0xff]   ;;  %v4607_v19 = vld [vmem:[#allocation4 + $0x80] ss:$16 sps:$4 sm:$0xff]   ;;  %6090 = vst [vmem:[#allocation33_spill] sm:$0xff] %v4610_v22  ;;  %6091 = vst [vmem:[#allocation34_spill] sm:$0xff] %v4613_v24 }
 0x36f   :  { %6088 = vst [vmem:[#allocation31_spill] sm:$0xff] %v4604_v18  ;;  %6089 = vst [vmem:[#allocation32_spill] sm:$0xff] %v4607_v19 }
 0x370   :  { %3318 = vtanh.f32 %v4518_v21 }
 0x37a   :  { %v3319_v26 = vpop.eup %3318 }
 0x37b   :  { %v1428_v27 = vmul.f32 %v3319_v26, %v1422_v25  ;;  %v4616_v25 = vld [vmem:[#allocation4 + $0xac] ss:$16 sps:$4 sm:$0xff]   ;;  %v4619_v26 = vld [vmem:[#allocation4 + $0xa0] ss:$16 sps:$4 sm:$0xff]  }
 0x37c   :  { %6092 = vst [vmem:[#allocation35_spill] sm:$0xff] %v4616_v25  ;;  %6093 = vst [vmem:[#allocation36_spill] sm:$0xff] %v4619_v26 }
 0x37d   :  { %v1429_v28 = vpack.c.bf16 %v1428_v27, %v1428_v27  ;;  %v4622_v27 = vld [vmem:[#allocation4 + $0xa8] ss:$16 sps:$4 sm:$0xff]  }
 0x37e   :  { %6094 = vst [vmem:[#allocation37_spill] sm:$0xff] %v4622_v27 }
 0x37f   :  { %1463 = vmatmul.mubr.bf16.vlgmr.msra.gmra.mrb[36].mxu0 %v1429_v28  ;;  %1504 = vmatmul.mubr.bf16.vlgmr.msra.gmra.mrb[36].mxu1 %v1429_v28 }
 0x380   :  { %1532 = vmatpush1.bf16.msra.mxu0 %v4345_v6  ;;  %1573 = vmatpush1.bf16.msra.mxu1 %v4348_v62 }
 0x381   :  { %1533 = vmatprep.subr.bf16.mxu0 %v4351_v14  ;;  %1574 = vmatprep.subr.bf16.mxu1 %v4354_v63 }
 0x382   :  { %1563 = vmatprep.mubr.bf16.mxu0 %v5956_v1  ;;  %1604 = vmatprep.mubr.bf16.mxu1 %v5956_v1 }
 0x384   :  { %1534 = vmatpush1.bf16.msra.mxu0 %v4359_v39  ;;  %1575 = vmatpush1.bf16.msra.mxu1 %v4362_v59 }
 0x385   :  { %1535 = vmatprep.subr.bf16.mxu0 %v4365_v10  ;;  %1576 = vmatprep.subr.bf16.mxu1 %v4368_v57 }
 0x388   :  { %1536 = vmatpush1.bf16.msra.mxu0 %v4371_v23  ;;  %1577 = vmatpush1.bf16.msra.mxu1 %v4374_v13 }
 0x389   :  { %1537 = vmatprep.subr.bf16.mxu0 %v4377_v11  ;;  %1578 = vmatprep.subr.bf16.mxu1 %v4380_v7 }
 0x38c   :  { %1538 = vmatpush1.bf16.msra.mxu0 %v4383_v12  ;;  %1579 = vmatpush1.bf16.msra.mxu1 %v4386_v60 }
 0x38d   :  { %1539 = vmatprep.subr.bf16.mxu0 %v4389_v58  ;;  %1580 = vmatprep.subr.bf16.mxu1 %v6072_v5 }
 0x390   :  { %1540 = vmatpush1.bf16.msra.mxu0 %v6073_v29  ;;  %1581 = vmatpush1.bf16.msra.mxu1 %v6074_v30 }
 0x391   :  { %1541 = vmatprep.subr.bf16.mxu0 %v6075_v34  ;;  %1582 = vmatprep.subr.bf16.mxu1 %v6076_v35 }
 0x394   :  { %1542 = vmatpush1.bf16.msra.mxu0 %v6077_v37  ;;  %1583 = vmatpush1.bf16.msra.mxu1 %v6078_v38 }
 0x395   :  { %1543 = vmatprep.subr.bf16.mxu0 %v6079_v40  ;;  %1584 = vmatprep.subr.bf16.mxu1 %v6080_v42 }
 0x398   :  { %1544 = vmatpush1.bf16.msra.mxu0 %v4419_v9  ;;  %1585 = vmatpush1.bf16.msra.mxu1 %v4422_v0 }
 0x399   :  { %1545 = vmatprep.subr.bf16.mxu0 %v4425_v2  ;;  %1586 = vmatprep.subr.bf16.mxu1 %v4428_v32 }
 0x39c   :  { %1546 = vmatpush1.bf16.msra.mxu0 %v4431_v3  ;;  %1587 = vmatpush1.bf16.msra.mxu1 %v4434_v61 }
 0x39d   :  { %1636 = vmatprep.subr.bf16.mxu0 %v4553_v43  ;;  %1677 = vmatprep.subr.bf16.mxu1 %v4556_v44 }
 0x39f   :  { %1564 = vmatmul.mubr.bf16.vlgmr.msra.gmra.mrb[40].mxu0 %v1429_v28  ;;  %1605 = vmatmul.mubr.bf16.vlgmr.msra.gmra.mrb[40].mxu1 %v1429_v28  ;;  %v4625_v28 = vld [vmem:[#allocation4 + $0xc4] ss:$16 sps:$4 sm:$0xff]  }
 0x3a0   :  { %1637 = vmatpush1.bf16.msra.mxu0 %v4559_v45  ;;  %1678 = vmatpush1.bf16.msra.mxu1 %v4562_v46  ;;  %6095 = vst [vmem:[#allocation38_spill] sm:$0xff] %v4625_v28 }
 0x3a1   :  { %1638 = vmatprep.subr.bf16.mxu0 %v4565_v47  ;;  %1679 = vmatprep.subr.bf16.mxu1 %v4568_v8 }
 0x3a4   :  { %1639 = vmatpush1.bf16.msra.mxu0 %v4571_v48  ;;  %1680 = vmatpush1.bf16.msra.mxu1 %v4574_v50 }
 0x3a5   :  { %1640 = vmatprep.subr.bf16.mxu0 %v4577_v51  ;;  %1681 = vmatprep.subr.bf16.mxu1 %v4580_v52 }
 0x3a8   :  { %1641 = vmatpush1.bf16.msra.mxu0 %v4583_v53  ;;  %1682 = vmatpush1.bf16.msra.mxu1 %v4586_v54 }
 0x3a9   :  { %1642 = vmatprep.subr.bf16.mxu0 %v4589_v55  ;;  %1683 = vmatprep.subr.bf16.mxu1 %v4592_v56 }
 0x3ac   :  { %1643 = vmatpush1.bf16.msra.mxu0 %v4595_v15  ;;  %1684 = vmatpush1.bf16.msra.mxu1 %v4598_v16 }
 0x3ad   :  { %1644 = vmatprep.subr.bf16.mxu0 %v4601_v17  ;;  %1685 = vmatprep.subr.bf16.mxu1 %v4604_v18 }
 0x3b0   :  { %1645 = vmatpush1.bf16.msra.mxu0 %v4607_v19  ;;  %1686 = vmatpush1.bf16.msra.mxu1 %v4610_v22  ;;  %v4628_v22 = vld [vmem:[#allocation4 + $0xcc] ss:$16 sps:$4 sm:$0xff]  }
 0x3b1   :  { %1646 = vmatprep.subr.bf16.mxu0 %v4613_v24  ;;  %1687 = vmatprep.subr.bf16.mxu1 %v4616_v25  ;;  %6096 = vst [vmem:[#allocation63_spill] sm:$0xff] %v4628_v22  ;;  %v4631_v24 = vld [vmem:[#allocation4 + $0xc0] ss:$16 sps:$4 sm:$0xff]   ;;  %v4634_v25 = vld [vmem:[#allocation4 + $0xc8] ss:$16 sps:$4 sm:$0xff]  }
 0x3b2   :  { %6097 = vst [vmem:[#allocation64_spill] sm:$0xff] %v4631_v24  ;;  %6098 = vst [vmem:[#allocation65_spill] sm:$0xff] %v4634_v25 }
 0x3b4   :  { %1647 = vmatpush1.bf16.msra.mxu0 %v4619_v26  ;;  %1688 = vmatpush1.bf16.msra.mxu1 %v4622_v27  ;;  %v4637_v26 = vld [vmem:[#allocation4 + $0xe4] ss:$16 sps:$4 sm:$0xff]   ;;  %v4640_v27 = vld [vmem:[#allocation4 + $0xec] ss:$16 sps:$4 sm:$0xff]  }
 0x3b5   :  { %1648 = vmatprep.subr.bf16.mxu0 %v4625_v28  ;;  %1689 = vmatprep.subr.bf16.mxu1 %v4628_v22  ;;  %6099 = vst [vmem:[#allocation66_spill] sm:$0xff] %v4637_v26  ;;  %6100 = vst [vmem:[#allocation67_spill] sm:$0xff] %v4640_v27  ;;  %v4643_v28 = vld [vmem:[#allocation4 + $0xe0] ss:$16 sps:$4 sm:$0xff]   ;;  %v4646_v22 = vld [vmem:[#allocation4 + $0xe8] ss:$16 sps:$4 sm:$0xff]  }
 0x3b6   :  { %6101 = vst [vmem:[#allocation39_spill] sm:$0xff] %v4643_v28  ;;  %6102 = vst [vmem:[#allocation40_spill] sm:$0xff] %v4646_v22 }
 0x3b8   :  { %1649 = vmatpush1.bf16.msra.mxu0 %v4631_v24  ;;  %1690 = vmatpush1.bf16.msra.mxu1 %v4634_v25  ;;  %v4649_v24 = vld [vmem:[#allocation4 + $0x104] ss:$16 sps:$4 sm:$0xff]   ;;  %v4652_v25 = vld [vmem:[#allocation4 + $0x10c] ss:$16 sps:$4 sm:$0xff]  }
 0x3b9   :  { %1650 = vmatprep.subr.bf16.mxu0 %v4637_v26  ;;  %1691 = vmatprep.subr.bf16.mxu1 %v4640_v27  ;;  %6103 = vst [vmem:[#allocation41_spill] sm:$0xff] %v4649_v24  ;;  %6104 = vst [vmem:[#allocation42_spill] sm:$0xff] %v4652_v25  ;;  %v4655_v26 = vld [vmem:[#allocation4 + $0x100] ss:$16 sps:$4 sm:$0xff]   ;;  %v4658_v27 = vld [vmem:[#allocation4 + $0x108] ss:$16 sps:$4 sm:$0xff]  }
 0x3ba   :  { %6105 = vst [vmem:[#allocation43_spill] sm:$0xff] %v4655_v26  ;;  %6106 = vst [vmem:[#allocation44_spill] sm:$0xff] %v4658_v27 }
 0x3bc   :  { %1651 = vmatpush1.bf16.msra.mxu0 %v4643_v28  ;;  %1692 = vmatpush1.bf16.msra.mxu1 %v4646_v22  ;;  %v4661_v28 = vld [vmem:[#allocation4 + $0x124] ss:$16 sps:$4 sm:$0xff]   ;;  %v4664_v22 = vld [vmem:[#allocation4 + $0x12c] ss:$16 sps:$4 sm:$0xff]  }
 0x3bd   :  { %1652 = vmatprep.subr.bf16.mxu0 %v4649_v24  ;;  %1693 = vmatprep.subr.bf16.mxu1 %v4652_v25  ;;  %6107 = vst [vmem:[#allocation45_spill] sm:$0xff] %v4661_v28  ;;  %6108 = vst [vmem:[#allocation46_spill] sm:$0xff] %v4664_v22  ;;  %v4667_v24 = vld [vmem:[#allocation4 + $0x120] ss:$16 sps:$4 sm:$0xff]   ;;  %v4670_v25 = vld [vmem:[#allocation4 + $0x128] ss:$16 sps:$4 sm:$0xff]  }
 0x3be   :  { %6109 = vst [vmem:[#allocation47_spill] sm:$0xff] %v4667_v24  ;;  %6110 = vst [vmem:[#allocation48_spill] sm:$0xff] %v4670_v25 }
 0x3c0   :  { %1653 = vmatpush1.bf16.msra.mxu0 %v4655_v26  ;;  %1694 = vmatpush1.bf16.msra.mxu1 %v4658_v27  ;;  %v4673_v26 = vld [vmem:[#allocation4 + $0x144] ss:$16 sps:$4 sm:$0xff]   ;;  %v4676_v27 = vld [vmem:[#allocation4 + $0x14c] ss:$16 sps:$4 sm:$0xff]  }
 0x3c1   :  { %1654 = vmatprep.subr.bf16.mxu0 %v4661_v28  ;;  %1695 = vmatprep.subr.bf16.mxu1 %v4664_v22  ;;  %6111 = vst [vmem:[#allocation49_spill] sm:$0xff] %v4673_v26  ;;  %6112 = vst [vmem:[#allocation50_spill] sm:$0xff] %v4676_v27  ;;  %v4679_v28 = vld [vmem:[#allocation4 + $0x140] ss:$16 sps:$4 sm:$0xff]   ;;  %v4682_v22 = vld [vmem:[#allocation4 + $0x148] ss:$16 sps:$4 sm:$0xff]  }
 0x3c2   :  { %6113 = vst [vmem:[#allocation51_spill] sm:$0xff] %v4679_v28  ;;  %6114 = vst [vmem:[#allocation52_spill] sm:$0xff] %v4682_v22 }
 0x3c4   :  { %1655 = vmatpush1.bf16.msra.mxu0 %v4667_v24  ;;  %1696 = vmatpush1.bf16.msra.mxu1 %v4670_v25  ;;  %v4685_v24 = vld [vmem:[#allocation4 + $0x164] ss:$16 sps:$4 sm:$0xff]   ;;  %v4688_v25 = vld [vmem:[#allocation4 + $0x16c] ss:$16 sps:$4 sm:$0xff]  }
 0x3c5   :  { %1656 = vmatprep.subr.bf16.mxu0 %v4673_v26  ;;  %1697 = vmatprep.subr.bf16.mxu1 %v4676_v27  ;;  %6115 = vst [vmem:[#allocation53_spill] sm:$0xff] %v4685_v24  ;;  %6116 = vst [vmem:[#allocation54_spill] sm:$0xff] %v4688_v25  ;;  %v4691_v26 = vld [vmem:[#allocation4 + $0x160] ss:$16 sps:$4 sm:$0xff]   ;;  %v4694_v27 = vld [vmem:[#allocation4 + $0x168] ss:$16 sps:$4 sm:$0xff]  }
 0x3c6   :  { %6117 = vst [vmem:[#allocation55_spill] sm:$0xff] %v4691_v26  ;;  %6118 = vst [vmem:[#allocation56_spill] sm:$0xff] %v4694_v27 }
 0x3c8   :  { %1657 = vmatpush1.bf16.msra.mxu0 %v4679_v28  ;;  %1698 = vmatpush1.bf16.msra.mxu1 %v4682_v22  ;;  %v4697_v28 = vld [vmem:[#allocation4 + $0x184] ss:$16 sps:$4 sm:$0xff]   ;;  %v4700_v22 = vld [vmem:[#allocation4 + $0x18c] ss:$16 sps:$4 sm:$0xff]  }
 0x3c9   :  { %1658 = vmatprep.subr.bf16.mxu0 %v4685_v24  ;;  %1699 = vmatprep.subr.bf16.mxu1 %v4688_v25  ;;  %6119 = vst [vmem:[#allocation57_spill] sm:$0xff] %v4697_v28  ;;  %6120 = vst [vmem:[#allocation58_spill] sm:$0xff] %v4700_v22  ;;  %v4703_v24 = vld [vmem:[#allocation4 + $0x180] ss:$16 sps:$4 sm:$0xff]   ;;  %v4706_v25 = vld [vmem:[#allocation4 + $0x188] ss:$16 sps:$4 sm:$0xff]  }
 0x3ca   :  { %6121 = vst [vmem:[#allocation59_spill] sm:$0xff] %v4703_v24  ;;  %6122 = vst [vmem:[#allocation60_spill] sm:$0xff] %v4706_v25 }
 0x3cc   :  { %1659 = vmatpush1.bf16.msra.mxu0 %v4691_v26  ;;  %1700 = vmatpush1.bf16.msra.mxu1 %v4694_v27  ;;  %v4709_v26 = vld [vmem:[#allocation4 + $0x1a4] ss:$16 sps:$4 sm:$0xff]   ;;  %v4712_v27 = vld [vmem:[#allocation4 + $0x1ac] ss:$16 sps:$4 sm:$0xff]  }
 0x3cd   :  { %1660 = vmatprep.subr.bf16.mxu0 %v4697_v28  ;;  %1701 = vmatprep.subr.bf16.mxu1 %v4700_v22  ;;  %6123 = vst [vmem:[#allocation61_spill] sm:$0xff] %v4709_v26  ;;  %6124 = vst [vmem:[#allocation62_spill] sm:$0xff] %v4712_v27  ;;  %v4715_v28 = vld [vmem:[#allocation4 + $0x1a0] ss:$16 sps:$4 sm:$0xff]   ;;  %v4718_v22 = vld [vmem:[#allocation4 + $0x1a8] ss:$16 sps:$4 sm:$0xff]  }
 0x3ce   :  { %6125 = vst [vmem:[#allocation8_spill] sm:$0xff] %v4715_v28  ;;  %6126 = vst [vmem:[#allocation9_spill] sm:$0xff] %v4718_v22 }
 0x3d0   :  { %1661 = vmatpush1.bf16.msra.mxu0 %v4703_v24  ;;  %1702 = vmatpush1.bf16.msra.mxu1 %v4706_v25  ;;  %v4721_v24 = vld [vmem:[#allocation4 + $0x1c4] ss:$16 sps:$4 sm:$0xff]   ;;  %v4724_v25 = vld [vmem:[#allocation4 + $0x1cc] ss:$16 sps:$4 sm:$0xff]  }
 0x3d1   :  { %1662 = vmatprep.subr.bf16.mxu0 %v4709_v26  ;;  %1703 = vmatprep.subr.bf16.mxu1 %v4712_v27  ;;  %6127 = vst [vmem:[#allocation14_spill] sm:$0xff] %v4721_v24  ;;  %6128 = vst [vmem:[#allocation68_spill] sm:$0xff] %v4724_v25  ;;  %v4727_v26 = vld [vmem:[#allocation4 + $0x1c0] ss:$16 sps:$4 sm:$0xff]   ;;  %v4730_v27 = vld [vmem:[#allocation4 + $0x1c8] ss:$16 sps:$4 sm:$0xff]  }
 0x3d2   :  { %6129 = vst [vmem:[#allocation69_spill] sm:$0xff] %v4727_v26  ;;  %6130 = vst [vmem:[#allocation70_spill] sm:$0xff] %v4730_v27 }
 0x3d4   :  { %1663 = vmatpush1.bf16.msra.mxu0 %v4715_v28  ;;  %1704 = vmatpush1.bf16.msra.mxu1 %v4718_v22  ;;  %v4733_v28 = vld [vmem:[#allocation4 + $0x1e4] ss:$16 sps:$4 sm:$0xff]   ;;  %v4736_v22 = vld [vmem:[#allocation4 + $0x1ec] ss:$16 sps:$4 sm:$0xff]  }
 0x3d5   :  { %1664 = vmatprep.subr.bf16.mxu0 %v4721_v24  ;;  %1705 = vmatprep.subr.bf16.mxu1 %v4724_v25  ;;  %6131 = vst [vmem:[#allocation71_spill] sm:$0xff] %v4733_v28  ;;  %6132 = vst [vmem:[#allocation15_spill] sm:$0xff] %v4736_v22  ;;  %v4739_v24 = vld [vmem:[#allocation4 + $0x1e0] ss:$16 sps:$4 sm:$0xff]   ;;  %v4742_v25 = vld [vmem:[#allocation4 + $0x1e8] ss:$16 sps:$4 sm:$0xff]  }
 0x3d6   :  { %6133 = vst [vmem:[#allocation16_spill] sm:$0xff] %v4739_v24  ;;  %6134 = vst [vmem:[#allocation17_spill] sm:$0xff] %v4742_v25 }
 0x3d8   :  { %1665 = vmatpush1.bf16.msra.mxu0 %v4727_v26  ;;  %1706 = vmatpush1.bf16.msra.mxu1 %v4730_v27 }
 0x3d9   :  { %1666 = vmatprep.subr.bf16.mxu0 %v4733_v28  ;;  %1707 = vmatprep.subr.bf16.mxu1 %v4736_v22 }
 0x3dc   :  { %1667 = vmatpush1.bf16.msra.mxu0 %v4739_v24  ;;  %1708 = vmatpush1.bf16.msra.mxu1 %v4742_v25 }
 0x3dd   :  { %1737 = vmatprep.subr.bf16.mxu0 %v6061_v31  ;;  %1778 = vmatprep.subr.bf16.mxu1 %v6062_v33 }
 0x452   :  { %v1464_v27 = vpop.f32.mrb[36].mxu0  ;;  %v1505_v26 = vpop.f32.mrb[36].mxu1 }
 0x453   :  { %v1465_v28 = vadd.f32 %v1464_v27, %v6063_v36  ;;  %v1466_v19 = vpop.f32.mrb[37].mxu0  ;;  %v1507_v18 = vpop.f32.mrb[37].mxu1  ;;  %v1506_v31 = vadd.f32 %v1505_v26, %v6066_v49 }
 0x454   :  { %v1467_v22 = vadd.f32 %v1466_v19, %v6064_v41  ;;  %v1468_v17 = vpop.f32.mrb[38].mxu0  ;;  %v1509_v16 = vpop.f32.mrb[38].mxu1  ;;  %v1508_v25 = vadd.f32 %v1507_v18, %v6065_v4 }
 0x455   :  { %v1512_v15 = vmul.f32 0.5, %v1465_v28  ;;  %v1469_v24 = vpop.f32.mrb[39].mxu0  ;;  %v1510_v56 = vpop.f32.mrb[39].mxu1  ;;  %v1514_v33 = vmul.f32 0.5, %v1506_v31 }
 0x456   :  { %v1513_v55 = vmul.f32 0.5, %v1467_v22 }
 0x457   :  { %3320 = vtanh.f32 %v1512_v15 }
 0x458   :  { %3322 = vtanh.f32 %v1513_v55 }
 0x459   :  { %3324 = vtanh.f32 %v1508_v25  ;;  %v6136_v25 = vld [vmem:[#allocation72_spill] sm:$0xff] }
 0x45a   :  { %3326 = vtanh.f32 %v1514_v33 }
 0x461   :  { %v3321_v54 = vpop.eup %3320 }
 0x462   :  { %v1518_v27 = vmul.f32 0.5, %v3321_v54  ;;  %v3323_v36 = vpop.eup %3322  ;;  %v6137_v54 = vld [vmem:[#allocation73_spill] sm:$0xff] }
 0x463   :  { %v1519_v19 = vmul.f32 0.5, %v3323_v36  ;;  %v3325_v17 = vpop.eup %3324  ;;  %v6138_v36 = vld [vmem:[#allocation74_spill] sm:$0xff] }
 0x464   :  { %v1521_v53 = vadd.f32 0.5, %v1518_v27  ;;  %v3327_v55 = vpop.eup %3326 }
 0x465   :  { %v1522_v16 = vadd.f32 0.5, %v1519_v19  ;;  %v1520_v15 = vmul.f32 0.5, %v3327_v55  ;;  %v6139_v19 = vld [vmem:[#allocation75_spill] sm:$0xff] }
 0x466   :  { %v1526_v28 = vmul.f32 %v3325_v17, %v1521_v53 }
 0x467   :  { %v1525_v56 = vmul.f32 %v1522_v16, %v4510_v20  ;;  %v1523_v16 = vadd.f32 0.5, %v1520_v15 }
 0x469   :  { %v4752_v22 = vadd.f32 %v1526_v28, %v1525_v56 }
 0x46b   :  { %6135 = vst [vmem:[#allocation18_spill] sm:$0xff] %v4752_v22  ;;  %3328 = vtanh.f32 %v4752_v22 }
 0x472   :  { %v1565_v18 = vpop.f32.mrb[40].mxu0  ;;  %v1606_v24 = vpop.f32.mrb[40].mxu1 }
 0x473   :  { %v1613_v26 = vadd.f32 %v1565_v18, %v6136_v25  ;;  %v1615_v31 = vadd.f32 %v1606_v24, %v6137_v54  ;;  %v1567_v27 = vpop.f32.mrb[41].mxu0  ;;  %v1608_v33 = vpop.f32.mrb[41].mxu1 }
 0x474   :  { %v1614_v49 = vadd.f32 %v1567_v27, %v6138_v36  ;;  %v1616_v53 = vadd.f32 %v1608_v33, %v6139_v19  ;;  %v1569_v17 = vpop.f32.mrb[42].mxu0  ;;  %v1610_v20 = vpop.f32.mrb[42].mxu1 }
 0x475   :  { %v1617_v28 = vmul.f32 0.5, %v1613_v26  ;;  %v1570_v56 = vpop.f32.mrb[43].mxu0  ;;  %v1611_v22 = vpop.f32.mrb[43].mxu1  ;;  %v1619_v24 = vmul.f32 0.5, %v1615_v31 }
 0x476   :  { %v3329_v4 = vpop.eup %3328  ;;  %v1618_v55 = vmul.f32 0.5, %v1614_v49  ;;  %v6173_v56 = vld [vmem:[#allocation52_spill] sm:$0xff] }
 0x477   :  { %3330 = vtanh.f32 %v1617_v28  ;;  %v1529_v41 = vmul.f32 %v3329_v4, %v1523_v16  ;;  %v6171_v16 = vld [vmem:[#allocation50_spill] sm:$0xff]  ;;  %v6172_v28 = vld [vmem:[#allocation51_spill] sm:$0xff] }
 0x478   :  { %3332 = vtanh.f32 %v1618_v55  ;;  %v6174_v55 = vld [vmem:[#allocation53_spill] sm:$0xff] }
 0x479   :  { %v1530_v18 = vpack.c.bf16 %v1529_v41, %v1529_v41  ;;  %3334 = vtanh.f32 %v1616_v53 }
 0x47a   :  { %3336 = vtanh.f32 %v1619_v24  ;;  %v6176_v24 = vld [vmem:[#allocation55_spill] sm:$0xff] }
 0x47b   :  { %1668 = vmatprep.mubr.bf16.mxu0 %v1530_v18  ;;  %1709 = vmatprep.mubr.bf16.mxu1 %v1530_v18  ;;  %v6175_v18 = vld [vmem:[#allocation54_spill] sm:$0xff] }
 0x481   :  { %v3331_v25 = vpop.eup %3330 }
 0x482   :  { %v1623_v54 = vmul.f32 0.5, %v3331_v25  ;;  %v3333_v27 = vpop.eup %3332  ;;  %v6177_v25 = vld [vmem:[#allocation56_spill] sm:$0xff] }
 0x483   :  { %v1624_v36 = vmul.f32 0.5, %v3333_v27  ;;  %v3335_v15 = vpop.eup %3334  ;;  %v6179_v27 = vld [vmem:[#allocation58_spill] sm:$0xff] }
 0x484   :  { %v1626_v33 = vadd.f32 0.5, %v1623_v54  ;;  %v3337_v41 = vpop.eup %3336  ;;  %v6178_v54 = vld [vmem:[#allocation57_spill] sm:$0xff] }
 0x485   :  { %v1627_v26 = vadd.f32 0.5, %v1624_v36  ;;  %v1625_v4 = vmul.f32 0.5, %v3337_v41  ;;  %v6181_v36 = vld [vmem:[#allocation60_spill] sm:$0xff]  ;;  %v6186_v41 = vld [vmem:[#allocation14_spill] sm:$0xff] }
 0x486   :  { %v1631_v19 = vmul.f32 %v3335_v15, %v1626_v33  ;;  %v6180_v33 = vld [vmem:[#allocation59_spill] sm:$0xff]  ;;  %v6182_v15 = vld [vmem:[#allocation61_spill] sm:$0xff] }
 0x487   :  { %v1630_v22 = vmul.f32 %v1627_v26, %v4518_v21  ;;  %v1628_v53 = vadd.f32 0.5, %v1625_v4  ;;  %v6161_v21 = vld [vmem:[#allocation40_spill] sm:$0xff]  ;;  %v6183_v26 = vld [vmem:[#allocation62_spill] sm:$0xff] }
 0x488   :  { %v6187_v4 = vld [vmem:[#allocation68_spill] sm:$0xff] }
 0x489   :  { %v4760_v49 = vadd.f32 %v1631_v19, %v1630_v22  ;;  %v6184_v19 = vld [vmem:[#allocation8_spill] sm:$0xff]  ;;  %v6185_v22 = vld [vmem:[#allocation9_spill] sm:$0xff] }
 0x48b   :  { %3338 = vtanh.f32 %v4760_v49 }
 0x495   :  { %v3339_v17 = vpop.eup %3338 }
 0x496   :  { %v1634_v31 = vmul.f32 %v3339_v17, %v1628_v53  ;;  %v6188_v53 = vld [vmem:[#allocation69_spill] sm:$0xff]  ;;  %v6189_v17 = vld [vmem:[#allocation70_spill] sm:$0xff] }
 0x498   :  { %v1635_v20 = vpack.c.bf16 %v1634_v31, %v1634_v31  ;;  %v6190_v31 = vld [vmem:[#allocation71_spill] sm:$0xff] }
 0x49a   :  { %1669 = vmatmul.mubr.bf16.vlgmr.msra.gmra.mrb[44].mxu0 %v1635_v20  ;;  %1710 = vmatmul.mubr.bf16.vlgmr.msra.gmra.mrb[44].mxu1 %v1635_v20 }
 0x49b   :  { %1738 = vmatpush1.bf16.msra.mxu0 %v4345_v6  ;;  %1779 = vmatpush1.bf16.msra.mxu1 %v4348_v62  ;;  %v6140_v6 = vld [vmem:[#allocation24_spill] sm:$0xff]  ;;  %v6141_v62 = vld [vmem:[#allocation25_spill] sm:$0xff] }
 0x49c   :  { %1739 = vmatprep.subr.bf16.mxu0 %v4351_v14  ;;  %1780 = vmatprep.subr.bf16.mxu1 %v4354_v63  ;;  %v6142_v14 = vld [vmem:[#allocation26_spill] sm:$0xff]  ;;  %v6143_v63 = vld [vmem:[#allocation27_spill] sm:$0xff] }
 0x49d   :  { %1769 = vmatprep.mubr.bf16.mxu0 %v5956_v1  ;;  %1810 = vmatprep.mubr.bf16.mxu1 %v5956_v1 }
 0x49f   :  { %1740 = vmatpush1.bf16.msra.mxu0 %v4359_v39  ;;  %1781 = vmatpush1.bf16.msra.mxu1 %v4362_v59  ;;  %v6144_v39 = vld [vmem:[#allocation28_spill] sm:$0xff]  ;;  %v6145_v59 = vld [vmem:[#allocation29_spill] sm:$0xff] }
 0x4a0   :  { %1741 = vmatprep.subr.bf16.mxu0 %v4365_v10  ;;  %1782 = vmatprep.subr.bf16.mxu1 %v4368_v57  ;;  %v6146_v10 = vld [vmem:[#allocation30_spill] sm:$0xff]  ;;  %v6147_v57 = vld [vmem:[#allocation31_spill] sm:$0xff] }
 0x4a3   :  { %1742 = vmatpush1.bf16.msra.mxu0 %v4371_v23  ;;  %1783 = vmatpush1.bf16.msra.mxu1 %v4374_v13  ;;  %v6148_v23 = vld [vmem:[#allocation32_spill] sm:$0xff]  ;;  %v6149_v13 = vld [vmem:[#allocation33_spill] sm:$0xff] }
 0x4a4   :  { %1743 = vmatprep.subr.bf16.mxu0 %v4377_v11  ;;  %1784 = vmatprep.subr.bf16.mxu1 %v4380_v7  ;;  %v6150_v11 = vld [vmem:[#allocation34_spill] sm:$0xff]  ;;  %v6151_v7 = vld [vmem:[#allocation35_spill] sm:$0xff] }
 0x4a7   :  { %1744 = vmatpush1.bf16.msra.mxu0 %v4383_v12  ;;  %1785 = vmatpush1.bf16.msra.mxu1 %v4386_v60  ;;  %v6152_v12 = vld [vmem:[#allocation36_spill] sm:$0xff]  ;;  %v6153_v60 = vld [vmem:[#allocation37_spill] sm:$0xff] }
 0x4a8   :  { %1745 = vmatprep.subr.bf16.mxu0 %v4389_v58  ;;  %1786 = vmatprep.subr.bf16.mxu1 %v6072_v5  ;;  %v6154_v58 = vld [vmem:[#allocation38_spill] sm:$0xff]  ;;  %v6162_v5 = vld [vmem:[#allocation41_spill] sm:$0xff] }
 0x4ab   :  { %1746 = vmatpush1.bf16.msra.mxu0 %v6073_v29  ;;  %1787 = vmatpush1.bf16.msra.mxu1 %v6074_v30  ;;  %v6163_v29 = vld [vmem:[#allocation42_spill] sm:$0xff]  ;;  %v6164_v30 = vld [vmem:[#allocation43_spill] sm:$0xff] }
 0x4ac   :  { %1747 = vmatprep.subr.bf16.mxu0 %v6075_v34  ;;  %1788 = vmatprep.subr.bf16.mxu1 %v6076_v35  ;;  %v6165_v34 = vld [vmem:[#allocation44_spill] sm:$0xff]  ;;  %v6166_v35 = vld [vmem:[#allocation45_spill] sm:$0xff] }
 0x4af   :  { %1748 = vmatpush1.bf16.msra.mxu0 %v6077_v37  ;;  %1789 = vmatpush1.bf16.msra.mxu1 %v6078_v38  ;;  %v6167_v37 = vld [vmem:[#allocation46_spill] sm:$0xff]  ;;  %v6168_v38 = vld [vmem:[#allocation47_spill] sm:$0xff] }
 0x4b0   :  { %1749 = vmatprep.subr.bf16.mxu0 %v6079_v40  ;;  %1790 = vmatprep.subr.bf16.mxu1 %v6080_v42  ;;  %v6169_v40 = vld [vmem:[#allocation48_spill] sm:$0xff]  ;;  %v6170_v42 = vld [vmem:[#allocation49_spill] sm:$0xff] }
 0x4b3   :  { %1750 = vmatpush1.bf16.msra.mxu0 %v4419_v9  ;;  %1791 = vmatpush1.bf16.msra.mxu1 %v4422_v0  ;;  %v6158_v9 = vld [vmem:[#allocation66_spill] sm:$0xff]  ;;  %v6159_v0 = vld [vmem:[#allocation67_spill] sm:$0xff] }
 0x4b4   :  { %1751 = vmatprep.subr.bf16.mxu0 %v4425_v2  ;;  %1792 = vmatprep.subr.bf16.mxu1 %v4428_v32  ;;  %v6155_v32 = vld [vmem:[#allocation63_spill] sm:$0xff] }
 0x4b5   :  { %v6160_v2 = vld [vmem:[#allocation39_spill] sm:$0xff] }
 0x4b7   :  { %1752 = vmatpush1.bf16.msra.mxu0 %v4431_v3  ;;  %1793 = vmatpush1.bf16.msra.mxu1 %v4434_v61  ;;  %v6156_v3 = vld [vmem:[#allocation64_spill] sm:$0xff]  ;;  %v6157_v61 = vld [vmem:[#allocation65_spill] sm:$0xff] }
 0x4b8   :  { %1842 = vmatprep.subr.bf16.mxu0 %v4553_v43  ;;  %1883 = vmatprep.subr.bf16.mxu1 %v4556_v44 }
 0x4ba   :  { %1770 = vmatmul.mubr.bf16.vlgmr.msra.gmra.mrb[48].mxu0 %v1635_v20  ;;  %1811 = vmatmul.mubr.bf16.vlgmr.msra.gmra.mrb[48].mxu1 %v1635_v20  ;;  %v6191_v20 = vld [vmem:[#allocation15_spill] sm:$0xff] }
 0x4bb   :  { %1843 = vmatpush1.bf16.msra.mxu0 %v4559_v45  ;;  %1884 = vmatpush1.bf16.msra.mxu1 %v4562_v46 }
 0x4bc   :  { %1844 = vmatprep.subr.bf16.mxu0 %v4565_v47  ;;  %1885 = vmatprep.subr.bf16.mxu1 %v4568_v8 }
 0x4bf   :  { %1845 = vmatpush1.bf16.msra.mxu0 %v4571_v48  ;;  %1886 = vmatpush1.bf16.msra.mxu1 %v4574_v50 }
 0x4c0   :  { %1846 = vmatprep.subr.bf16.mxu0 %v4577_v51  ;;  %1887 = vmatprep.subr.bf16.mxu1 %v4580_v52 }
 0x4c3   :  { %1847 = vmatpush1.bf16.msra.mxu0 %v6140_v6  ;;  %1888 = vmatpush1.bf16.msra.mxu1 %v6141_v62 }
 0x4c4   :  { %1848 = vmatprep.subr.bf16.mxu0 %v6142_v14  ;;  %1889 = vmatprep.subr.bf16.mxu1 %v6143_v63 }
 0x4c7   :  { %1849 = vmatpush1.bf16.msra.mxu0 %v6144_v39  ;;  %1890 = vmatpush1.bf16.msra.mxu1 %v6145_v59 }
 0x4c8   :  { %1850 = vmatprep.subr.bf16.mxu0 %v6146_v10  ;;  %1891 = vmatprep.subr.bf16.mxu1 %v6147_v57 }
 0x4cb   :  { %1851 = vmatpush1.bf16.msra.mxu0 %v6148_v23  ;;  %1892 = vmatpush1.bf16.msra.mxu1 %v6149_v13 }
 0x4cc   :  { %1852 = vmatprep.subr.bf16.mxu0 %v6150_v11  ;;  %1893 = vmatprep.subr.bf16.mxu1 %v6151_v7 }
 0x4cf   :  { %1853 = vmatpush1.bf16.msra.mxu0 %v6152_v12  ;;  %1894 = vmatpush1.bf16.msra.mxu1 %v6153_v60 }
 0x4d0   :  { %1854 = vmatprep.subr.bf16.mxu0 %v6154_v58  ;;  %1895 = vmatprep.subr.bf16.mxu1 %v6155_v32 }
 0x4d3   :  { %1855 = vmatpush1.bf16.msra.mxu0 %v6156_v3  ;;  %1896 = vmatpush1.bf16.msra.mxu1 %v6157_v61 }
 0x4d4   :  { %1856 = vmatprep.subr.bf16.mxu0 %v6158_v9  ;;  %1897 = vmatprep.subr.bf16.mxu1 %v6159_v0 }
 0x4d7   :  { %1857 = vmatpush1.bf16.msra.mxu0 %v6160_v2  ;;  %1898 = vmatpush1.bf16.msra.mxu1 %v6161_v21 }
 0x4d8   :  { %1858 = vmatprep.subr.bf16.mxu0 %v6162_v5  ;;  %1899 = vmatprep.subr.bf16.mxu1 %v6163_v29 }
 0x4db   :  { %1859 = vmatpush1.bf16.msra.mxu0 %v6164_v30  ;;  %1900 = vmatpush1.bf16.msra.mxu1 %v6165_v34 }
 0x4dc   :  { %1860 = vmatprep.subr.bf16.mxu0 %v6166_v35  ;;  %1901 = vmatprep.subr.bf16.mxu1 %v6167_v37 }
 0x4df   :  { %1861 = vmatpush1.bf16.msra.mxu0 %v6168_v38  ;;  %1902 = vmatpush1.bf16.msra.mxu1 %v6169_v40 }
 0x4e0   :  { %1862 = vmatprep.subr.bf16.mxu0 %v6170_v42  ;;  %1903 = vmatprep.subr.bf16.mxu1 %v6171_v16 }
 0x4e3   :  { %1863 = vmatpush1.bf16.msra.mxu0 %v6172_v28  ;;  %1904 = vmatpush1.bf16.msra.mxu1 %v6173_v56 }
 0x4e4   :  { %1864 = vmatprep.subr.bf16.mxu0 %v6174_v55  ;;  %1905 = vmatprep.subr.bf16.mxu1 %v6175_v18 }
 0x4e7   :  { %1865 = vmatpush1.bf16.msra.mxu0 %v6176_v24  ;;  %1906 = vmatpush1.bf16.msra.mxu1 %v6177_v25 }
 0x4e8   :  { %1866 = vmatprep.subr.bf16.mxu0 %v6178_v54  ;;  %1907 = vmatprep.subr.bf16.mxu1 %v6179_v27 }
 0x4eb   :  { %1867 = vmatpush1.bf16.msra.mxu0 %v6180_v33  ;;  %1908 = vmatpush1.bf16.msra.mxu1 %v6181_v36  ;;  %v6192_v36 = vld [vmem:[#allocation16_spill] sm:$0xff]  ;;  %v6197_v33 = vld [vmem:[#allocation11_spill] sm:$0xff] }
 0x4ec   :  { %1868 = vmatprep.subr.bf16.mxu0 %v6182_v15  ;;  %1909 = vmatprep.subr.bf16.mxu1 %v6183_v26  ;;  %v6193_v15 = vld [vmem:[#allocation17_spill] sm:$0xff]  ;;  %v4859_v26 = vld [vmem:[#allocation2 + $0x4] ss:$16 sps:$4 sm:$0xff]  }
 0x4ed   :  { %6194 = vst [vmem:[#allocation19_spill] sm:$0xff] %v4859_v26 }
 0x4ef   :  { %1869 = vmatpush1.bf16.msra.mxu0 %v6184_v19  ;;  %1910 = vmatpush1.bf16.msra.mxu1 %v6185_v22  ;;  %v4862_v22 = vld [vmem:[#allocation2 + $0xc] ss:$16 sps:$4 sm:$0xff]  }
 0x4f0   :  { %1870 = vmatprep.subr.bf16.mxu0 %v6186_v41  ;;  %1911 = vmatprep.subr.bf16.mxu1 %v6187_v4  ;;  %6195 = vst [vmem:[#allocation20_spill] sm:$0xff] %v4862_v22  ;;  %v6196_v41 = vld [vmem:[#allocation10_spill] sm:$0xff] }
 0x4f3   :  { %1871 = vmatpush1.bf16.msra.mxu0 %v6188_v53  ;;  %1912 = vmatpush1.bf16.msra.mxu1 %v6189_v17 }
 0x4f4   :  { %1872 = vmatprep.subr.bf16.mxu0 %v6190_v31  ;;  %1913 = vmatprep.subr.bf16.mxu1 %v6191_v20 }
 0x4f7   :  { %1873 = vmatpush1.bf16.msra.mxu0 %v6192_v36  ;;  %1914 = vmatpush1.bf16.msra.mxu1 %v6193_v15 }
 0x4f8   :  { %1943 = vmatprep.subr.bf16.mxu0 %v4859_v26  ;;  %1984 = vmatprep.subr.bf16.mxu1 %v4862_v22  ;;  %v6198_v26 = vld [vmem:[#allocation12_spill] sm:$0xff]  ;;  %v6199_v22 = vld [vmem:[#allocation13_spill] sm:$0xff] }
 0x56d   :  { %v1670_v4 = vpop.f32.mrb[44].mxu0  ;;  %v1711_v53 = vpop.f32.mrb[44].mxu1 }
 0x56e   :  { %v1671_v17 = vadd.f32 %v1670_v4, %v6196_v41  ;;  %v1672_v19 = vpop.f32.mrb[45].mxu0  ;;  %v1713_v31 = vpop.f32.mrb[45].mxu1  ;;  %v1712_v55 = vadd.f32 %v1711_v53, %v6199_v22 }
 0x56f   :  { %v1673_v20 = vadd.f32 %v1672_v19, %v6197_v33  ;;  %v1674_v27 = vpop.f32.mrb[46].mxu0  ;;  %v1715_v36 = vpop.f32.mrb[46].mxu1  ;;  %v1714_v18 = vadd.f32 %v1713_v31, %v6198_v26 }
 0x570   :  { %v1718_v54 = vmul.f32 0.5, %v1671_v17  ;;  %v1675_v15 = vpop.f32.mrb[47].mxu0  ;;  %v1716_v25 = vpop.f32.mrb[47].mxu1  ;;  %v1720_v56 = vmul.f32 0.5, %v1712_v55  ;;  %v6202_v55 = vld [vmem:[#allocation76_spill] sm:$0xff] }
 0x571   :  { %v1719_v24 = vmul.f32 0.5, %v1673_v20  ;;  %v6200_v15 = vld [vmem:[#allocation18_spill] sm:$0xff] }
 0x572   :  { %3340 = vtanh.f32 %v1718_v54 }
 0x573   :  { %3342 = vtanh.f32 %v1719_v24 }
 0x574   :  { %3344 = vtanh.f32 %v1714_v18 }
 0x575   :  { %3346 = vtanh.f32 %v1720_v56 }
 0x57c   :  { %v3341_v28 = vpop.eup %3340 }
 0x57d   :  { %v1724_v4 = vmul.f32 0.5, %v3341_v28  ;;  %v3343_v41 = vpop.eup %3342  ;;  %v6203_v28 = vld [vmem:[#allocation77_spill] sm:$0xff] }
 0x57e   :  { %v1725_v19 = vmul.f32 0.5, %v3343_v41  ;;  %v3345_v27 = vpop.eup %3344  ;;  %v6204_v41 = vld [vmem:[#allocation78_spill] sm:$0xff] }
 0x57f   :  { %v1727_v16 = vadd.f32 0.5, %v1724_v4  ;;  %v3347_v24 = vpop.eup %3346 }
 0x580   :  { %v1728_v36 = vadd.f32 0.5, %v1725_v19  ;;  %v1726_v18 = vmul.f32 0.5, %v3347_v24  ;;  %v6205_v19 = vld [vmem:[#allocation79_spill] sm:$0xff] }
 0x581   :  { %v1732_v17 = vmul.f32 %v3345_v27, %v1727_v16 }
 0x582   :  { %v1731_v25 = vmul.f32 %v1728_v36, %v6200_v15 }
 0x584   :  { %v4870_v20 = vadd.f32 %v1732_v17, %v1731_v25  ;;  %v1729_v17 = vadd.f32 0.5, %v1726_v18 }
 0x586   :  { %6201 = vst [vmem:[#allocation21_spill] sm:$0xff] %v4870_v20  ;;  %3348 = vtanh.f32 %v4870_v20 }
 0x58d   :  { %v1771_v54 = vpop.f32.mrb[48].mxu0  ;;  %v1812_v53 = vpop.f32.mrb[48].mxu1 }
 0x58e   :  { %v1819_v31 = vadd.f32 %v1771_v54, %v6202_v55  ;;  %v1821_v22 = vadd.f32 %v1812_v53, %v6203_v28  ;;  %v1773_v4 = vpop.f32.mrb[49].mxu0  ;;  %v1814_v56 = vpop.f32.mrb[49].mxu1 }
 0x58f   :  { %v1820_v26 = vadd.f32 %v1773_v4, %v6204_v41  ;;  %v1822_v16 = vadd.f32 %v1814_v56, %v6205_v19  ;;  %v1775_v27 = vpop.f32.mrb[50].mxu0  ;;  %v1816_v36 = vpop.f32.mrb[50].mxu1 }
 0x590   :  { %v1823_v15 = vmul.f32 0.5, %v1819_v31  ;;  %v1776_v25 = vpop.f32.mrb[51].mxu0  ;;  %v1817_v20 = vpop.f32.mrb[51].mxu1  ;;  %v1825_v53 = vmul.f32 0.5, %v1821_v22 }
 0x591   :  { %v3349_v33 = vpop.eup %3348  ;;  %v1824_v24 = vmul.f32 0.5, %v1820_v26  ;;  %v4894_v25 = vld [vmem:[#allocation2 + $0x2c] ss:$16 sps:$4 sm:$0xff]  }
 0x592   :  { %3350 = vtanh.f32 %v1823_v15  ;;  %v1735_v42 = vmul.f32 %v3349_v33, %v1729_v17  ;;  %v4885_v17 = vld [vmem:[#allocation2] ss:$16 sps:$4 sm:$0xff]   ;;  %v4891_v15 = vld [vmem:[#allocation2 + $0x24] ss:$16 sps:$4 sm:$0xff]  }
 0x593   :  { %3352 = vtanh.f32 %v1824_v24  ;;  %v4899_v24 = vld [vmem:[#allocation2 + $0x20] ss:$16 sps:$4 sm:$0xff]  }
 0x594   :  { %v1736_v54 = vpack.c.bf16 %v1735_v42, %v1735_v42  ;;  %3354 = vtanh.f32 %v1822_v16 }
 0x595   :  { %3356 = vtanh.f32 %v1825_v53  ;;  %v4905_v53 = vld [vmem:[#allocation2 + $0x44] ss:$16 sps:$4 sm:$0xff]  }
 0x596   :  { %1874 = vmatprep.mubr.bf16.mxu0 %v1736_v54  ;;  %1915 = vmatprep.mubr.bf16.mxu1 %v1736_v54  ;;  %v4902_v54 = vld [vmem:[#allocation2 + $0x28] ss:$16 sps:$4 sm:$0xff]  }
 0x59c   :  { %v3351_v55 = vpop.eup %3350 }
 0x59d   :  { %v1829_v28 = vmul.f32 0.5, %v3351_v55  ;;  %v3353_v4 = vpop.eup %3352  ;;  %v4908_v55 = vld [vmem:[#allocation2 + $0x4c] ss:$16 sps:$4 sm:$0xff]  }
 0x59e   :  { %v1830_v41 = vmul.f32 0.5, %v3353_v4  ;;  %v3355_v18 = vpop.eup %3354  ;;  %v4914_v4 = vld [vmem:[#allocation2 + $0x48] ss:$16 sps:$4 sm:$0xff]  }
 0x59f   :  { %v1832_v56 = vadd.f32 0.5, %v1829_v28  ;;  %v3357_v42 = vpop.eup %3356  ;;  %v4911_v28 = vld [vmem:[#allocation2 + $0x40] ss:$16 sps:$4 sm:$0xff]  }
 0x5a0   :  { %v1833_v31 = vadd.f32 0.5, %v1830_v41  ;;  %v1831_v33 = vmul.f32 0.5, %v3357_v42  ;;  %v4920_v41 = vld [vmem:[#allocation2 + $0x6c] ss:$16 sps:$4 sm:$0xff]   ;;  %v4935_v42 = vld [vmem:[#allocation2 + $0x80] ss:$16 sps:$4 sm:$0xff]  }
 0x5a1   :  { %v1837_v19 = vmul.f32 %v3355_v18, %v1832_v56  ;;  %v4917_v56 = vld [vmem:[#allocation2 + $0x64] ss:$16 sps:$4 sm:$0xff]   ;;  %v4923_v18 = vld [vmem:[#allocation2 + $0x60] ss:$16 sps:$4 sm:$0xff]   ;;  %6207 = vst [vmem:[#allocation23_spill] sm:$0xff] %v4935_v42 }
 0x5a2   :  { %v1836_v20 = vmul.f32 %v1833_v31, %v4760_v49  ;;  %v1834_v16 = vadd.f32 0.5, %v1831_v33  ;;  %v4888_v49 = vld [vmem:[#allocation2 + $0x8] ss:$16 sps:$4 sm:$0xff]  }
 0x5a3   :  { %v4926_v31 = vld [vmem:[#allocation2 + $0x68] ss:$16 sps:$4 sm:$0xff]  }
 0x5a4   :  { %v4878_v26 = vadd.f32 %v1837_v19, %v1836_v20  ;;  %v4929_v19 = vld [vmem:[#allocation2 + $0x84] ss:$16 sps:$4 sm:$0xff]   ;;  %v4932_v20 = vld [vmem:[#allocation2 + $0x8c] ss:$16 sps:$4 sm:$0xff]   ;;  %v4938_v33 = vld [vmem:[#allocation2 + $0x88] ss:$16 sps:$4 sm:$0xff]  }
 0x5a5   :  { %6206 = vst [vmem:[#allocation22_spill] sm:$0xff] %v4932_v20  ;;  %6208 = vst [vmem:[#allocation72_spill] sm:$0xff] %v4938_v33 }
 0x5a6   :  { %3358 = vtanh.f32 %v4878_v26 }
 0x5b0   :  { %v3359_v27 = vpop.eup %3358 }
 0x5b1   :  { %v1840_v22 = vmul.f32 %v3359_v27, %v1834_v16  ;;  %v4941_v16 = vld [vmem:[#allocation2 + $0xa4] ss:$16 sps:$4 sm:$0xff]   ;;  %v4944_v27 = vld [vmem:[#allocation2 + $0xac] ss:$16 sps:$4 sm:$0xff]  }
 0x5b2   :  { %6209 = vst [vmem:[#allocation73_spill] sm:$0xff] %v4941_v16  ;;  %6210 = vst [vmem:[#allocation74_spill] sm:$0xff] %v4944_v27 }
 0x5b3   :  { %v4881_v36 = vpack.c.bf16 %v1840_v22, %v1840_v22  ;;  %v4947_v22 = vld [vmem:[#allocation2 + $0xa0] ss:$16 sps:$4 sm:$0xff]  }
 0x5b4   :  { %6211 = vst [vmem:[#allocation75_spill] sm:$0xff] %v4947_v22 }
 0x5b5   :  { %1875 = vmatmul.mubr.bf16.vlgmr.msra.gmra.mrb[52].mxu0 %v4881_v36  ;;  %1916 = vmatmul.mubr.bf16.vlgmr.msra.gmra.mrb[52].mxu1 %v4881_v36 }
 0x5b6   :  { %1944 = vmatpush1.bf16.msra.mxu0 %v4885_v17  ;;  %1985 = vmatpush1.bf16.msra.mxu1 %v4888_v49 }
 0x5b7   :  { %1945 = vmatprep.subr.bf16.mxu0 %v4891_v15  ;;  %1986 = vmatprep.subr.bf16.mxu1 %v4894_v25 }
 0x5b8   :  { %1975 = vmatprep.mubr.bf16.mxu0 %v5956_v1  ;;  %2016 = vmatprep.mubr.bf16.mxu1 %v5956_v1 }
 0x5ba   :  { %1946 = vmatpush1.bf16.msra.mxu0 %v4899_v24  ;;  %1987 = vmatpush1.bf16.msra.mxu1 %v4902_v54 }
 0x5bb   :  { %1947 = vmatprep.subr.bf16.mxu0 %v4905_v53  ;;  %1988 = vmatprep.subr.bf16.mxu1 %v4908_v55 }
 0x5be   :  { %1948 = vmatpush1.bf16.msra.mxu0 %v4911_v28  ;;  %1989 = vmatpush1.bf16.msra.mxu1 %v4914_v4 }
 0x5bf   :  { %1949 = vmatprep.subr.bf16.mxu0 %v4917_v56  ;;  %1990 = vmatprep.subr.bf16.mxu1 %v4920_v41 }
 0x5c2   :  { %1950 = vmatpush1.bf16.msra.mxu0 %v4923_v18  ;;  %1991 = vmatpush1.bf16.msra.mxu1 %v4926_v31 }
 0x5c3   :  { %1951 = vmatprep.subr.bf16.mxu0 %v4929_v19  ;;  %1992 = vmatprep.subr.bf16.mxu1 %v4932_v20  ;;  %v4950_v20 = vld [vmem:[#allocation2 + $0xa8] ss:$16 sps:$4 sm:$0xff]  }
 0x5c4   :  { %6212 = vst [vmem:[#allocation24_spill] sm:$0xff] %v4950_v20 }
 0x5c6   :  { %1952 = vmatpush1.bf16.msra.mxu0 %v4935_v42  ;;  %1993 = vmatpush1.bf16.msra.mxu1 %v4938_v33  ;;  %v4953_v42 = vld [vmem:[#allocation2 + $0xc4] ss:$16 sps:$4 sm:$0xff]   ;;  %v4956_v33 = vld [vmem:[#allocation2 + $0xcc] ss:$16 sps:$4 sm:$0xff]  }
 0x5c7   :  { %1953 = vmatprep.subr.bf16.mxu0 %v4941_v16  ;;  %1994 = vmatprep.subr.bf16.mxu1 %v4944_v27  ;;  %6213 = vst [vmem:[#allocation25_spill] sm:$0xff] %v4953_v42  ;;  %6214 = vst [vmem:[#allocation26_spill] sm:$0xff] %v4956_v33  ;;  %v4959_v16 = vld [vmem:[#allocation2 + $0xc0] ss:$16 sps:$4 sm:$0xff]   ;;  %v4962_v27 = vld [vmem:[#allocation2 + $0xc8] ss:$16 sps:$4 sm:$0xff]  }
 0x5ca   :  { %1954 = vmatpush1.bf16.msra.mxu0 %v4947_v22  ;;  %1995 = vmatpush1.bf16.msra.mxu1 %v4950_v20  ;;  %v4965_v22 = vld [vmem:[#allocation2 + $0xe4] ss:$16 sps:$4 sm:$0xff]   ;;  %v4968_v20 = vld [vmem:[#allocation2 + $0xec] ss:$16 sps:$4 sm:$0xff]  }
 0x5cb   :  { %1955 = vmatprep.subr.bf16.mxu0 %v4953_v42  ;;  %1996 = vmatprep.subr.bf16.mxu1 %v4956_v33  ;;  %v4971_v42 = vld [vmem:[#allocation2 + $0xe0] ss:$16 sps:$4 sm:$0xff]   ;;  %v4974_v33 = vld [vmem:[#allocation2 + $0xe8] ss:$16 sps:$4 sm:$0xff]  }
 0x5ce   :  { %1956 = vmatpush1.bf16.msra.mxu0 %v4959_v16  ;;  %1997 = vmatpush1.bf16.msra.mxu1 %v4962_v27 }
 0x5cf   :  { %1957 = vmatprep.subr.bf16.mxu0 %v4965_v22  ;;  %1998 = vmatprep.subr.bf16.mxu1 %v4968_v20 }
 0x5d2   :  { %1958 = vmatpush1.bf16.msra.mxu0 %v4971_v42  ;;  %1999 = vmatpush1.bf16.msra.mxu1 %v4974_v33 }
 0x5d3   :  { %2048 = vmatprep.subr.bf16.mxu0 %v4553_v43  ;;  %2089 = vmatprep.subr.bf16.mxu1 %v4556_v44  ;;  %v6215_v43 = vld [vmem:[#allocation49_spill] sm:$0xff]  ;;  %v6216_v44 = vld [vmem:[#allocation50_spill] sm:$0xff] }
 0x5d5   :  { %1976 = vmatmul.mubr.bf16.vlgmr.msra.gmra.mrb[56].mxu0 %v4881_v36  ;;  %2017 = vmatmul.mubr.bf16.vlgmr.msra.gmra.mrb[56].mxu1 %v4881_v36  ;;  %v6243_v36 = vld [vmem:[#allocation12_spill] sm:$0xff] }
 0x5d6   :  { %2049 = vmatpush1.bf16.msra.mxu0 %v4559_v45  ;;  %2090 = vmatpush1.bf16.msra.mxu1 %v4562_v46  ;;  %v6217_v45 = vld [vmem:[#allocation51_spill] sm:$0xff]  ;;  %v6218_v46 = vld [vmem:[#allocation52_spill] sm:$0xff] }
 0x5d7   :  { %2050 = vmatprep.subr.bf16.mxu0 %v4565_v47  ;;  %2091 = vmatprep.subr.bf16.mxu1 %v4568_v8  ;;  %v6219_v47 = vld [vmem:[#allocation53_spill] sm:$0xff]  ;;  %v6220_v8 = vld [vmem:[#allocation54_spill] sm:$0xff] }
 0x5da   :  { %2051 = vmatpush1.bf16.msra.mxu0 %v4571_v48  ;;  %2092 = vmatpush1.bf16.msra.mxu1 %v4574_v50  ;;  %v6221_v48 = vld [vmem:[#allocation55_spill] sm:$0xff]  ;;  %v6222_v50 = vld [vmem:[#allocation56_spill] sm:$0xff] }
 0x5db   :  { %2052 = vmatprep.subr.bf16.mxu0 %v4577_v51  ;;  %2093 = vmatprep.subr.bf16.mxu1 %v4580_v52  ;;  %v6223_v51 = vld [vmem:[#allocation57_spill] sm:$0xff]  ;;  %v6224_v52 = vld [vmem:[#allocation58_spill] sm:$0xff] }
 0x5de   :  { %2053 = vmatpush1.bf16.msra.mxu0 %v6140_v6  ;;  %2094 = vmatpush1.bf16.msra.mxu1 %v6141_v62  ;;  %v6225_v6 = vld [vmem:[#allocation59_spill] sm:$0xff]  ;;  %v6226_v62 = vld [vmem:[#allocation60_spill] sm:$0xff] }
 0x5df   :  { %2054 = vmatprep.subr.bf16.mxu0 %v6142_v14  ;;  %2095 = vmatprep.subr.bf16.mxu1 %v6143_v63  ;;  %v6227_v14 = vld [vmem:[#allocation61_spill] sm:$0xff]  ;;  %v6228_v63 = vld [vmem:[#allocation62_spill] sm:$0xff] }
 0x5e2   :  { %2055 = vmatpush1.bf16.msra.mxu0 %v6144_v39  ;;  %2096 = vmatpush1.bf16.msra.mxu1 %v6145_v59  ;;  %v6229_v39 = vld [vmem:[#allocation8_spill] sm:$0xff]  ;;  %v6230_v59 = vld [vmem:[#allocation9_spill] sm:$0xff] }
 0x5e3   :  { %2056 = vmatprep.subr.bf16.mxu0 %v6146_v10  ;;  %2097 = vmatprep.subr.bf16.mxu1 %v6147_v57  ;;  %v6231_v10 = vld [vmem:[#allocation14_spill] sm:$0xff]  ;;  %v6232_v57 = vld [vmem:[#allocation68_spill] sm:$0xff] }
 0x5e6   :  { %2057 = vmatpush1.bf16.msra.mxu0 %v6148_v23  ;;  %2098 = vmatpush1.bf16.msra.mxu1 %v6149_v13  ;;  %v6233_v23 = vld [vmem:[#allocation69_spill] sm:$0xff]  ;;  %v6234_v13 = vld [vmem:[#allocation70_spill] sm:$0xff] }
 0x5e7   :  { %2058 = vmatprep.subr.bf16.mxu0 %v6150_v11  ;;  %2099 = vmatprep.subr.bf16.mxu1 %v6151_v7  ;;  %v6235_v11 = vld [vmem:[#allocation71_spill] sm:$0xff] }
 0x5e8   :  { %v6236_v7 = vld [vmem:[#allocation15_spill] sm:$0xff] }
 0x5ea   :  { %2059 = vmatpush1.bf16.msra.mxu0 %v6152_v12  ;;  %2100 = vmatpush1.bf16.msra.mxu1 %v6153_v60  ;;  %v6237_v12 = vld [vmem:[#allocation16_spill] sm:$0xff]  ;;  %v6238_v60 = vld [vmem:[#allocation17_spill] sm:$0xff] }
 0x5eb   :  { %2060 = vmatprep.subr.bf16.mxu0 %v6154_v58  ;;  %2101 = vmatprep.subr.bf16.mxu1 %v6155_v32  ;;  %v6239_v58 = vld [vmem:[#allocation19_spill] sm:$0xff]  ;;  %v6240_v32 = vld [vmem:[#allocation20_spill] sm:$0xff] }
 0x5ee   :  { %2061 = vmatpush1.bf16.msra.mxu0 %v6156_v3  ;;  %2102 = vmatpush1.bf16.msra.mxu1 %v6157_v61 }
 0x5ef   :  { %2062 = vmatprep.subr.bf16.mxu0 %v6158_v9  ;;  %2103 = vmatprep.subr.bf16.mxu1 %v6159_v0  ;;  %v6241_v9 = vld [vmem:[#allocation10_spill] sm:$0xff] }
 0x5f2   :  { %2063 = vmatpush1.bf16.msra.mxu0 %v6160_v2  ;;  %2104 = vmatpush1.bf16.msra.mxu1 %v6161_v21 }
 0x5f3   :  { %2064 = vmatprep.subr.bf16.mxu0 %v6162_v5  ;;  %2105 = vmatprep.subr.bf16.mxu1 %v6163_v29  ;;  %v6242_v5 = vld [vmem:[#allocation11_spill] sm:$0xff] }
 0x5f6   :  { %2065 = vmatpush1.bf16.msra.mxu0 %v6164_v30  ;;  %2106 = vmatpush1.bf16.msra.mxu1 %v6165_v34 }
 0x5f7   :  { %2066 = vmatprep.subr.bf16.mxu0 %v6166_v35  ;;  %2107 = vmatprep.subr.bf16.mxu1 %v6167_v37 }
 0x5fa   :  { %2067 = vmatpush1.bf16.msra.mxu0 %v6168_v38  ;;  %2108 = vmatpush1.bf16.msra.mxu1 %v6169_v40 }
 0x5fb   :  { %2068 = vmatprep.subr.bf16.mxu0 %v6215_v43  ;;  %2109 = vmatprep.subr.bf16.mxu1 %v6216_v44  ;;  %v6244_v44 = vld [vmem:[#allocation13_spill] sm:$0xff] }
 0x5fe   :  { %2069 = vmatpush1.bf16.msra.mxu0 %v6217_v45  ;;  %2110 = vmatpush1.bf16.msra.mxu1 %v6218_v46 }
 0x5ff   :  { %2070 = vmatprep.subr.bf16.mxu0 %v6219_v47  ;;  %2111 = vmatprep.subr.bf16.mxu1 %v6220_v8 }
 0x602   :  { %2071 = vmatpush1.bf16.msra.mxu0 %v6221_v48  ;;  %2112 = vmatpush1.bf16.msra.mxu1 %v6222_v50 }
 0x603   :  { %2072 = vmatprep.subr.bf16.mxu0 %v6223_v51  ;;  %2113 = vmatprep.subr.bf16.mxu1 %v6224_v52 }
 0x606   :  { %2073 = vmatpush1.bf16.msra.mxu0 %v6225_v6  ;;  %2114 = vmatpush1.bf16.msra.mxu1 %v6226_v62 }
 0x607   :  { %2074 = vmatprep.subr.bf16.mxu0 %v6227_v14  ;;  %2115 = vmatprep.subr.bf16.mxu1 %v6228_v63  ;;  %v6245_v14 = vld [vmem:[#allocation21_spill] sm:$0xff] }
 0x60a   :  { %2075 = vmatpush1.bf16.msra.mxu0 %v6229_v39  ;;  %2116 = vmatpush1.bf16.msra.mxu1 %v6230_v59 }
 0x60b   :  { %2076 = vmatprep.subr.bf16.mxu0 %v6231_v10  ;;  %2117 = vmatprep.subr.bf16.mxu1 %v6232_v57 }
 0x60e   :  { %2077 = vmatpush1.bf16.msra.mxu0 %v6233_v23  ;;  %2118 = vmatpush1.bf16.msra.mxu1 %v6234_v13  ;;  %v6246_v13 = vld [vmem:[#allocation80_spill] sm:$0xff] }
 0x60f   :  { %2078 = vmatprep.subr.bf16.mxu0 %v6235_v11  ;;  %2119 = vmatprep.subr.bf16.mxu1 %v6236_v7  ;;  %v6247_v7 = vld [vmem:[#allocation81_spill] sm:$0xff] }
 0x612   :  { %2079 = vmatpush1.bf16.msra.mxu0 %v6237_v12  ;;  %2120 = vmatpush1.bf16.msra.mxu1 %v6238_v60 }
 0x613   :  { %2149 = vmatprep.subr.bf16.mxu0 %v6239_v58  ;;  %2190 = vmatprep.subr.bf16.mxu1 %v6240_v32 }
 0x688   :  { %v1876_v3 = vpop.f32.mrb[52].mxu0  ;;  %v1917_v61 = vpop.f32.mrb[52].mxu1 }
 0x689   :  { %v1877_v0 = vadd.f32 %v1876_v3, %v6241_v9  ;;  %v1878_v2 = vpop.f32.mrb[53].mxu0  ;;  %v1919_v21 = vpop.f32.mrb[53].mxu1  ;;  %v1918_v45 = vadd.f32 %v1917_v61, %v6244_v44  ;;  %v6248_v61 = vld [vmem:[#allocation82_spill] sm:$0xff] }
 0x68a   :  { %v1879_v29 = vadd.f32 %v1878_v2, %v6242_v5  ;;  %v1880_v30 = vpop.f32.mrb[54].mxu0  ;;  %v1921_v34 = vpop.f32.mrb[54].mxu1  ;;  %v1920_v43 = vadd.f32 %v1919_v21, %v6243_v36  ;;  %v6249_v2 = vld [vmem:[#allocation83_spill] sm:$0xff] }
 0x68b   :  { %v1924_v35 = vmul.f32 0.5, %v1877_v0  ;;  %v1881_v37 = vpop.f32.mrb[55].mxu0  ;;  %v1922_v38 = vpop.f32.mrb[55].mxu1  ;;  %v1926_v46 = vmul.f32 0.5, %v1918_v45 }
 0x68c   :  { %v1925_v40 = vmul.f32 0.5, %v1879_v29 }
 0x68d   :  { %3360 = vtanh.f32 %v1924_v35 }
 0x68e   :  { %3362 = vtanh.f32 %v1925_v40 }
 0x68f   :  { %3364 = vtanh.f32 %v1920_v43 }
 0x690   :  { %3366 = vtanh.f32 %v1926_v46 }
 0x697   :  { %v3361_v47 = vpop.eup %3360 }
 0x698   :  { %v1930_v8 = vmul.f32 0.5, %v3361_v47  ;;  %v3363_v48 = vpop.eup %3362 }
 0x699   :  { %v1931_v51 = vmul.f32 0.5, %v3363_v48  ;;  %v3365_v52 = vpop.eup %3364 }
 0x69a   :  { %v1933_v50 = vadd.f32 0.5, %v1930_v8  ;;  %v3367_v59 = vpop.eup %3366 }
 0x69b   :  { %v1934_v6 = vadd.f32 0.5, %v1931_v51  ;;  %v1932_v10 = vmul.f32 0.5, %v3367_v59 }
 0x69c   :  { %v1938_v62 = vmul.f32 %v3365_v52, %v1933_v50 }
 0x69d   :  { %v1937_v63 = vmul.f32 %v1934_v6, %v6245_v14  ;;  %v1935_v34 = vadd.f32 0.5, %v1932_v10 }
 0x69f   :  { %v5050_v39 = vadd.f32 %v1938_v62, %v1937_v63 }
 0x6a1   :  { %3368 = vtanh.f32 %v5050_v39 }
 0x6a8   :  { %v1977_v57 = vpop.f32.mrb[56].mxu0  ;;  %v2018_v23 = vpop.f32.mrb[56].mxu1 }
 0x6a9   :  { %v2025_v11 = vadd.f32 %v1977_v57, %v6246_v13  ;;  %v2027_v12 = vadd.f32 %v2018_v23, %v6247_v7  ;;  %v1979_v60 = vpop.f32.mrb[57].mxu0  ;;  %v2020_v3 = vpop.f32.mrb[57].mxu1 }
 0x6aa   :  { %v2026_v0 = vadd.f32 %v1979_v60, %v6248_v61  ;;  %v2028_v21 = vadd.f32 %v2020_v3, %v6249_v2  ;;  %v1981_v29 = vpop.f32.mrb[58].mxu0  ;;  %v2022_v30 = vpop.f32.mrb[58].mxu1  ;;  %v6252_v60 = vld [vmem:[#allocation72_spill] sm:$0xff]  ;;  %v6253_v3 = vld [vmem:[#allocation73_spill] sm:$0xff]  ;;  %v6254_v61 = vld [vmem:[#allocation74_spill] sm:$0xff] }
 0x6ab   :  { %v2029_v35 = vmul.f32 0.5, %v2025_v11  ;;  %v1982_v37 = vpop.f32.mrb[59].mxu0  ;;  %v2023_v38 = vpop.f32.mrb[59].mxu1  ;;  %v2031_v47 = vmul.f32 0.5, %v2027_v12  ;;  %v6251_v12 = vld [vmem:[#allocation23_spill] sm:$0xff]  ;;  %v6256_v2 = vld [vmem:[#allocation24_spill] sm:$0xff] }
 0x6ac   :  { %v3369_v40 = vpop.eup %3368  ;;  %v2030_v43 = vmul.f32 0.5, %v2026_v0  ;;  %v6255_v0 = vld [vmem:[#allocation75_spill] sm:$0xff]  ;;  %v6258_v29 = vld [vmem:[#allocation26_spill] sm:$0xff] }
 0x6ad   :  { %3370 = vtanh.f32 %v2029_v35  ;;  %v1941_v45 = vmul.f32 %v3369_v40, %v1935_v34  ;;  %v5093_v30 = vld [vmem:[#allocation4 + $0x4] ss:$16 sps:$4 sm:$0xff]   ;;  %v5096_v34 = vld [vmem:[#allocation4 + $0xc] ss:$16 sps:$4 sm:$0xff]   ;;  %v5099_v35 = vld [vmem:[#allocation4] ss:$16 sps:$4 sm:$0xff]  }
 0x6ae   :  { %3372 = vtanh.f32 %v2030_v43  ;;  %v5102_v37 = vld [vmem:[#allocation4 + $0x8] ss:$16 sps:$4 sm:$0xff]   ;;  %v5105_v38 = vld [vmem:[#allocation4 + $0x24] ss:$16 sps:$4 sm:$0xff]   ;;  %v5108_v40 = vld [vmem:[#allocation4 + $0x2c] ss:$16 sps:$4 sm:$0xff]  }
 0x6af   :  { %v1942_v46 = vpack.c.bf16 %v1941_v45, %v1941_v45  ;;  %3374 = vtanh.f32 %v2028_v21  ;;  %v6257_v21 = vld [vmem:[#allocation25_spill] sm:$0xff]  ;;  %v5111_v43 = vld [vmem:[#allocation4 + $0x20] ss:$16 sps:$4 sm:$0xff]  }
 0x6b0   :  { %3376 = vtanh.f32 %v2031_v47  ;;  %v5114_v45 = vld [vmem:[#allocation4 + $0x28] ss:$16 sps:$4 sm:$0xff]   ;;  %v5120_v47 = vld [vmem:[#allocation4 + $0x4c] ss:$16 sps:$4 sm:$0xff]  }
 0x6b1   :  { %2080 = vmatprep.mubr.bf16.mxu0 %v1942_v46  ;;  %2121 = vmatprep.mubr.bf16.mxu1 %v1942_v46  ;;  %v5117_v46 = vld [vmem:[#allocation4 + $0x44] ss:$16 sps:$4 sm:$0xff]  }
 0x6b7   :  { %v3371_v8 = vpop.eup %3370 }
 0x6b8   :  { %v2035_v48 = vmul.f32 0.5, %v3371_v8  ;;  %v3373_v50 = vpop.eup %3372  ;;  %v5123_v8 = vld [vmem:[#allocation4 + $0x40] ss:$16 sps:$4 sm:$0xff]  }
 0x6b9   :  { %v2036_v52 = vmul.f32 0.5, %v3373_v50  ;;  %v3375_v6 = vpop.eup %3374  ;;  %6259 = vst [vmem:[#allocation27_spill] sm:$0xff] %v5123_v8  ;;  %v5129_v50 = vld [vmem:[#allocation4 + $0x64] ss:$16 sps:$4 sm:$0xff]  }
 0x6ba   :  { %v2038_v51 = vadd.f32 0.5, %v2035_v48  ;;  %v3377_v10 = vpop.eup %3376  ;;  %v5126_v48 = vld [vmem:[#allocation4 + $0x48] ss:$16 sps:$4 sm:$0xff]   ;;  %6261 = vst [vmem:[#allocation29_spill] sm:$0xff] %v5129_v50 }
 0x6bb   :  { %v2039_v62 = vadd.f32 0.5, %v2036_v52  ;;  %v2037_v57 = vmul.f32 0.5, %v3377_v10  ;;  %6260 = vst [vmem:[#allocation28_spill] sm:$0xff] %v5126_v48  ;;  %v5135_v52 = vld [vmem:[#allocation4 + $0x60] ss:$16 sps:$4 sm:$0xff]  }
 0x6bc   :  { %v2043_v14 = vmul.f32 %v3375_v6, %v2038_v51  ;;  %v5132_v51 = vld [vmem:[#allocation4 + $0x6c] ss:$16 sps:$4 sm:$0xff]   ;;  %6263 = vst [vmem:[#allocation31_spill] sm:$0xff] %v5135_v52  ;;  %v5138_v6 = vld [vmem:[#allocation4 + $0x68] ss:$16 sps:$4 sm:$0xff]  }
 0x6bd   :  { %v2042_v63 = vmul.f32 %v2039_v62, %v4878_v26  ;;  %v2040_v23 = vadd.f32 0.5, %v2037_v57  ;;  %v6250_v26 = vld [vmem:[#allocation22_spill] sm:$0xff]  ;;  %6262 = vst [vmem:[#allocation30_spill] sm:$0xff] %v5132_v51  ;;  %6264 = vst [vmem:[#allocation32_spill] sm:$0xff] %v5138_v6  ;;  %v5150_v10 = vld [vmem:[#allocation4 + $0x88] ss:$16 sps:$4 sm:$0xff]  }
 0x6be   :  { %v5141_v62 = vld [vmem:[#allocation4 + $0x84] ss:$16 sps:$4 sm:$0xff]   ;;  %6268 = vst [vmem:[#allocation36_spill] sm:$0xff] %v5150_v10 }
 0x6bf   :  { %v5058_v59 = vadd.f32 %v2043_v14, %v2042_v63  ;;  %6265 = vst [vmem:[#allocation33_spill] sm:$0xff] %v5141_v62  ;;  %v5144_v14 = vld [vmem:[#allocation4 + $0x8c] ss:$16 sps:$4 sm:$0xff]   ;;  %v5147_v63 = vld [vmem:[#allocation4 + $0x80] ss:$16 sps:$4 sm:$0xff]  }
 0x6c0   :  { %6266 = vst [vmem:[#allocation34_spill] sm:$0xff] %v5144_v14  ;;  %6267 = vst [vmem:[#allocation35_spill] sm:$0xff] %v5147_v63  ;;  %v5153_v57 = vld [vmem:[#allocation4 + $0xa4] ss:$16 sps:$4 sm:$0xff]  }
 0x6c1   :  { %3378 = vtanh.f32 %v5058_v59  ;;  %6269 = vst [vmem:[#allocation37_spill] sm:$0xff] %v5153_v57 }
 0x6cb   :  { %v3379_v13 = vpop.eup %3378 }
 0x6cc   :  { %v2046_v11 = vmul.f32 %v3379_v13, %v2040_v23  ;;  %v5156_v23 = vld [vmem:[#allocation4 + $0xac] ss:$16 sps:$4 sm:$0xff]   ;;  %v5159_v13 = vld [vmem:[#allocation4 + $0xa0] ss:$16 sps:$4 sm:$0xff]  }
 0x6cd   :  { %6270 = vst [vmem:[#allocation38_spill] sm:$0xff] %v5156_v23  ;;  %6271 = vst [vmem:[#allocation63_spill] sm:$0xff] %v5159_v13 }
 0x6ce   :  { %v2047_v7 = vpack.c.bf16 %v2046_v11, %v2046_v11  ;;  %v5162_v11 = vld [vmem:[#allocation4 + $0xa8] ss:$16 sps:$4 sm:$0xff]  }
 0x6cf   :  { %6272 = vst [vmem:[#allocation64_spill] sm:$0xff] %v5162_v11 }
 0x6d0   :  { %2081 = vmatmul.mubr.bf16.vlgmr.msra.gmra.mrb[60].mxu0 %v2047_v7  ;;  %2122 = vmatmul.mubr.bf16.vlgmr.msra.gmra.mrb[60].mxu1 %v2047_v7 }
 0x6d1   :  { %2150 = vmatpush1.bf16.msra.mxu0 %v4885_v17  ;;  %2191 = vmatpush1.bf16.msra.mxu1 %v4888_v49 }
 0x6d2   :  { %2151 = vmatprep.subr.bf16.mxu0 %v4891_v15  ;;  %2192 = vmatprep.subr.bf16.mxu1 %v4894_v25 }
 0x6d3   :  { %2181 = vmatprep.mubr.bf16.mxu0 %v5956_v1  ;;  %2222 = vmatprep.mubr.bf16.mxu1 %v5956_v1 }
 0x6d5   :  { %2152 = vmatpush1.bf16.msra.mxu0 %v4899_v24  ;;  %2193 = vmatpush1.bf16.msra.mxu1 %v4902_v54 }
 0x6d6   :  { %2153 = vmatprep.subr.bf16.mxu0 %v4905_v53  ;;  %2194 = vmatprep.subr.bf16.mxu1 %v4908_v55 }
 0x6d9   :  { %2154 = vmatpush1.bf16.msra.mxu0 %v4911_v28  ;;  %2195 = vmatpush1.bf16.msra.mxu1 %v4914_v4 }
 0x6da   :  { %2155 = vmatprep.subr.bf16.mxu0 %v4917_v56  ;;  %2196 = vmatprep.subr.bf16.mxu1 %v4920_v41 }
 0x6dd   :  { %2156 = vmatpush1.bf16.msra.mxu0 %v4923_v18  ;;  %2197 = vmatpush1.bf16.msra.mxu1 %v4926_v31 }
 0x6de   :  { %2157 = vmatprep.subr.bf16.mxu0 %v4929_v19  ;;  %2198 = vmatprep.subr.bf16.mxu1 %v6250_v26 }
 0x6e1   :  { %2158 = vmatpush1.bf16.msra.mxu0 %v6251_v12  ;;  %2199 = vmatpush1.bf16.msra.mxu1 %v6252_v60 }
 0x6e2   :  { %2159 = vmatprep.subr.bf16.mxu0 %v6253_v3  ;;  %2200 = vmatprep.subr.bf16.mxu1 %v6254_v61 }
 0x6e5   :  { %2160 = vmatpush1.bf16.msra.mxu0 %v6255_v0  ;;  %2201 = vmatpush1.bf16.msra.mxu1 %v6256_v2 }
 0x6e6   :  { %2161 = vmatprep.subr.bf16.mxu0 %v6257_v21  ;;  %2202 = vmatprep.subr.bf16.mxu1 %v6258_v29 }
 0x6e9   :  { %2162 = vmatpush1.bf16.msra.mxu0 %v4959_v16  ;;  %2203 = vmatpush1.bf16.msra.mxu1 %v4962_v27 }
 0x6ea   :  { %2163 = vmatprep.subr.bf16.mxu0 %v4965_v22  ;;  %2204 = vmatprep.subr.bf16.mxu1 %v4968_v20 }
 0x6ed   :  { %2164 = vmatpush1.bf16.msra.mxu0 %v4971_v42  ;;  %2205 = vmatpush1.bf16.msra.mxu1 %v4974_v33 }
 0x6ee   :  { %2254 = vmatprep.subr.bf16.mxu0 %v5093_v30  ;;  %2295 = vmatprep.subr.bf16.mxu1 %v5096_v34 }
 0x6f0   :  { %2182 = vmatmul.mubr.bf16.vlgmr.msra.gmra.mrb[64].mxu0 %v2047_v7  ;;  %2223 = vmatmul.mubr.bf16.vlgmr.msra.gmra.mrb[64].mxu1 %v2047_v7  ;;  %v5165_v7 = vld [vmem:[#allocation4 + $0xc4] ss:$16 sps:$4 sm:$0xff]  }
 0x6f1   :  { %2255 = vmatpush1.bf16.msra.mxu0 %v5099_v35  ;;  %2296 = vmatpush1.bf16.msra.mxu1 %v5102_v37  ;;  %6273 = vst [vmem:[#allocation65_spill] sm:$0xff] %v5165_v7 }
 0x6f2   :  { %2256 = vmatprep.subr.bf16.mxu0 %v5105_v38  ;;  %2297 = vmatprep.subr.bf16.mxu1 %v5108_v40 }
 0x6f5   :  { %2257 = vmatpush1.bf16.msra.mxu0 %v5111_v43  ;;  %2298 = vmatpush1.bf16.msra.mxu1 %v5114_v45 }
 0x6f6   :  { %2258 = vmatprep.subr.bf16.mxu0 %v5117_v46  ;;  %2299 = vmatprep.subr.bf16.mxu1 %v5120_v47 }
 0x6f9   :  { %2259 = vmatpush1.bf16.msra.mxu0 %v5123_v8  ;;  %2300 = vmatpush1.bf16.msra.mxu1 %v5126_v48 }
 0x6fa   :  { %2260 = vmatprep.subr.bf16.mxu0 %v5129_v50  ;;  %2301 = vmatprep.subr.bf16.mxu1 %v5132_v51 }
 0x6fd   :  { %2261 = vmatpush1.bf16.msra.mxu0 %v5135_v52  ;;  %2302 = vmatpush1.bf16.msra.mxu1 %v5138_v6 }
 0x6fe   :  { %2262 = vmatprep.subr.bf16.mxu0 %v5141_v62  ;;  %2303 = vmatprep.subr.bf16.mxu1 %v5144_v14 }
 0x701   :  { %2263 = vmatpush1.bf16.msra.mxu0 %v5147_v63  ;;  %2304 = vmatpush1.bf16.msra.mxu1 %v5150_v10  ;;  %v5168_v10 = vld [vmem:[#allocation4 + $0xcc] ss:$16 sps:$4 sm:$0xff]  }
 0x702   :  { %2264 = vmatprep.subr.bf16.mxu0 %v5153_v57  ;;  %2305 = vmatprep.subr.bf16.mxu1 %v5156_v23  ;;  %6274 = vst [vmem:[#allocation66_spill] sm:$0xff] %v5168_v10  ;;  %v5171_v57 = vld [vmem:[#allocation4 + $0xc0] ss:$16 sps:$4 sm:$0xff]   ;;  %v5174_v23 = vld [vmem:[#allocation4 + $0xc8] ss:$16 sps:$4 sm:$0xff]  }
 0x703   :  { %6275 = vst [vmem:[#allocation67_spill] sm:$0xff] %v5171_v57  ;;  %6276 = vst [vmem:[#allocation39_spill] sm:$0xff] %v5174_v23 }
 0x705   :  { %2265 = vmatpush1.bf16.msra.mxu0 %v5159_v13  ;;  %2306 = vmatpush1.bf16.msra.mxu1 %v5162_v11  ;;  %v5177_v13 = vld [vmem:[#allocation4 + $0xe4] ss:$16 sps:$4 sm:$0xff]   ;;  %v5180_v11 = vld [vmem:[#allocation4 + $0xec] ss:$16 sps:$4 sm:$0xff]  }
 0x706   :  { %2266 = vmatprep.subr.bf16.mxu0 %v5165_v7  ;;  %2307 = vmatprep.subr.bf16.mxu1 %v5168_v10  ;;  %6277 = vst [vmem:[#allocation40_spill] sm:$0xff] %v5177_v13  ;;  %6278 = vst [vmem:[#allocation41_spill] sm:$0xff] %v5180_v11  ;;  %v5183_v7 = vld [vmem:[#allocation4 + $0xe0] ss:$16 sps:$4 sm:$0xff]   ;;  %v5186_v10 = vld [vmem:[#allocation4 + $0xe8] ss:$16 sps:$4 sm:$0xff]  }
 0x707   :  { %6279 = vst [vmem:[#allocation42_spill] sm:$0xff] %v5183_v7  ;;  %6280 = vst [vmem:[#allocation43_spill] sm:$0xff] %v5186_v10 }
 0x709   :  { %2267 = vmatpush1.bf16.msra.mxu0 %v5171_v57  ;;  %2308 = vmatpush1.bf16.msra.mxu1 %v5174_v23  ;;  %v5189_v57 = vld [vmem:[#allocation4 + $0x104] ss:$16 sps:$4 sm:$0xff]   ;;  %v5192_v23 = vld [vmem:[#allocation4 + $0x10c] ss:$16 sps:$4 sm:$0xff]  }
 0x70a   :  { %2268 = vmatprep.subr.bf16.mxu0 %v5177_v13  ;;  %2309 = vmatprep.subr.bf16.mxu1 %v5180_v11  ;;  %6281 = vst [vmem:[#allocation44_spill] sm:$0xff] %v5189_v57  ;;  %6282 = vst [vmem:[#allocation45_spill] sm:$0xff] %v5192_v23  ;;  %v5195_v13 = vld [vmem:[#allocation4 + $0x100] ss:$16 sps:$4 sm:$0xff]   ;;  %v5198_v11 = vld [vmem:[#allocation4 + $0x108] ss:$16 sps:$4 sm:$0xff]  }
 0x70b   :  { %6283 = vst [vmem:[#allocation46_spill] sm:$0xff] %v5195_v13  ;;  %6284 = vst [vmem:[#allocation47_spill] sm:$0xff] %v5198_v11 }
 0x70d   :  { %2269 = vmatpush1.bf16.msra.mxu0 %v5183_v7  ;;  %2310 = vmatpush1.bf16.msra.mxu1 %v5186_v10  ;;  %v5201_v7 = vld [vmem:[#allocation4 + $0x124] ss:$16 sps:$4 sm:$0xff]   ;;  %v5204_v10 = vld [vmem:[#allocation4 + $0x12c] ss:$16 sps:$4 sm:$0xff]  }
 0x70e   :  { %2270 = vmatprep.subr.bf16.mxu0 %v5189_v57  ;;  %2311 = vmatprep.subr.bf16.mxu1 %v5192_v23  ;;  %6285 = vst [vmem:[#allocation48_spill] sm:$0xff] %v5201_v7  ;;  %6286 = vst [vmem:[#allocation18_spill] sm:$0xff] %v5204_v10  ;;  %v5207_v57 = vld [vmem:[#allocation4 + $0x120] ss:$16 sps:$4 sm:$0xff]   ;;  %v5210_v23 = vld [vmem:[#allocation4 + $0x128] ss:$16 sps:$4 sm:$0xff]  }
 0x70f   :  { %6287 = vst [vmem:[#allocation76_spill] sm:$0xff] %v5207_v57  ;;  %6288 = vst [vmem:[#allocation77_spill] sm:$0xff] %v5210_v23 }
 0x711   :  { %2271 = vmatpush1.bf16.msra.mxu0 %v5195_v13  ;;  %2312 = vmatpush1.bf16.msra.mxu1 %v5198_v11  ;;  %v5213_v13 = vld [vmem:[#allocation4 + $0x144] ss:$16 sps:$4 sm:$0xff]   ;;  %v5216_v11 = vld [vmem:[#allocation4 + $0x14c] ss:$16 sps:$4 sm:$0xff]  }
 0x712   :  { %2272 = vmatprep.subr.bf16.mxu0 %v5201_v7  ;;  %2313 = vmatprep.subr.bf16.mxu1 %v5204_v10  ;;  %6289 = vst [vmem:[#allocation78_spill] sm:$0xff] %v5213_v13  ;;  %6290 = vst [vmem:[#allocation79_spill] sm:$0xff] %v5216_v11  ;;  %v5219_v7 = vld [vmem:[#allocation4 + $0x140] ss:$16 sps:$4 sm:$0xff]   ;;  %v5222_v10 = vld [vmem:[#allocation4 + $0x148] ss:$16 sps:$4 sm:$0xff]  }
 0x713   :  { %6291 = vst [vmem:[#allocation49_spill] sm:$0xff] %v5219_v7  ;;  %6292 = vst [vmem:[#allocation50_spill] sm:$0xff] %v5222_v10 }
 0x715   :  { %2273 = vmatpush1.bf16.msra.mxu0 %v5207_v57  ;;  %2314 = vmatpush1.bf16.msra.mxu1 %v5210_v23  ;;  %v5225_v57 = vld [vmem:[#allocation4 + $0x164] ss:$16 sps:$4 sm:$0xff]   ;;  %v5228_v23 = vld [vmem:[#allocation4 + $0x16c] ss:$16 sps:$4 sm:$0xff]  }
 0x716   :  { %2274 = vmatprep.subr.bf16.mxu0 %v5213_v13  ;;  %2315 = vmatprep.subr.bf16.mxu1 %v5216_v11  ;;  %6293 = vst [vmem:[#allocation51_spill] sm:$0xff] %v5225_v57  ;;  %6294 = vst [vmem:[#allocation52_spill] sm:$0xff] %v5228_v23  ;;  %v5231_v13 = vld [vmem:[#allocation4 + $0x160] ss:$16 sps:$4 sm:$0xff]   ;;  %v5234_v11 = vld [vmem:[#allocation4 + $0x168] ss:$16 sps:$4 sm:$0xff]  }
 0x717   :  { %6295 = vst [vmem:[#allocation53_spill] sm:$0xff] %v5231_v13  ;;  %6296 = vst [vmem:[#allocation54_spill] sm:$0xff] %v5234_v11 }
 0x719   :  { %2275 = vmatpush1.bf16.msra.mxu0 %v5219_v7  ;;  %2316 = vmatpush1.bf16.msra.mxu1 %v5222_v10  ;;  %v5237_v7 = vld [vmem:[#allocation4 + $0x184] ss:$16 sps:$4 sm:$0xff]   ;;  %v5240_v10 = vld [vmem:[#allocation4 + $0x18c] ss:$16 sps:$4 sm:$0xff]  }
 0x71a   :  { %2276 = vmatprep.subr.bf16.mxu0 %v5225_v57  ;;  %2317 = vmatprep.subr.bf16.mxu1 %v5228_v23  ;;  %6297 = vst [vmem:[#allocation55_spill] sm:$0xff] %v5237_v7  ;;  %6298 = vst [vmem:[#allocation56_spill] sm:$0xff] %v5240_v10  ;;  %v5243_v57 = vld [vmem:[#allocation4 + $0x180] ss:$16 sps:$4 sm:$0xff]   ;;  %v5246_v23 = vld [vmem:[#allocation4 + $0x188] ss:$16 sps:$4 sm:$0xff]  }
 0x71b   :  { %6299 = vst [vmem:[#allocation57_spill] sm:$0xff] %v5243_v57  ;;  %6300 = vst [vmem:[#allocation58_spill] sm:$0xff] %v5246_v23 }
 0x71d   :  { %2277 = vmatpush1.bf16.msra.mxu0 %v5231_v13  ;;  %2318 = vmatpush1.bf16.msra.mxu1 %v5234_v11  ;;  %v5249_v13 = vld [vmem:[#allocation4 + $0x1a4] ss:$16 sps:$4 sm:$0xff]   ;;  %v5252_v11 = vld [vmem:[#allocation4 + $0x1ac] ss:$16 sps:$4 sm:$0xff]  }
 0x71e   :  { %2278 = vmatprep.subr.bf16.mxu0 %v5237_v7  ;;  %2319 = vmatprep.subr.bf16.mxu1 %v5240_v10  ;;  %6301 = vst [vmem:[#allocation59_spill] sm:$0xff] %v5249_v13  ;;  %6302 = vst [vmem:[#allocation60_spill] sm:$0xff] %v5252_v11  ;;  %v5255_v7 = vld [vmem:[#allocation4 + $0x1a0] ss:$16 sps:$4 sm:$0xff]   ;;  %v5258_v10 = vld [vmem:[#allocation4 + $0x1a8] ss:$16 sps:$4 sm:$0xff]  }
 0x71f   :  { %6303 = vst [vmem:[#allocation61_spill] sm:$0xff] %v5255_v7  ;;  %6304 = vst [vmem:[#allocation62_spill] sm:$0xff] %v5258_v10 }
 0x721   :  { %2279 = vmatpush1.bf16.msra.mxu0 %v5243_v57  ;;  %2320 = vmatpush1.bf16.msra.mxu1 %v5246_v23  ;;  %v5261_v57 = vld [vmem:[#allocation4 + $0x1c4] ss:$16 sps:$4 sm:$0xff]   ;;  %v5264_v23 = vld [vmem:[#allocation4 + $0x1cc] ss:$16 sps:$4 sm:$0xff]  }
 0x722   :  { %2280 = vmatprep.subr.bf16.mxu0 %v5249_v13  ;;  %2321 = vmatprep.subr.bf16.mxu1 %v5252_v11  ;;  %6305 = vst [vmem:[#allocation8_spill] sm:$0xff] %v5261_v57  ;;  %6306 = vst [vmem:[#allocation9_spill] sm:$0xff] %v5264_v23  ;;  %v5267_v13 = vld [vmem:[#allocation4 + $0x1c0] ss:$16 sps:$4 sm:$0xff]   ;;  %v5270_v11 = vld [vmem:[#allocation4 + $0x1c8] ss:$16 sps:$4 sm:$0xff]  }
 0x723   :  { %6307 = vst [vmem:[#allocation14_spill] sm:$0xff] %v5267_v13  ;;  %6308 = vst [vmem:[#allocation68_spill] sm:$0xff] %v5270_v11 }
 0x725   :  { %2281 = vmatpush1.bf16.msra.mxu0 %v5255_v7  ;;  %2322 = vmatpush1.bf16.msra.mxu1 %v5258_v10  ;;  %v5273_v7 = vld [vmem:[#allocation4 + $0x1e4] ss:$16 sps:$4 sm:$0xff]   ;;  %v5276_v10 = vld [vmem:[#allocation4 + $0x1ec] ss:$16 sps:$4 sm:$0xff]  }
 0x726   :  { %2282 = vmatprep.subr.bf16.mxu0 %v5261_v57  ;;  %2323 = vmatprep.subr.bf16.mxu1 %v5264_v23  ;;  %6309 = vst [vmem:[#allocation69_spill] sm:$0xff] %v5273_v7  ;;  %6310 = vst [vmem:[#allocation70_spill] sm:$0xff] %v5276_v10  ;;  %v5279_v57 = vld [vmem:[#allocation4 + $0x1e0] ss:$16 sps:$4 sm:$0xff]   ;;  %v5282_v23 = vld [vmem:[#allocation4 + $0x1e8] ss:$16 sps:$4 sm:$0xff]  }
 0x727   :  { %6311 = vst [vmem:[#allocation71_spill] sm:$0xff] %v5279_v57  ;;  %6312 = vst [vmem:[#allocation15_spill] sm:$0xff] %v5282_v23 }
 0x729   :  { %2283 = vmatpush1.bf16.msra.mxu0 %v5267_v13  ;;  %2324 = vmatpush1.bf16.msra.mxu1 %v5270_v11 }
 0x72a   :  { %2284 = vmatprep.subr.bf16.mxu0 %v5273_v7  ;;  %2325 = vmatprep.subr.bf16.mxu1 %v5276_v10 }
 0x72d   :  { %2285 = vmatpush1.bf16.msra.mxu0 %v5279_v57  ;;  %2326 = vmatpush1.bf16.msra.mxu1 %v5282_v23 }
 0x72e   :  { %2355 = vmatprep.subr.bf16.mxu0 %v6239_v58  ;;  %2396 = vmatprep.subr.bf16.mxu1 %v6240_v32 }
 0x7a3   :  { %v2082_v11 = vpop.f32.mrb[60].mxu0  ;;  %v2123_v13 = vpop.f32.mrb[60].mxu1 }
 0x7a4   :  { %v2083_v7 = vadd.f32 %v2082_v11, %v6241_v9  ;;  %v2084_v63 = vpop.f32.mrb[61].mxu0  ;;  %v2125_v14 = vpop.f32.mrb[61].mxu1  ;;  %v2124_v58 = vadd.f32 %v2123_v13, %v6244_v44 }
 0x7a5   :  { %v2085_v10 = vadd.f32 %v2084_v63, %v6242_v5  ;;  %v2086_v62 = vpop.f32.mrb[62].mxu0  ;;  %v2127_v6 = vpop.f32.mrb[62].mxu1  ;;  %v2126_v23 = vadd.f32 %v2125_v14, %v6243_v36 }
 0x7a6   :  { %v2130_v52 = vmul.f32 0.5, %v2083_v7  ;;  %v2087_v57 = vpop.f32.mrb[63].mxu0  ;;  %v2128_v51 = vpop.f32.mrb[63].mxu1  ;;  %v2132_v32 = vmul.f32 0.5, %v2124_v58 }
 0x7a7   :  { %v2131_v50 = vmul.f32 0.5, %v2085_v10 }
 0x7a8   :  { %3380 = vtanh.f32 %v2130_v52 }
 0x7a9   :  { %3382 = vtanh.f32 %v2131_v50 }
 0x7aa   :  { %3384 = vtanh.f32 %v2126_v23  ;;  %v6314_v23 = vld [vmem:[#allocation84_spill] sm:$0xff] }
 0x7ab   :  { %3386 = vtanh.f32 %v2132_v32 }
 0x7b2   :  { %v3381_v48 = vpop.eup %3380 }
 0x7b3   :  { %v2136_v11 = vmul.f32 0.5, %v3381_v48  ;;  %v3383_v9 = vpop.eup %3382  ;;  %v6315_v48 = vld [vmem:[#allocation85_spill] sm:$0xff] }
 0x7b4   :  { %v2137_v63 = vmul.f32 0.5, %v3383_v9  ;;  %v3385_v62 = vpop.eup %3384  ;;  %v6316_v9 = vld [vmem:[#allocation86_spill] sm:$0xff] }
 0x7b5   :  { %v2139_v8 = vadd.f32 0.5, %v2136_v11  ;;  %v3387_v50 = vpop.eup %3386 }
 0x7b6   :  { %v2140_v6 = vadd.f32 0.5, %v2137_v63  ;;  %v2138_v52 = vmul.f32 0.5, %v3387_v50  ;;  %v6317_v63 = vld [vmem:[#allocation87_spill] sm:$0xff] }
 0x7b7   :  { %v2144_v7 = vmul.f32 %v3385_v62, %v2139_v8 }
 0x7b8   :  { %v2143_v51 = vmul.f32 %v2140_v6, %v5050_v39  ;;  %v2141_v6 = vadd.f32 0.5, %v2138_v52 }
 0x7ba   :  { %v5292_v10 = vadd.f32 %v2144_v7, %v2143_v51 }
 0x7bc   :  { %6313 = vst [vmem:[#allocation16_spill] sm:$0xff] %v5292_v10  ;;  %3388 = vtanh.f32 %v5292_v10 }
 0x7c3   :  { %v2183_v14 = vpop.f32.mrb[64].mxu0  ;;  %v2224_v57 = vpop.f32.mrb[64].mxu1 }
 0x7c4   :  { %v2231_v13 = vadd.f32 %v2183_v14, %v6314_v23  ;;  %v2233_v58 = vadd.f32 %v2224_v57, %v6315_v48  ;;  %v2185_v11 = vpop.f32.mrb[65].mxu0  ;;  %v2226_v32 = vpop.f32.mrb[65].mxu1 }
 0x7c5   :  { %v2232_v44 = vadd.f32 %v2185_v11, %v6316_v9  ;;  %v2234_v8 = vadd.f32 %v2226_v32, %v6317_v63  ;;  %v2187_v62 = vpop.f32.mrb[66].mxu0  ;;  %v2228_v39 = vpop.f32.mrb[66].mxu1 }
 0x7c6   :  { %v2235_v7 = vmul.f32 0.5, %v2231_v13  ;;  %v2188_v51 = vpop.f32.mrb[67].mxu0  ;;  %v2229_v10 = vpop.f32.mrb[67].mxu1  ;;  %v2237_v57 = vmul.f32 0.5, %v2233_v58 }
 0x7c7   :  { %v3389_v36 = vpop.eup %3388  ;;  %v2236_v50 = vmul.f32 0.5, %v2232_v44  ;;  %v6362_v51 = vld [vmem:[#allocation61_spill] sm:$0xff] }
 0x7c8   :  { %3390 = vtanh.f32 %v2235_v7  ;;  %v2147_v5 = vmul.f32 %v3389_v36, %v2141_v6  ;;  %v6360_v6 = vld [vmem:[#allocation59_spill] sm:$0xff]  ;;  %v6361_v7 = vld [vmem:[#allocation60_spill] sm:$0xff] }
 0x7c9   :  { %3392 = vtanh.f32 %v2236_v50  ;;  %v6363_v50 = vld [vmem:[#allocation62_spill] sm:$0xff] }
 0x7ca   :  { %v2148_v14 = vpack.c.bf16 %v2147_v5, %v2147_v5  ;;  %3394 = vtanh.f32 %v2234_v8 }
 0x7cb   :  { %3396 = vtanh.f32 %v2237_v57  ;;  %v6365_v57 = vld [vmem:[#allocation9_spill] sm:$0xff] }
 0x7cc   :  { %2286 = vmatprep.mubr.bf16.mxu0 %v2148_v14  ;;  %2327 = vmatprep.mubr.bf16.mxu1 %v2148_v14  ;;  %v6364_v14 = vld [vmem:[#allocation8_spill] sm:$0xff] }
 0x7d2   :  { %v3391_v23 = vpop.eup %3390 }
 0x7d3   :  { %v2241_v48 = vmul.f32 0.5, %v3391_v23  ;;  %v3393_v11 = vpop.eup %3392  ;;  %v6366_v23 = vld [vmem:[#allocation14_spill] sm:$0xff] }
 0x7d4   :  { %v2242_v9 = vmul.f32 0.5, %v3393_v11  ;;  %v3395_v52 = vpop.eup %3394  ;;  %v6368_v11 = vld [vmem:[#allocation69_spill] sm:$0xff] }
 0x7d5   :  { %v2244_v32 = vadd.f32 0.5, %v2241_v48  ;;  %v3397_v5 = vpop.eup %3396  ;;  %v6367_v48 = vld [vmem:[#allocation68_spill] sm:$0xff] }
 0x7d6   :  { %v2245_v13 = vadd.f32 0.5, %v2242_v9  ;;  %v2243_v36 = vmul.f32 0.5, %v3397_v5  ;;  %v6370_v9 = vld [vmem:[#allocation71_spill] sm:$0xff] }
 0x7d7   :  { %v2249_v63 = vmul.f32 %v3395_v52, %v2244_v32  ;;  %v6369_v32 = vld [vmem:[#allocation70_spill] sm:$0xff]  ;;  %v6371_v52 = vld [vmem:[#allocation15_spill] sm:$0xff] }
 0x7d8   :  { %v2248_v10 = vmul.f32 %v2245_v13, %v5058_v59  ;;  %v2246_v8 = vadd.f32 0.5, %v2243_v36  ;;  %v6340_v59 = vld [vmem:[#allocation44_spill] sm:$0xff] }
 0x7da   :  { %v5300_v44 = vadd.f32 %v2249_v63, %v2248_v10  ;;  %v6372_v10 = vld [vmem:[#allocation10_spill] sm:$0xff] }
 0x7dc   :  { %3398 = vtanh.f32 %v5300_v44 }
 0x7e6   :  { %v3399_v62 = vpop.eup %3398 }
 0x7e7   :  { %v2252_v58 = vmul.f32 %v3399_v62, %v2246_v8  ;;  %v6373_v62 = vld [vmem:[#allocation11_spill] sm:$0xff] }
 0x7e9   :  { %v2253_v39 = vpack.c.bf16 %v2252_v58, %v2252_v58 }
 0x7eb   :  { %2287 = vmatmul.mubr.bf16.vlgmr.msra.gmra.mrb[68].mxu0 %v2253_v39  ;;  %2328 = vmatmul.mubr.bf16.vlgmr.msra.gmra.mrb[68].mxu1 %v2253_v39 }
 0x7ec   :  { %2356 = vmatpush1.bf16.msra.mxu0 %v4885_v17  ;;  %2397 = vmatpush1.bf16.msra.mxu1 %v4888_v49  ;;  %v6319_v17 = vld [vmem:[#allocation28_spill] sm:$0xff]  ;;  %v6320_v49 = vld [vmem:[#allocation29_spill] sm:$0xff] }
 0x7ed   :  { %2357 = vmatprep.subr.bf16.mxu0 %v4891_v15  ;;  %2398 = vmatprep.subr.bf16.mxu1 %v4894_v25  ;;  %v6321_v15 = vld [vmem:[#allocation30_spill] sm:$0xff]  ;;  %v6322_v25 = vld [vmem:[#allocation31_spill] sm:$0xff] }
 0x7ee   :  { %2387 = vmatprep.mubr.bf16.mxu0 %v5956_v1  ;;  %2428 = vmatprep.mubr.bf16.mxu1 %v5956_v1  ;;  %v6318_v1 = vld [vmem:[#allocation27_spill] sm:$0xff] }
 0x7f0   :  { %2358 = vmatpush1.bf16.msra.mxu0 %v4899_v24  ;;  %2399 = vmatpush1.bf16.msra.mxu1 %v4902_v54  ;;  %v6323_v24 = vld [vmem:[#allocation32_spill] sm:$0xff]  ;;  %v6324_v54 = vld [vmem:[#allocation33_spill] sm:$0xff] }
 0x7f1   :  { %2359 = vmatprep.subr.bf16.mxu0 %v4905_v53  ;;  %2400 = vmatprep.subr.bf16.mxu1 %v4908_v55  ;;  %v6325_v53 = vld [vmem:[#allocation34_spill] sm:$0xff]  ;;  %v6326_v55 = vld [vmem:[#allocation35_spill] sm:$0xff] }
 0x7f4   :  { %2360 = vmatpush1.bf16.msra.mxu0 %v4911_v28  ;;  %2401 = vmatpush1.bf16.msra.mxu1 %v4914_v4  ;;  %v6327_v28 = vld [vmem:[#allocation36_spill] sm:$0xff]  ;;  %v6328_v4 = vld [vmem:[#allocation37_spill] sm:$0xff] }
 0x7f5   :  { %2361 = vmatprep.subr.bf16.mxu0 %v4917_v56  ;;  %2402 = vmatprep.subr.bf16.mxu1 %v4920_v41  ;;  %v6329_v56 = vld [vmem:[#allocation38_spill] sm:$0xff]  ;;  %v6330_v41 = vld [vmem:[#allocation63_spill] sm:$0xff] }
 0x7f8   :  { %2362 = vmatpush1.bf16.msra.mxu0 %v4923_v18  ;;  %2403 = vmatpush1.bf16.msra.mxu1 %v4926_v31  ;;  %v6331_v18 = vld [vmem:[#allocation64_spill] sm:$0xff]  ;;  %v6332_v31 = vld [vmem:[#allocation65_spill] sm:$0xff] }
 0x7f9   :  { %2363 = vmatprep.subr.bf16.mxu0 %v4929_v19  ;;  %2404 = vmatprep.subr.bf16.mxu1 %v6250_v26  ;;  %v6333_v19 = vld [vmem:[#allocation66_spill] sm:$0xff]  ;;  %v6341_v26 = vld [vmem:[#allocation45_spill] sm:$0xff] }
 0x7fc   :  { %2364 = vmatpush1.bf16.msra.mxu0 %v6251_v12  ;;  %2405 = vmatpush1.bf16.msra.mxu1 %v6252_v60  ;;  %v6342_v12 = vld [vmem:[#allocation46_spill] sm:$0xff]  ;;  %v6343_v60 = vld [vmem:[#allocation47_spill] sm:$0xff] }
 0x7fd   :  { %2365 = vmatprep.subr.bf16.mxu0 %v6253_v3  ;;  %2406 = vmatprep.subr.bf16.mxu1 %v6254_v61  ;;  %v6344_v3 = vld [vmem:[#allocation48_spill] sm:$0xff]  ;;  %v6345_v61 = vld [vmem:[#allocation18_spill] sm:$0xff] }
 0x800   :  { %2366 = vmatpush1.bf16.msra.mxu0 %v6255_v0  ;;  %2407 = vmatpush1.bf16.msra.mxu1 %v6256_v2  ;;  %v6346_v0 = vld [vmem:[#allocation76_spill] sm:$0xff]  ;;  %v6347_v2 = vld [vmem:[#allocation77_spill] sm:$0xff] }
 0x801   :  { %2367 = vmatprep.subr.bf16.mxu0 %v6257_v21  ;;  %2408 = vmatprep.subr.bf16.mxu1 %v6258_v29  ;;  %v6348_v21 = vld [vmem:[#allocation78_spill] sm:$0xff]  ;;  %v6349_v29 = vld [vmem:[#allocation79_spill] sm:$0xff] }
 0x804   :  { %2368 = vmatpush1.bf16.msra.mxu0 %v4959_v16  ;;  %2409 = vmatpush1.bf16.msra.mxu1 %v4962_v27  ;;  %v6337_v16 = vld [vmem:[#allocation41_spill] sm:$0xff]  ;;  %v6338_v27 = vld [vmem:[#allocation42_spill] sm:$0xff] }
 0x805   :  { %2369 = vmatprep.subr.bf16.mxu0 %v4965_v22  ;;  %2410 = vmatprep.subr.bf16.mxu1 %v4968_v20  ;;  %v6334_v20 = vld [vmem:[#allocation67_spill] sm:$0xff] }
 0x806   :  { %v6339_v22 = vld [vmem:[#allocation43_spill] sm:$0xff] }
 0x808   :  { %2370 = vmatpush1.bf16.msra.mxu0 %v4971_v42  ;;  %2411 = vmatpush1.bf16.msra.mxu1 %v4974_v33  ;;  %v6335_v42 = vld [vmem:[#allocation39_spill] sm:$0xff]  ;;  %v6336_v33 = vld [vmem:[#allocation40_spill] sm:$0xff] }
 0x809   :  { %2460 = vmatprep.subr.bf16.mxu0 %v5093_v30  ;;  %2501 = vmatprep.subr.bf16.mxu1 %v5096_v34  ;;  %v6350_v30 = vld [vmem:[#allocation49_spill] sm:$0xff]  ;;  %v6351_v34 = vld [vmem:[#allocation50_spill] sm:$0xff] }
 0x80b   :  { %2388 = vmatmul.mubr.bf16.vlgmr.msra.gmra.mrb[72].mxu0 %v2253_v39  ;;  %2429 = vmatmul.mubr.bf16.vlgmr.msra.gmra.mrb[72].mxu1 %v2253_v39 }
 0x80c   :  { %2461 = vmatpush1.bf16.msra.mxu0 %v5099_v35  ;;  %2502 = vmatpush1.bf16.msra.mxu1 %v5102_v37  ;;  %v6352_v35 = vld [vmem:[#allocation51_spill] sm:$0xff]  ;;  %v6353_v37 = vld [vmem:[#allocation52_spill] sm:$0xff] }
 0x80d   :  { %2462 = vmatprep.subr.bf16.mxu0 %v5105_v38  ;;  %2503 = vmatprep.subr.bf16.mxu1 %v5108_v40  ;;  %v6354_v38 = vld [vmem:[#allocation53_spill] sm:$0xff]  ;;  %v6355_v40 = vld [vmem:[#allocation54_spill] sm:$0xff] }
 0x810   :  { %2463 = vmatpush1.bf16.msra.mxu0 %v5111_v43  ;;  %2504 = vmatpush1.bf16.msra.mxu1 %v5114_v45  ;;  %v6356_v43 = vld [vmem:[#allocation55_spill] sm:$0xff]  ;;  %v6357_v45 = vld [vmem:[#allocation56_spill] sm:$0xff] }
 0x811   :  { %2464 = vmatprep.subr.bf16.mxu0 %v5117_v46  ;;  %2505 = vmatprep.subr.bf16.mxu1 %v5120_v47  ;;  %v6358_v46 = vld [vmem:[#allocation57_spill] sm:$0xff]  ;;  %v6359_v47 = vld [vmem:[#allocation58_spill] sm:$0xff] }
 0x814   :  { %2465 = vmatpush1.bf16.msra.mxu0 %v6318_v1  ;;  %2506 = vmatpush1.bf16.msra.mxu1 %v6319_v17 }
 0x815   :  { %2466 = vmatprep.subr.bf16.mxu0 %v6320_v49  ;;  %2507 = vmatprep.subr.bf16.mxu1 %v6321_v15 }
 0x818   :  { %2467 = vmatpush1.bf16.msra.mxu0 %v6322_v25  ;;  %2508 = vmatpush1.bf16.msra.mxu1 %v6323_v24  ;;  %v6374_v24 = vld [vmem:[#allocation12_spill] sm:$0xff] }
 0x819   :  { %2468 = vmatprep.subr.bf16.mxu0 %v6324_v54  ;;  %2509 = vmatprep.subr.bf16.mxu1 %v6325_v53  ;;  %v6375_v53 = vld [vmem:[#allocation13_spill] sm:$0xff] }
 0x81c   :  { %2469 = vmatpush1.bf16.msra.mxu0 %v6326_v55  ;;  %2510 = vmatpush1.bf16.msra.mxu1 %v6327_v28 }
 0x81d   :  { %2470 = vmatprep.subr.bf16.mxu0 %v6328_v4  ;;  %2511 = vmatprep.subr.bf16.mxu1 %v6329_v56 }
 0x820   :  { %2471 = vmatpush1.bf16.msra.mxu0 %v6330_v41  ;;  %2512 = vmatpush1.bf16.msra.mxu1 %v6331_v18 }
 0x821   :  { %2472 = vmatprep.subr.bf16.mxu0 %v6332_v31  ;;  %2513 = vmatprep.subr.bf16.mxu1 %v6333_v19 }
 0x824   :  { %2473 = vmatpush1.bf16.msra.mxu0 %v6334_v20  ;;  %2514 = vmatpush1.bf16.msra.mxu1 %v6335_v42 }
 0x825   :  { %2474 = vmatprep.subr.bf16.mxu0 %v6336_v33  ;;  %2515 = vmatprep.subr.bf16.mxu1 %v6337_v16  ;;  %v6376_v33 = vld [vmem:[#allocation16_spill] sm:$0xff] }
 0x828   :  { %2475 = vmatpush1.bf16.msra.mxu0 %v6338_v27  ;;  %2516 = vmatpush1.bf16.msra.mxu1 %v6339_v22 }
 0x829   :  { %2476 = vmatprep.subr.bf16.mxu0 %v6340_v59  ;;  %2517 = vmatprep.subr.bf16.mxu1 %v6341_v26 }
 0x82c   :  { %2477 = vmatpush1.bf16.msra.mxu0 %v6342_v12  ;;  %2518 = vmatpush1.bf16.msra.mxu1 %v6343_v60  ;;  %v6377_v60 = vld [vmem:[#allocation88_spill] sm:$0xff] }
 0x82d   :  { %2478 = vmatprep.subr.bf16.mxu0 %v6344_v3  ;;  %2519 = vmatprep.subr.bf16.mxu1 %v6345_v61  ;;  %v6378_v61 = vld [vmem:[#allocation89_spill] sm:$0xff] }
 0x830   :  { %2479 = vmatpush1.bf16.msra.mxu0 %v6346_v0  ;;  %2520 = vmatpush1.bf16.msra.mxu1 %v6347_v2 }
 0x831   :  { %2480 = vmatprep.subr.bf16.mxu0 %v6348_v21  ;;  %2521 = vmatprep.subr.bf16.mxu1 %v6349_v29  ;;  %v6379_v29 = vld [vmem:[#allocation90_spill] sm:$0xff] }
 0x834   :  { %2481 = vmatpush1.bf16.msra.mxu0 %v6350_v30  ;;  %2522 = vmatpush1.bf16.msra.mxu1 %v6351_v34  ;;  %v6380_v34 = vld [vmem:[#allocation91_spill] sm:$0xff] }
 0x835   :  { %2482 = vmatprep.subr.bf16.mxu0 %v6352_v35  ;;  %2523 = vmatprep.subr.bf16.mxu1 %v6353_v37 }
 0x838   :  { %2483 = vmatpush1.bf16.msra.mxu0 %v6354_v38  ;;  %2524 = vmatpush1.bf16.msra.mxu1 %v6355_v40 }
 0x839   :  { %2484 = vmatprep.subr.bf16.mxu0 %v6356_v43  ;;  %2525 = vmatprep.subr.bf16.mxu1 %v6357_v45 }
 0x83c   :  { %2485 = vmatpush1.bf16.msra.mxu0 %v6358_v46  ;;  %2526 = vmatpush1.bf16.msra.mxu1 %v6359_v47 }
 0x83d   :  { %2486 = vmatprep.subr.bf16.mxu0 %v6360_v6  ;;  %2527 = vmatprep.subr.bf16.mxu1 %v6361_v7 }
 0x840   :  { %2487 = vmatpush1.bf16.msra.mxu0 %v6362_v51  ;;  %2528 = vmatpush1.bf16.msra.mxu1 %v6363_v50 }
 0x841   :  { %2488 = vmatprep.subr.bf16.mxu0 %v6364_v14  ;;  %2529 = vmatprep.subr.bf16.mxu1 %v6365_v57 }
 0x844   :  { %2489 = vmatpush1.bf16.msra.mxu0 %v6366_v23  ;;  %2530 = vmatpush1.bf16.msra.mxu1 %v6367_v48 }
 0x845   :  { %2490 = vmatprep.subr.bf16.mxu0 %v6368_v11  ;;  %2531 = vmatprep.subr.bf16.mxu1 %v6369_v32 }
 0x848   :  { %2491 = vmatpush1.bf16.msra.mxu0 %v6370_v9  ;;  %2532 = vmatpush1.bf16.msra.mxu1 %v6371_v52 }
 0x8be   :  { %v2288_v13 = vpop.f32.mrb[68].mxu0  ;;  %v2329_v63 = vpop.f32.mrb[68].mxu1 }
 0x8bf   :  { %v2289_v5 = vadd.f32 %v2288_v13, %v6372_v10  ;;  %v2290_v36 = vpop.f32.mrb[69].mxu0  ;;  %v2331_v8 = vpop.f32.mrb[69].mxu1  ;;  %v2330_v55 = vadd.f32 %v2329_v63, %v6375_v53 }
 0x8c0   :  { %v2291_v58 = vadd.f32 %v2290_v36, %v6373_v62  ;;  %v2292_v39 = vpop.f32.mrb[70].mxu0  ;;  %v2333_v1 = vpop.f32.mrb[70].mxu1  ;;  %v2332_v54 = vadd.f32 %v2331_v8, %v6374_v24 }
 0x8c1   :  { %v2336_v17 = vmul.f32 0.5, %v2289_v5  ;;  %v2293_v49 = vpop.f32.mrb[71].mxu0  ;;  %v2334_v15 = vpop.f32.mrb[71].mxu1  ;;  %v2338_v28 = vmul.f32 0.5, %v2330_v55  ;;  %v3255_v55 = vld [vmem:[%s5521_s6 + $0x28] sm:$0xff]  }
 0x8c2   :  { %v2337_v25 = vmul.f32 0.5, %v2291_v58  ;;  %v3676_v49 = vmov 0.0   ;;  %v3252_v15 = vld [vmem:[%s5521_s6 + $0x10] sm:$0xff]  }
 0x8c3   :  { %3400 = vtanh.f32 %v2336_v17  ;;  %v3250_v17 = vld [vmem:[%s5521_s6] sm:$0xff]   ;;  %3036 = vmatprep.subr.bf16.mxu0 %v3676_v49  ;;  %3056 = vmatprep.subr.bf16.mxu1 %v3676_v49 }
 0x8c4   :  { %3402 = vtanh.f32 %v2337_v25  ;;  %v3253_v25 = vld [vmem:[%s5521_s6 + $0x18] sm:$0xff]  }
 0x8c5   :  { %3404 = vtanh.f32 %v2332_v54  ;;  %v3254_v54 = vld [vmem:[%s5521_s6 + $0x20] sm:$0xff]  }
 0x8c6   :  { %3406 = vtanh.f32 %v2338_v28  ;;  %v3256_v28 = vld [vmem:[%s5521_s6 + $0x30] sm:$0xff]  }
 0x8cd   :  { %v3401_v4 = vpop.eup %3400 }
 0x8ce   :  { %v2342_v56 = vmul.f32 0.5, %v3401_v4  ;;  %v3403_v41 = vpop.eup %3402  ;;  %v3257_v4 = vld [vmem:[%s5521_s6 + $0x38] sm:$0xff]  }
 0x8cf   :  { %v2343_v31 = vmul.f32 0.5, %v3403_v41  ;;  %v3405_v19 = vpop.eup %3404  ;;  %v3259_v41 = vld [vmem:[%s5523_s8 + $0x8] sm:$0xff]  }
 0x8d0   :  { %v2345_v18 = vadd.f32 0.5, %v2342_v56  ;;  %v3407_v22 = vpop.eup %3406  ;;  %v3258_v56 = vld [vmem:[%s5523_s8] sm:$0xff]  }
 0x8d1   :  { %v2346_v20 = vadd.f32 0.5, %v2343_v31  ;;  %v2344_v59 = vmul.f32 0.5, %v3407_v22  ;;  %v3261_v31 = vld [vmem:[%s5523_s8 + $0x18] sm:$0xff]  }
 0x8d2   :  { %v2350_v42 = vmul.f32 %v3405_v19, %v2345_v18  ;;  %v3260_v18 = vld [vmem:[%s5523_s8 + $0x10] sm:$0xff]   ;;  %v3262_v19 = vld [vmem:[%s5523_s8 + $0x20] sm:$0xff]  }
 0x8d3   :  { %v2349_v16 = vmul.f32 %v2346_v20, %v6376_v33  ;;  %v2347_v40 = vadd.f32 0.5, %v2344_v59  ;;  %v3263_v20 = vld [vmem:[%s5523_s8 + $0x28] sm:$0xff]  }
 0x8d5   :  { %v5404_v27 = vadd.f32 %v2350_v42, %v2349_v16 }
 0x8d7   :  { %3408 = vtanh.f32 %v5404_v27 }
 0x8de   :  { %v2389_v26 = vpop.f32.mrb[72].mxu0  ;;  %v2430_v12 = vpop.f32.mrb[72].mxu1 }
 0x8df   :  { %v2437_v3 = vadd.f32 %v2389_v26, %v6377_v60  ;;  %v2439_v0 = vadd.f32 %v2430_v12, %v6378_v61  ;;  %v2391_v2 = vpop.f32.mrb[73].mxu0  ;;  %v2432_v21 = vpop.f32.mrb[73].mxu1 }
 0x8e0   :  { %v2438_v30 = vadd.f32 %v2391_v2, %v6379_v29  ;;  %v2440_v35 = vadd.f32 %v2432_v21, %v6380_v34  ;;  %v2393_v37 = vpop.f32.mrb[74].mxu0  ;;  %v2434_v38 = vpop.f32.mrb[74].mxu1 }
 0x8e1   :  { %v2441_v43 = vmul.f32 0.5, %v2437_v3  ;;  %v2394_v45 = vpop.f32.mrb[75].mxu0  ;;  %v2435_v46 = vpop.f32.mrb[75].mxu1  ;;  %v2443_v50 = vmul.f32 0.5, %v2439_v0 }
 0x8e2   :  { %v3409_v47 = vpop.eup %3408  ;;  %v2442_v6 = vmul.f32 0.5, %v2438_v30 }
 0x8e3   :  { %3410 = vtanh.f32 %v2441_v43  ;;  %v2353_v7 = vmul.f32 %v3409_v47, %v2347_v40 }
 0x8e4   :  { %3412 = vtanh.f32 %v2442_v6 }
 0x8e5   :  { %v2354_v51 = vpack.c.bf16 %v2353_v7, %v2353_v7  ;;  %3414 = vtanh.f32 %v2440_v35 }
 0x8e6   :  { %3416 = vtanh.f32 %v2443_v50  ;;  %v3264_v50 = vld [vmem:[%s5523_s8 + $0x30] sm:$0xff]  }
 0x8e7   :  { %2492 = vmatprep.mubr.bf16.mxu0 %v2354_v51  ;;  %2533 = vmatprep.mubr.bf16.mxu1 %v2354_v51 }
 0x8ed   :  { %v3411_v14 = vpop.eup %3410 }
 0x8ee   :  { %v2447_v57 = vmul.f32 0.5, %v3411_v14  ;;  %v3413_v23 = vpop.eup %3412  ;;  %v3266_v14 = vld [vmem:[%s5525_s10] sm:$0xff]  }
 0x8ef   :  { %v2448_v11 = vmul.f32 0.5, %v3413_v23  ;;  %v3415_v32 = vpop.eup %3414  ;;  %v2989_v23 = vld [vmem:[%s5522_s7] ss:$0 sm:$0xff] }
 0x8f0   :  { %v2450_v48 = vadd.f32 0.5, %v2447_v57  ;;  %v3417_v5 = vpop.eup %3416  ;;  %v3267_v57 = vld [vmem:[%s5525_s10 + $0x8] sm:$0xff]  }
 0x8f1   :  { %v2451_v9 = vadd.f32 0.5, %v2448_v11  ;;  %v2449_v36 = vmul.f32 0.5, %v3417_v5  ;;  %v3268_v5 = vld [vmem:[%s5525_s10 + $0x10] sm:$0xff]  }
 0x8f2   :  { %v2455_v52 = vmul.f32 %v3415_v32, %v2450_v48 }
 0x8f3   :  { %v2454_v13 = vmul.f32 %v2451_v9, %v5300_v44  ;;  %v2452_v8 = vadd.f32 0.5, %v2449_v36  ;;  %v3251_v44 = vld [vmem:[%s5521_s6 + $0x8] sm:$0xff]   ;;  %v3269_v36 = vld [vmem:[%s5525_s10 + $0x18] sm:$0xff]  }
 0x8f5   :  { %v2456_v63 = vadd.f32 %v2455_v52, %v2454_v13 }
 0x8f7   :  { %3418 = vtanh.f32 %v2456_v63 }
 0x901   :  { %v3419_v58 = vpop.eup %3418 }
 0x902   :  { %v2458_v39 = vmul.f32 %v3419_v58, %v2452_v8  ;;  %v2998_v8 = vld [vmem:[%s5524_s9] ss:$0 sm:$0xff] }
 0x904   :  { %v2459_v1 = vpack.c.bf16 %v2458_v39, %v2458_v39 }
 0x906   :  { %2493 = vmatmul.mubr.bf16.vlgmr.msra.gmra.mrb[76].mxu0 %v2459_v1  ;;  %2534 = vmatmul.mubr.bf16.vlgmr.msra.gmra.mrb[76].mxu1 %v2459_v1 }
 0x907   :  { %3037 = vmatpush3.bf16.msra.mxu0 %v3250_v17  ;;  %3052 = vmatprep.mubr.msk.bf16.mxu0 %vm3677_vm3, %v3676_v49 }
 0x908   :  { %3038 = vmatprep.subr.bf16.mxu0 %v3676_v49  ;;  %3072 = vmatprep.mubr.msk.bf16.mxu1 %vm3677_vm3, %v3676_v49 }
 0x909   :  { %3057 = vmatpush3.bf16.msra.mxu1 %v3258_v56 }
 0x90a   :  { %3058 = vmatprep.subr.bf16.mxu1 %v3676_v49 }
 0x90b   :  { %3039 = vmatpush3.bf16.msra.mxu0 %v3251_v44 }
 0x90c   :  { %3040 = vmatprep.subr.bf16.mxu0 %v3676_v49 }
 0x90d   :  { %3059 = vmatpush3.bf16.msra.mxu1 %v3259_v41 }
 0x90e   :  { %3060 = vmatprep.subr.bf16.mxu1 %v3676_v49 }
 0x90f   :  { %3041 = vmatpush3.bf16.msra.mxu0 %v3252_v15 }
 0x910   :  { %3042 = vmatprep.subr.bf16.mxu0 %v3676_v49 }
 0x911   :  { %3061 = vmatpush3.bf16.msra.mxu1 %v3260_v18 }
 0x912   :  { %3062 = vmatprep.subr.bf16.mxu1 %v3676_v49 }
 0x913   :  { %3043 = vmatpush3.bf16.msra.mxu0 %v3253_v25 }
 0x914   :  { %3044 = vmatprep.subr.bf16.mxu0 %v3676_v49 }
 0x915   :  { %3063 = vmatpush3.bf16.msra.mxu1 %v3261_v31 }
 0x916   :  { %3064 = vmatprep.subr.bf16.mxu1 %v3676_v49 }
 0x917   :  { %3045 = vmatpush3.bf16.msra.mxu0 %v3254_v54 }
 0x918   :  { %3046 = vmatprep.subr.bf16.mxu0 %v3676_v49 }
 0x919   :  { %3065 = vmatpush3.bf16.msra.mxu1 %v3262_v19 }
 0x91a   :  { %3066 = vmatprep.subr.bf16.mxu1 %v3676_v49 }
 0x91b   :  { %3047 = vmatpush3.bf16.msra.mxu0 %v3255_v55 }
 0x91c   :  { %3048 = vmatprep.subr.bf16.mxu0 %v3676_v49 }
 0x91d   :  { %3067 = vmatpush3.bf16.msra.mxu1 %v3263_v20 }
 0x91e   :  { %3068 = vmatprep.subr.bf16.mxu1 %v3676_v49 }
 0x91f   :  { %3049 = vmatpush3.bf16.msra.mxu0 %v3256_v28 }
 0x920   :  { %3050 = vmatprep.subr.bf16.mxu0 %v3676_v49 }
 0x921   :  { %3069 = vmatpush3.bf16.msra.mxu1 %v3264_v50 }
 0x922   :  { %3070 = vmatprep.subr.bf16.mxu1 %v3676_v49 }
 0x923   :  { %3051 = vmatpush3.bf16.msra.mxu0 %v3257_v4 }
 0x924   :  { %3076 = vmatprep.subr.bf16.mxu0 %v3676_v49 }
 0x9d9   :  { %v2494_v42 = vpop.f32.mrb[76].mxu0  ;;  %v2535_v33 = vpop.f32.mrb[76].mxu1 }
 0x9da   :  { %v2495_v16 = vadd.f32 %v2494_v42, %v6372_v10  ;;  %v2496_v22 = vpop.f32.mrb[77].mxu0  ;;  %v2537_v59 = vpop.f32.mrb[77].mxu1  ;;  %v2536_v29 = vadd.f32 %v2535_v33, %v6375_v53 }
 0x9db   :  { %v2497_v26 = vadd.f32 %v2496_v22, %v6373_v62  ;;  %v2498_v12 = vpop.f32.mrb[78].mxu0  ;;  %v2539_v60 = vpop.f32.mrb[78].mxu1  ;;  %v2538_v21 = vadd.f32 %v2537_v59, %v6374_v24 }
 0x9dc   :  { %v2542_v3 = vmul.f32 0.5, %v2495_v16  ;;  %v2499_v61 = vpop.f32.mrb[79].mxu0  ;;  %v2540_v0 = vpop.f32.mrb[79].mxu1  ;;  %v2544_v30 = vmul.f32 0.5, %v2536_v29 }
 0x9dd   :  { %v2543_v2 = vmul.f32 0.5, %v2497_v26 }
 0x9de   :  { %3420 = vtanh.f32 %v2542_v3 }
 0x9df   :  { %3422 = vtanh.f32 %v2543_v2 }
 0x9e0   :  { %3424 = vtanh.f32 %v2538_v21 }
 0x9e1   :  { %3426 = vtanh.f32 %v2544_v30 }
 0x9e8   :  { %v3421_v34 = vpop.eup %3420 }
 0x9e9   :  { %v2548_v10 = vmul.f32 0.5, %v3421_v34  ;;  %v3423_v35 = vpop.eup %3422 }
 0x9ea   :  { %v2549_v62 = vmul.f32 0.5, %v3423_v35  ;;  %v3425_v38 = vpop.eup %3424 }
 0x9eb   :  { %v2551_v37 = vadd.f32 0.5, %v2548_v10  ;;  %v3427_v47 = vpop.eup %3426 }
 0x9ec   :  { %v2552_v40 = vadd.f32 0.5, %v2549_v62  ;;  %v2550_v24 = vmul.f32 0.5, %v3427_v47 }
 0x9ed   :  { %v2556_v43 = vmul.f32 %v3425_v38, %v2551_v37 }
 0x9ee   :  { %v2555_v45 = vmul.f32 %v2552_v40, %v5404_v27  ;;  %v2553_v6 = vadd.f32 0.5, %v2550_v24  ;;  %v3265_v27 = vld [vmem:[%s5523_s8 + $0x38] sm:$0xff]  }
 0x9ef   :  { %3071 = vmatpush3.bf16.msra.mxu1 %v3265_v27 }
 0x9f0   :  { %v2557_v46 = vadd.f32 %v2556_v43, %v2555_v45 }
 0x9f2   :  { %3428 = vtanh.f32 %v2557_v46 }
 0x9fc   :  { %v3429_v7 = vpop.eup %3428 }
 0x9fd   :  { %v2559_v51 = vmul.f32 %v3429_v7, %v2553_v6 }
 0x9ff   :  { %v2560_v53 = vpack.c.bf16 %v2559_v51, %v2559_v51 }
 0xa01   :  { %3053 = vmatmul.mubr.bf16.vlgmr.msra.gmra.mrb[80].mxu0 %v2560_v53 }
 0xa02   :  { %3084 = vmatprep.mubr.msk.bf16.mxu0 %vm3677_vm3, %v3676_v49  ;;  %3077 = vmatpush3.bf16.msra.mxu0 %v3266_v14 }
 0xa03   :  { %3078 = vmatprep.subr.bf16.mxu0 %v3676_v49 }
 0xa06   :  { %3079 = vmatpush3.bf16.msra.mxu0 %v3267_v57 }
 0xa07   :  { %3080 = vmatprep.subr.bf16.mxu0 %v3676_v49 }
 0xa0a   :  { %3081 = vmatpush3.bf16.msra.mxu0 %v3268_v5 }
 0xa0b   :  { %3082 = vmatprep.subr.bf16.mxu0 %v3676_v49  ;;  %v3007_v49 = vld [vmem:[%s5526_s11] ss:$0 sm:$0xff] }
 0xa0e   :  { %3083 = vmatpush3.bf16.msra.mxu0 %v3269_v36 }
 0xad4   :  { %v2666_v48 = vpop.f32.mrb[80].mxu0 }
 0xad5   :  { %v2667_v11 = vadd.f32 %v2989_v23, %v2666_v48  ;;  %v3054_v32 = vpop.f32.mrb[81].mxu0 }
 0xad6   :  { %v2669_v9 = vpop.f32.mrb[82].mxu0 }
 0xad7   :  { %v2672_v52 = vmax.f32 %v2667_v11, 0.0  ;;  %v3055_v13 = vpop.f32.mrb[83].mxu0 }
 0xad9   :  { %v2673_v63 = vpack.c.bf16 %v2672_v52, %v2672_v52 }
 0xadb   :  { %3073 = vmatmul.mubr.bf16.vlgmr.msra.gmra.mrb[80].mxu1 %v2673_v63 }
 0xbae   :  { %v2779_v58 = vpop.f32.mrb[80].mxu1 }
 0xbaf   :  { %v2780_v39 = vadd.f32 %v2998_v8, %v2779_v58  ;;  %v3074_v1 = vpop.f32.mrb[81].mxu1 }
 0xbb0   :  { %v2782_v17 = vpop.f32.mrb[82].mxu1 }
 0xbb1   :  { %v2785_v44 = vmax.f32 %v2780_v39, 0.0  ;;  %v3075_v15 = vpop.f32.mrb[83].mxu1 }
 0xbb3   :  { %v2786_v25 = vpack.c.bf16 %v2785_v44, %v2785_v44 }
 0xbb5   :  { %3085 = vmatmul.mubr.msk.bf16.vlgmr.msra.gmra.mrb[84].mxu0 %vm2826_vm4, %v2786_v25 }
 0xc88   :  { %v2864_v54 = vpop.f32.mrb[84].mxu0 }
 0xc89   :  { %v2865_v55 = vadd.f32 %v3007_v49, %v2864_v54  ;;  %v3086_v28 = vpop.f32.mrb[85].mxu0 }
 0xc8a   :  { %v2867_v4 = vpop.f32.mrb[86].mxu0 }
 0xc8b   :  { %2870 = vst [vmem:[%s5527_s12] sm:$0xff] %v2865_v55  ;;  %v3087_v56 = vpop.f32.mrb[87].mxu0 }
 0xc8c   :  { %2875 = vsyncpa [#allocation3], 1 }
 0xc8d   :  { %2876 = vsyncpa [#allocation5], 1 }

</bundles_post_ra>
